<compile_context>
chip_gen: v5e
topology: v5e:2x2
jax: 0.10.0
libtpu: 0.0.40
codegen_flags: <defaults>
</compile_context>

<pallas_src>
import functools

import jax
import jax.numpy as jnp
from jax.experimental import pallas as pl
from jax.experimental.pallas import tpu as pltpu

_LANE = 128


# ----------------------------------------------------------------------------
# Shared body: BoW-encode both sentences + pair features + MLP head.
# ----------------------------------------------------------------------------
def _pair_logits(x1_ref, x2_ref, w_enc_ref, b_enc_ref, w1_ref, b1_ref,
                 w2_ref, b2_ref):
    f32, bf16 = jnp.float32, jnp.bfloat16
    tb = x1_ref.shape[0]

    # Sum-pool over the sequence (the 1/S of the mean is folded into w_enc at
    # param-build time).  Pool in f32 so the kernel is also fine on v5e (no
    # bf16 VPU there); cast to bf16 only for the MXU LHS.
    p1 = jnp.sum(x1_ref[...].astype(f32), axis=1)                    # [TB, Dw]
    p2 = jnp.sum(x2_ref[...].astype(f32), axis=1)                    # [TB, Dw]

    # Stack both sentences along the sublane axis -> one encoder matmul with
    # M = 2*TB rows (MXU stays throughput-bound instead of latency-bound).
    p = jnp.concatenate([p1, p2], axis=0).astype(bf16)               # [2TB, Dw]
    s = jnp.dot(p, w_enc_ref[...], preferred_element_type=f32) + b_enc_ref[...]
    s1, s2 = s[:tb], s[tb:]                                          # [TB, D]

    # cat([s1, s2, |s1-s2|, s1*s2], 1) @ W1 rewritten as four accumulating
    # matmuls against the four [D, H] row blocks of W1 (no lane concat).
    h_pre = jnp.dot(s1.astype(bf16), w1_ref[0], preferred_element_type=f32)
    h_pre += jnp.dot(s2.astype(bf16), w1_ref[1], preferred_element_type=f32)
    h_pre += jnp.dot(jnp.abs(s1 - s2).astype(bf16), w1_ref[2],
                     preferred_element_type=f32)
    h_pre += jnp.dot((s1 * s2).astype(bf16), w1_ref[3],
                     preferred_element_type=f32)
    h = jnp.tanh(h_pre + b1_ref[...])                                # [TB, H] (EUP)

    logits = jnp.dot(h.astype(bf16), w2_ref[...],
                     preferred_element_type=f32) + b2_ref[...]       # [TB, Cp]
    return logits


# Inference variant: logits only (no cross-entropy work, no loss DMA).
def _logits_kernel(x1_ref, x2_ref, w_enc_ref, b_enc_ref, w1_ref, b1_ref,
                   w2_ref, b2_ref, logits_ref):
    logits_ref[...] = _pair_logits(x1_ref, x2_ref, w_enc_ref, b_enc_ref,
                                   w1_ref, b1_ref, w2_ref, b2_ref)


# Training variant: logits + per-tile cross-entropy partial sum.
def _logits_and_loss_kernel(x1_ref, x2_ref, lbl_ref, w_enc_ref, b_enc_ref,
                            w1_ref, b1_ref, w2_ref, b2_ref,
                            logits_ref, loss_ref, *, n_classes, n_rows):
    logits = _pair_logits(x1_ref, x2_ref, w_enc_ref, b_enc_ref,
                          w1_ref, b1_ref, w2_ref, b2_ref)
    logits_ref[...] = logits                                         # lane-dense store

    tb, cp = logits.shape
    col = jax.lax.broadcasted_iota(jnp.int32, (tb, cp), 1)
    row = jax.lax.broadcasted_iota(jnp.int32, (tb, 1), 0) + pl.program_id(0) * tb
    class_valid = col < n_classes                 # mask padded class lanes
    row_valid = row < n_rows                      # mask padded batch rows (ragged tile)

    masked = jnp.where(class_valid, logits, jnp.float32(-1e30))      # f32-only safe
    m = jnp.max(masked, axis=-1, keepdims=True)
    lse = m + jnp.log(jnp.sum(jnp.exp(masked - m), axis=-1, keepdims=True))
    picked = jnp.sum(jnp.where(col == lbl_ref[...], logits, 0.0),
                     axis=-1, keepdims=True)                         # [TB, 1]
    per_row = jnp.where(row_valid, lse - picked, 0.0)                # [TB, 1]

    # Per-tile partial sum, broadcast into a lane-dense [8, Cp] slab so the
    # batch grid axis stays "parallel" (no cross-step accumulator); the wrapper
    # sums the partials and divides by the true B.
    loss_ref[...] = jnp.full((8, cp), jnp.sum(per_row), dtype=jnp.float32)


# ----------------------------------------------------------------------------
# One-time parameter preparation (NOT per forward call).
# ----------------------------------------------------------------------------
def prepare_params(params, seq_len):
    """bf16-cast weights, fold the mean-pool 1/S into w_enc, split W1 into its
    four [D, H] row blocks (matching the concat order), lane-pad W2/b2."""
    bf16 = jnp.bfloat16
    Dw, D = params["w_enc"].shape
    H = params["w1"].shape[1]
    C = params["w2"].shape[1]
    Cp = pl.cdiv(C, _LANE) * _LANE
    w2_pad = jnp.zeros((H, Cp), jnp.float32).at[:, :C].set(params["w2"])
    b2_pad = jnp.zeros((1, Cp), jnp.float32).at[:, :C].set(params["b2"])
    return {
        "seq_len": int(seq_len),
        "n_classes": int(C),
        "w_enc": (params["w_enc"] / float(seq_len)).astype(bf16),    # [Dw, D]
        "b_enc": params["b_enc"].astype(jnp.float32),                # [1, D]
        "w1": params["w1"].reshape(4, D, H).astype(bf16),            # [4, D, H]
        "b1": params["b1"].astype(jnp.float32),                      # [1, H]
        "w2": w2_pad.astype(bf16),                                   # [H, Cp]
        "b2": b2_pad,                                                # [1, Cp]
    }


# ----------------------------------------------------------------------------
# Wrapper: full MultiTaskModel.forward (pair_input, bow encoder, mlp classifier)
# ----------------------------------------------------------------------------
def multitask_forward(prep, input1, input2, label=None, *, block_b=128):
    B, S, Dw = input1.shape
    assert S == prep["seq_len"], "prepared params were built for a different seq_len"
    D = prep["w_enc"].shape[1]
    H = prep["w1"].shape[2]
    Cp = prep["w2"].shape[1]
    C = prep["n_classes"]

    tb = min(block_b, B)
    num_tiles = pl.cdiv(B, tb)
    b_pad = num_tiles * tb

    bf16 = jnp.bfloat16
    x1 = input1.astype(bf16)
    x2 = input2.astype(bf16)
    if b_pad != B:                                # ragged last tile -> explicit pad
        pad = ((0, b_pad - B), (0, 0), (0, 0))
        x1 = jnp.pad(x1, pad)
        x2 = jnp.pad(x2, pad)

    weight_args = (prep["w_enc"], prep["b_enc"], prep["w1"], prep["b1"],
                   prep["w2"], prep["b2"])
    weight_specs = [                               # constant index_maps: VMEM-resident
        pl.BlockSpec((Dw, D), lambda i: (0, 0)),       # w_enc
        pl.BlockSpec((1, D), lambda i: (0, 0)),        # b_enc
        pl.BlockSpec((4, D, H), lambda i: (0, 0, 0)),  # w1 row blocks
        pl.BlockSpec((1, H), lambda i: (0, 0)),        # b1
        pl.BlockSpec((H, Cp), lambda i: (0, 0)),       # w2 (lane padded)
        pl.BlockSpec((1, Cp), lambda i: (0, 0)),       # b2 (lane padded)
    ]
    x_spec = pl.BlockSpec((tb, S, Dw), lambda i: (i, 0, 0))
    logits_spec = pl.BlockSpec((tb, Cp), lambda i: (i, 0))
    cparams = pltpu.CompilerParams(dimension_semantics=("parallel",))

    if label is None:
        logits_pad = pl.pallas_call(
            _logits_kernel,
            out_shape=jax.ShapeDtypeStruct((b_pad, Cp), jnp.float32),
            grid_spec=pl.GridSpec(
                grid=(num_tiles,),
                in_specs=[x_spec, x_spec] + weight_specs,
                out_specs=logits_spec,
            ),
            compiler_params=cparams,
        )(x1, x2, *weight_args)
        return {"logits": logits_pad[:B, :C]}

    lbl = label.reshape(-1, 1).astype(jnp.int32)
    if b_pad != B:
        lbl = jnp.pad(lbl, ((0, b_pad - B), (0, 0)))

    kernel = functools.partial(_logits_and_loss_kernel, n_classes=C, n_rows=B)
    logits_pad, loss_parts = pl.pallas_call(
        kernel,
        out_shape=(
            jax.ShapeDtypeStruct((b_pad, Cp), jnp.float32),          # padded logits slab
            jax.ShapeDtypeStruct((num_tiles * 8, Cp), jnp.float32),  # per-tile partials
        ),
        grid_spec=pl.GridSpec(
            grid=(num_tiles,),
            in_specs=[x_spec, x_spec, pl.BlockSpec((tb, 1), lambda i: (i, 0))]
                     + weight_specs,
            out_specs=(logits_spec, pl.BlockSpec((8, Cp), lambda i: (i, 0))),
        ),
        compiler_params=cparams,
    )(x1, x2, lbl, *weight_args)

    # Each tile wrote its partial sum into 8 identical rows; take row 0 of each.
    loss = jnp.sum(loss_parts[::8, 0]) / B
    # TODO(synk): scorer1/scorer2 metric bookkeeping (accuracy/pearson/matthews) is
    # host-side Python in the original module and is not part of the kernel.
    return {"logits": logits_pad[:B, :C], "loss": loss}


# Pure-JAX reference (f32) for correctness checking.
def ref_forward(params, input1, input2, label):
    hp = jax.lax.Precision.HIGHEST
    enc = lambda x: jnp.dot(jnp.mean(x, axis=1), params["w_enc"], precision=hp) + params["b_enc"]
    s1, s2 = enc(input1), enc(input2)
    feat = jnp.concatenate([s1, s2, jnp.abs(s1 - s2), s1 * s2], axis=1)
    h = jnp.tanh(jnp.dot(feat, params["w1"], precision=hp) + params["b1"])
    logits = jnp.dot(h, params["w2"], precision=hp) + params["b2"]
    logp = jax.nn.log_softmax(logits, axis=-1)
    loss = -jnp.mean(jnp.take_along_axis(logp, label[:, None], axis=-1))
    return logits, loss


if __name__ == "__main__":
    # Lane-aligned demo shapes: batch=256 (2 grid tiles of 128), seq=8,
    # word/sent/hidden dim=128, classes=3.
    B, S, Dw, D, H, C = 256, 8, 128, 128, 128, 3
    TB = 128

    key = jax.random.PRNGKey(0)
    ks = jax.random.split(key, 8)
    params = {
        "w_enc": jax.random.normal(ks[0], (Dw, D), jnp.float32) * 0.1,
        "b_enc": jax.random.normal(ks[1], (1, D), jnp.float32) * 0.1,
        "w1": jax.random.normal(ks[2], (4 * D, H), jnp.float32) * 0.1,
        "b1": jax.random.normal(ks[3], (1, H), jnp.float32) * 0.1,
        "w2": jax.random.normal(ks[4], (H, C), jnp.float32) * 0.1,
        "b2": jax.random.normal(ks[5], (1, C), jnp.float32) * 0.1,
    }
    input1 = jax.random.normal(ks[6], (B, S, Dw), jnp.float32)
    input2 = jax.random.normal(ks[7], (B, S, Dw), jnp.float32)
    label = jnp.arange(B, dtype=jnp.int32) % C

    prep = prepare_params(params, seq_len=S)      # one-time, outside the fwd path

    # Training-style call (logits + loss).
    out = multitask_forward(prep, input1, input2, label, block_b=TB)
    jax.block_until_ready(out["logits"])
    jax.block_until_ready(out["loss"])

    # Inference-style call (label=None -> loss-free kernel variant).
    out_inf = multitask_forward(prep, input1, input2, None, block_b=TB)
    jax.block_until_ready(out_inf["logits"])

    ref_logits, ref_loss = ref_forward(params, input1, input2, label)
    # bf16 weights/activations with f32 accumulation -> loose-ish tolerance vs f32 ref.
    assert jnp.allclose(out["logits"], ref_logits, atol=5e-2, rtol=5e-2)
    assert jnp.allclose(out_inf["logits"], ref_logits, atol=5e-2, rtol=5e-2)
    assert jnp.allclose(out["loss"], ref_loss, atol=3e-2, rtol=3e-2)

    print("KERNEL_OK")
</pallas_src>

<mosaic_0001>
module attributes {stable_mosaic.version = 11 : i64} {
  func.func @_logits_and_loss_kernel(%arg0: i32, %arg1: memref<128x8x128xbf16, #tpu.memory_space<vmem>>, %arg2: memref<128x8x128xbf16, #tpu.memory_space<vmem>>, %arg3: memref<128x1xi32, #tpu.memory_space<vmem>>, %arg4: memref<128x128xbf16, #tpu.memory_space<vmem>>, %arg5: memref<1x128xf32, #tpu.memory_space<vmem>>, %arg6: memref<4x128x128xbf16, #tpu.memory_space<vmem>>, %arg7: memref<1x128xf32, #tpu.memory_space<vmem>>, %arg8: memref<128x128xbf16, #tpu.memory_space<vmem>>, %arg9: memref<1x128xf32, #tpu.memory_space<vmem>>, %arg10: memref<128x128xf32, #tpu.memory_space<vmem>>, %arg11: memref<8x128xf32, #tpu.memory_space<vmem>>) attributes {dimension_semantics = [#tpu.dimension_semantics<parallel>], iteration_bounds = array<i64: 2>, scalar_prefetch = 0 : i64, scratch_operands = 0 : i64, tpu.core_type = #tpu.core_type<tc>, window_params = [{transform_indices = @transform_0, window_bounds = array<i64: 128, 8, 128>}, {transform_indices = @transform_1, window_bounds = array<i64: 128, 8, 128>}, {transform_indices = @transform_2, window_bounds = array<i64: 128, 1>}, {pipeline_mode = #tpu.pipeline_mode<synchronous>, transform_indices = @transform_3, window_bounds = array<i64: 128, 128>}, {pipeline_mode = #tpu.pipeline_mode<synchronous>, transform_indices = @transform_4, window_bounds = array<i64: 1, 128>}, {pipeline_mode = #tpu.pipeline_mode<synchronous>, transform_indices = @transform_5, window_bounds = array<i64: 4, 128, 128>}, {pipeline_mode = #tpu.pipeline_mode<synchronous>, transform_indices = @transform_6, window_bounds = array<i64: 1, 128>}, {pipeline_mode = #tpu.pipeline_mode<synchronous>, transform_indices = @transform_7, window_bounds = array<i64: 128, 128>}, {pipeline_mode = #tpu.pipeline_mode<synchronous>, transform_indices = @transform_8, window_bounds = array<i64: 1, 128>}, {transform_indices = @transform_9, window_bounds = array<i64: 128, 128>}, {transform_indices = @transform_10, window_bounds = array<i64: 8, 128>}]} {
    %c0 = arith.constant 0 : index
    %c0_0 = arith.constant 0 : index
    %c0_1 = arith.constant 0 : index
    %0 = vector.load %arg1[%c0, %c0_0, %c0_1] : memref<128x8x128xbf16, #tpu.memory_space<vmem>>, vector<128x8x128xbf16>
    %1 = arith.extf %0 : vector<128x8x128xbf16> to vector<128x8x128xf32>
    %cst = arith.constant dense<0.000000e+00> : vector<128x128xf32>
    %2 = vector.multi_reduction <add>, %1, %cst [1] : vector<128x8x128xf32> to vector<128x128xf32>
    %c0_2 = arith.constant 0 : index
    %c0_3 = arith.constant 0 : index
    %c0_4 = arith.constant 0 : index
    %3 = vector.load %arg2[%c0_2, %c0_3, %c0_4] : memref<128x8x128xbf16, #tpu.memory_space<vmem>>, vector<128x8x128xbf16>
    %4 = arith.extf %3 : vector<128x8x128xbf16> to vector<128x8x128xf32>
    %cst_5 = arith.constant dense<0.000000e+00> : vector<128x128xf32>
    %5 = vector.multi_reduction <add>, %4, %cst_5 [1] : vector<128x8x128xf32> to vector<128x128xf32>
    %6 = tpu.concatenate %2, %5 in 0 : vector<128x128xf32>, vector<128x128xf32> -> vector<256x128xf32>
    %7 = arith.truncf %6 : vector<256x128xf32> to vector<256x128xbf16>
    %c0_6 = arith.constant 0 : index
    %c0_7 = arith.constant 0 : index
    %8 = vector.load %arg4[%c0_6, %c0_7] : memref<128x128xbf16, #tpu.memory_space<vmem>>, vector<128x128xbf16>
    %cst_8 = arith.constant dense<0.000000e+00> : vector<256x128xf32>
    %9 = tpu.matmul %7, %8, %cst_8 {dimension_numbers = #tpu.dot_dimension_numbers<[1], [0], [0], [1], [0, 0, 1, 1], [], []>} : vector<256x128xbf16>, vector<128x128xbf16>, vector<256x128xf32> -> vector<256x128xf32>
    %c0_9 = arith.constant 0 : index
    %c0_10 = arith.constant 0 : index
    %10 = vector.load %arg5[%c0_9, %c0_10] : memref<1x128xf32, #tpu.memory_space<vmem>>, vector<1x128xf32>
    %11 = vector.broadcast %10 : vector<1x128xf32> to vector<256x128xf32>
    %12 = arith.addf %9, %11 : vector<256x128xf32>
    %13 = vector.extract_strided_slice %12 {offsets = [0, 0], sizes = [128, 128], strides = [1, 1]} : vector<256x128xf32> to vector<128x128xf32>
    %14 = vector.extract_strided_slice %12 {offsets = [128, 0], sizes = [128, 128], strides = [1, 1]} : vector<256x128xf32> to vector<128x128xf32>
    %15 = arith.truncf %13 : vector<128x128xf32> to vector<128x128xbf16>
    %c0_11 = arith.constant 0 : index
    %c0_12 = arith.constant 0 : index
    %c0_13 = arith.constant 0 : index
    %16 = vector.load %arg6[%c0_11, %c0_12, %c0_13] : memref<4x128x128xbf16, #tpu.memory_space<vmem>>, vector<1x128x128xbf16>
    %17 = vector.shape_cast %16 : vector<1x128x128xbf16> to vector<128x128xbf16>
    %cst_14 = arith.constant dense<0.000000e+00> : vector<128x128xf32>
    %18 = tpu.matmul %15, %17, %cst_14 {dimension_numbers = #tpu.dot_dimension_numbers<[1], [0], [0], [1], [0, 0, 1, 1], [], []>} : vector<128x128xbf16>, vector<128x128xbf16>, vector<128x128xf32> -> vector<128x128xf32>
    %19 = arith.truncf %14 : vector<128x128xf32> to vector<128x128xbf16>
    %c1 = arith.constant 1 : index
    %c0_15 = arith.constant 0 : index
    %c0_16 = arith.constant 0 : index
    %20 = vector.load %arg6[%c1, %c0_15, %c0_16] : memref<4x128x128xbf16, #tpu.memory_space<vmem>>, vector<1x128x128xbf16>
    %21 = vector.shape_cast %20 : vector<1x128x128xbf16> to vector<128x128xbf16>
    %cst_17 = arith.constant dense<0.000000e+00> : vector<128x128xf32>
    %22 = tpu.matmul %19, %21, %cst_17 {dimension_numbers = #tpu.dot_dimension_numbers<[1], [0], [0], [1], [0, 0, 1, 1], [], []>} : vector<128x128xbf16>, vector<128x128xbf16>, vector<128x128xf32> -> vector<128x128xf32>
    %23 = arith.addf %18, %22 : vector<128x128xf32>
    %24 = arith.subf %13, %14 : vector<128x128xf32>
    %25 = math.absf %24 : vector<128x128xf32>
    %26 = arith.truncf %25 : vector<128x128xf32> to vector<128x128xbf16>
    %c2 = arith.constant 2 : index
    %c0_18 = arith.constant 0 : index
    %c0_19 = arith.constant 0 : index
    %27 = vector.load %arg6[%c2, %c0_18, %c0_19] : memref<4x128x128xbf16, #tpu.memory_space<vmem>>, vector<1x128x128xbf16>
    %28 = vector.shape_cast %27 : vector<1x128x128xbf16> to vector<128x128xbf16>
    %cst_20 = arith.constant dense<0.000000e+00> : vector<128x128xf32>
    %29 = tpu.matmul %26, %28, %cst_20 {dimension_numbers = #tpu.dot_dimension_numbers<[1], [0], [0], [1], [0, 0, 1, 1], [], []>} : vector<128x128xbf16>, vector<128x128xbf16>, vector<128x128xf32> -> vector<128x128xf32>
    %30 = arith.addf %23, %29 : vector<128x128xf32>
    %31 = arith.mulf %13, %14 : vector<128x128xf32>
    %32 = arith.truncf %31 : vector<128x128xf32> to vector<128x128xbf16>
    %c3 = arith.constant 3 : index
    %c0_21 = arith.constant 0 : index
    %c0_22 = arith.constant 0 : index
    %33 = vector.load %arg6[%c3, %c0_21, %c0_22] : memref<4x128x128xbf16, #tpu.memory_space<vmem>>, vector<1x128x128xbf16>
    %34 = vector.shape_cast %33 : vector<1x128x128xbf16> to vector<128x128xbf16>
    %cst_23 = arith.constant dense<0.000000e+00> : vector<128x128xf32>
    %35 = tpu.matmul %32, %34, %cst_23 {dimension_numbers = #tpu.dot_dimension_numbers<[1], [0], [0], [1], [0, 0, 1, 1], [], []>} : vector<128x128xbf16>, vector<128x128xbf16>, vector<128x128xf32> -> vector<128x128xf32>
    %36 = arith.addf %30, %35 : vector<128x128xf32>
    %c0_24 = arith.constant 0 : index
    %c0_25 = arith.constant 0 : index
    %37 = vector.load %arg7[%c0_24, %c0_25] : memref<1x128xf32, #tpu.memory_space<vmem>>, vector<1x128xf32>
    %38 = vector.broadcast %37 : vector<1x128xf32> to vector<128x128xf32>
    %39 = arith.addf %36, %38 : vector<128x128xf32>
    %40 = math.tanh %39 : vector<128x128xf32>
    %41 = arith.truncf %40 : vector<128x128xf32> to vector<128x128xbf16>
    %c0_26 = arith.constant 0 : index
    %c0_27 = arith.constant 0 : index
    %42 = vector.load %arg8[%c0_26, %c0_27] : memref<128x128xbf16, #tpu.memory_space<vmem>>, vector<128x128xbf16>
    %cst_28 = arith.constant dense<0.000000e+00> : vector<128x128xf32>
    %43 = tpu.matmul %41, %42, %cst_28 {dimension_numbers = #tpu.dot_dimension_numbers<[1], [0], [0], [1], [0, 0, 1, 1], [], []>} : vector<128x128xbf16>, vector<128x128xbf16>, vector<128x128xf32> -> vector<128x128xf32>
    %c0_29 = arith.constant 0 : index
    %c0_30 = arith.constant 0 : index
    %44 = vector.load %arg9[%c0_29, %c0_30] : memref<1x128xf32, #tpu.memory_space<vmem>>, vector<1x128xf32>
    %45 = vector.broadcast %44 : vector<1x128xf32> to vector<128x128xf32>
    %46 = arith.addf %43, %45 : vector<128x128xf32>
    %c0_31 = arith.constant 0 : index
    %c0_32 = arith.constant 0 : index
    %47 = vector.load %arg10[%c0_31, %c0_32] : memref<128x128xf32, #tpu.memory_space<vmem>>, vector<128x128xf32>
    tpu.vector_store %arg10[%c0_31, %c0_32], %46 {strides = array<i32>} : memref<128x128xf32, #tpu.memory_space<vmem>>, vector<128x128xf32>,
    %48 = tpu.iota {dimensions = array<i32: 1>} : vector<128x128xi32>
    %49 = tpu.iota {dimensions = array<i32: 0>} : vector<128x1xi32>
    %c128_i32 = arith.constant 128 : i32
    %50 = arith.muli %arg0, %c128_i32 : i32
    %51 = vector.broadcast %50 : i32 to vector<128x1xi32>
    %52 = arith.addi %49, %51 : vector<128x1xi32>
    %c3_i32 = arith.constant 3 : i32
    %53 = vector.broadcast %c3_i32 : i32 to vector<128x128xi32>
    %54 = arith.cmpi slt, %48, %53 : vector<128x128xi32>
    %c256_i32 = arith.constant 256 : i32
    %55 = vector.broadcast %c256_i32 : i32 to vector<128x1xi32>
    %56 = arith.cmpi slt, %52, %55 : vector<128x1xi32>
    %cst_33 = arith.constant -1.000000e+30 : f32
    %57 = vector.broadcast %cst_33 : f32 to vector<128x128xf32>
    %58 = arith.select %54, %46, %57 : vector<128x128xi1>, vector<128x128xf32>
    %cst_34 = arith.constant dense<0xFF800000> : vector<128xf32>
    %59 = vector.multi_reduction <maximumf>, %58, %cst_34 [1] : vector<128x128xf32> to vector<128xf32>
    %60 = vector.shape_cast %59 : vector<128xf32> to vector<128x1xf32>
    %61 = vector.broadcast %60 : vector<128x1xf32> to vector<128x128xf32>
    %62 = arith.subf %58, %61 : vector<128x128xf32>
    %63 = math.exp %62 : vector<128x128xf32>
    %cst_35 = arith.constant dense<0.000000e+00> : vector<128xf32>
    %64 = vector.multi_reduction <add>, %63, %cst_35 [1] : vector<128x128xf32> to vector<128xf32>
    %65 = vector.shape_cast %64 : vector<128xf32> to vector<128x1xf32>
    %66 = math.log %65 : vector<128x1xf32>
    %67 = arith.addf %60, %66 : vector<128x1xf32>
    %c0_36 = arith.constant 0 : index
    %c0_37 = arith.constant 0 : index
    %68 = vector.load %arg3[%c0_36, %c0_37] : memref<128x1xi32, #tpu.memory_space<vmem>>, vector<128x1xi32>
    %69 = vector.broadcast %68 : vector<128x1xi32> to vector<128x128xi32>
    %70 = arith.cmpi eq, %48, %69 : vector<128x128xi32>
    %cst_38 = arith.constant 0.000000e+00 : f32
    %71 = vector.broadcast %cst_38 : f32 to vector<128x128xf32>
    %72 = arith.select %70, %46, %71 : vector<128x128xi1>, vector<128x128xf32>
    %cst_39 = arith.constant dense<0.000000e+00> : vector<128xf32>
    %73 = vector.multi_reduction <add>, %72, %cst_39 [1] : vector<128x128xf32> to vector<128xf32>
    %74 = vector.shape_cast %73 : vector<128xf32> to vector<128x1xf32>
    %75 = arith.subf %67, %74 : vector<128x1xf32>
    %cst_40 = arith.constant 0.000000e+00 : f32
    %76 = vector.broadcast %cst_40 : f32 to vector<128x1xf32>
    %77 = arith.select %56, %75, %76 : vector<128x1xi1>, vector<128x1xf32>
    %78 = vector.shape_cast %77 : vector<128x1xf32> to vector<1x128x1xf32>
    %cst_41 = arith.constant dense<0.000000e+00> : vector<1xf32>
    %79 = vector.multi_reduction <add>, %78, %cst_41 [1, 2] : vector<1x128x1xf32> to vector<1xf32>
    %80 = vector.shape_cast %79 : vector<1xf32> to vector<1x1x1xf32>
    %81 = vector.extract %80[0, 0, 0] : f32 from vector<1x1x1xf32>
    %82 = vector.broadcast %81 : f32 to vector<8x128xf32>
    %c0_42 = arith.constant 0 : index
    %c0_43 = arith.constant 0 : index
    %83 = vector.load %arg11[%c0_42, %c0_43] : memref<8x128xf32, #tpu.memory_space<vmem>>, vector<8x128xf32>
    tpu.vector_store %arg11[%c0_42, %c0_43], %82 {strides = array<i32>} : memref<8x128xf32, #tpu.memory_space<vmem>>, vector<8x128xf32>,
    return
  }
  func.func @transform_0(%arg0: i32) -> (i32, i32, i32) {
    %c0_i32 = arith.constant 0 : i32
    %c0_i32_0 = arith.constant 0 : i32
    %c0_i32_1 = arith.constant 0 : i32
    return %arg0, %c0_i32, %c0_i32_0 : i32, i32, i32
  }
  func.func @transform_1(%arg0: i32) -> (i32, i32, i32) {
    %c0_i32 = arith.constant 0 : i32
    %c0_i32_0 = arith.constant 0 : i32
    %c0_i32_1 = arith.constant 0 : i32
    return %arg0, %c0_i32, %c0_i32_0 : i32, i32, i32
  }
  func.func @transform_2(%arg0: i32) -> (i32, i32) {
    %c0_i32 = arith.constant 0 : i32
    %c0_i32_0 = arith.constant 0 : i32
    return %arg0, %c0_i32 : i32, i32
  }
  func.func @transform_3(%arg0: i32) -> (i32, i32) {
    %c0_i32 = arith.constant 0 : i32
    %c0_i32_0 = arith.constant 0 : i32
    %c0_i32_1 = arith.constant 0 : i32
    return %c0_i32, %c0_i32_0 : i32, i32
  }
  func.func @transform_4(%arg0: i32) -> (i32, i32) {
    %c0_i32 = arith.constant 0 : i32
    %c0_i32_0 = arith.constant 0 : i32
    %c0_i32_1 = arith.constant 0 : i32
    return %c0_i32, %c0_i32_0 : i32, i32
  }
  func.func @transform_5(%arg0: i32) -> (i32, i32, i32) {
    %c0_i32 = arith.constant 0 : i32
    %c0_i32_0 = arith.constant 0 : i32
    %c0_i32_1 = arith.constant 0 : i32
    %c0_i32_2 = arith.constant 0 : i32
    return %c0_i32, %c0_i32_0, %c0_i32_1 : i32, i32, i32
  }
  func.func @transform_6(%arg0: i32) -> (i32, i32) {
    %c0_i32 = arith.constant 0 : i32
    %c0_i32_0 = arith.constant 0 : i32
    %c0_i32_1 = arith.constant 0 : i32
    return %c0_i32, %c0_i32_0 : i32, i32
  }
  func.func @transform_7(%arg0: i32) -> (i32, i32) {
    %c0_i32 = arith.constant 0 : i32
    %c0_i32_0 = arith.constant 0 : i32
    %c0_i32_1 = arith.constant 0 : i32
    return %c0_i32, %c0_i32_0 : i32, i32
  }
  func.func @transform_8(%arg0: i32) -> (i32, i32) {
    %c0_i32 = arith.constant 0 : i32
    %c0_i32_0 = arith.constant 0 : i32
    %c0_i32_1 = arith.constant 0 : i32
    return %c0_i32, %c0_i32_0 : i32, i32
  }
  func.func @transform_9(%arg0: i32) -> (i32, i32) {
    %c0_i32 = arith.constant 0 : i32
    %c0_i32_0 = arith.constant 0 : i32
    return %arg0, %c0_i32 : i32, i32
  }
  func.func @transform_10(%arg0: i32) -> (i32, i32) {
    %c0_i32 = arith.constant 0 : i32
    %c0_i32_0 = arith.constant 0 : i32
    return %arg0, %c0_i32 : i32, i32
  }
}

</mosaic_0001>

<bundles_post_ra>
// kernel: tpu_custom_call.1
= control target key start
LH: loop header
LB: loop body
LE: loop exit
PB: predicated region body
PF: predicated region fallthrough
CT: control target
= control target key end

     0   :  { %s8478_s0 = inlined_call_operand.hbm [shape: bf16[256,8,128], index: 0, kind: input, shape index: {}]   ;;  %s8479_s1 = inlined_call_operand.hbm [shape: bf16[256,8,128], index: 1, kind: input, shape index: {}]   ;;  %s8480_s2 = inlined_call_operand.vmem [shape: s32[256,1], index: 2, kind: input, shape index: {}]   ;;  %s8481_s3 = inlined_call_operand.hbm [shape: bf16[128,128], index: 3, kind: input, shape index: {}]   ;;  %s8482_s4 = inlined_call_operand.vmem [shape: f32[1,128], index: 4, kind: input, shape index: {}]   ;;  %s8483_s5 = inlined_call_operand.vmem [shape: bf16[4,128,128], index: 5, kind: input, shape index: {}]   ;;  %s8484_s6 = inlined_call_operand.vmem [shape: f32[1,128], index: 6, kind: input, shape index: {}]   ;;  %s8485_s7 = inlined_call_operand.hbm [shape: bf16[128,128], index: 7, kind: input, shape index: {}]   ;;  %s8486_s8 = inlined_call_operand.vmem [shape: f32[1,128], index: 8, kind: input, shape index: {}]   ;;  %s8487_s9 = inlined_call_operand.hbm [shape: f32[256,128], index: 9, kind: output, shape index: {0}]   ;;  %s8488_s10 = inlined_call_operand.hbm [shape: f32[16,128], index: 10, kind: output, shape index: {1}]  }
   0x1   :  { %8499 = sst [smem:[#allocation24_spill]] %s8478_s0 }
   0x2   :  { %8500 = sst [smem:[#allocation25_spill]] %s8481_s3 }
   0x3   :  { %8501 = sst [smem:[#allocation26_spill]] %s8485_s7 }
   0x4   :  { %8502 = sst [smem:[#allocation27_spill]] %s8488_s10 }
   0x5   :  { %16 = vsyncpa [#allocation3], 0 }
   0x6   :  { %18 = vsyncpa [#allocation3 + $0x1], 0 }
   0x7   :  { %19 = vsyncpa [#allocation6], 0 }
   0x8   :  { %21 = vsyncpa [#allocation6 + $0x1], 0 }
   0x9   :  { %22 = vsyncpa [#allocation9], 0 }
   0xa   :  { %23 = vsyncpa [#allocation4], 0 }
   0xb   :  { %25 = vsyncpa [#allocation4 + $0x1], 0 }
   0xc   :  { %26 = vsyncpa [#allocation12], 0 }
   0xd   :  { %28 = vsyncpa [#allocation12 + $0x1], 0  ;;  %s6073_s13 = smov 0   ;;  %s6075_s14 = smov 0  }
   0xe   :  { %s6077_s15 = smov 0   ;;  %s6079_s16 = smov 0  }
   0xf LB: > { %8503 = sst [smem:[#allocation19_spill]] %s5997_s13  ;;  %s6094_s17 = sadd.s32 4294967295, %s6009_s16   ;;  %s6009_s16 = sphi %s6079_s16, %s8522_s16   ;;  %s6005_s15 = sphi %s6077_s15, %s8524_s15   ;;  %s6001_s14 = sphi %s6075_s14, %s8526_s14   ;;  %s5997_s13 = sphi %s6073_s13, %s8525_s13  }
  0x10   : > { %8504 = sst [smem:[#allocation20_spill]] %s6005_s15  ;;  %s4603_s18 = sadd.s32 4294967294, %s6009_s16  }
  0x11   : > { %p54_p0 = scmp.ne.s32.totalorder %s6001_s14, %s5997_s13  ;;  %p55_p1 = scmp.eq.s32.totalorder %s6094_s17, 0 }
  0x12   : > { %p256_p2 = scmp.eq.s32.totalorder %s6094_s17, 1  ;;  %p262_p3 = scmp.eq.s32.totalorder %s4603_s18, 1 }
  0x13   : > { %p6103_p4 = por %p55_p1, %p54_p0  ;;  %p4604_p5 = scmp.ge.s32.totalorder %s6009_s16, 1 }
  0x14   : > { %p6108_p6 = por %p262_p3, %p54_p0  ;;  %p295_p7 = scmp.lt.s32.totalorder %s6009_s16, 3 }
  0x15   : > { %s8508_s3 = sld [smem:[#allocation25_spill]]  ;;  %s6011_s25 = smov [#allocation7]  }
  0x16   : > { %s8506_s20 = scalar_select %p6108_p6, 1, 0 }
  0x17   : > { %p6116_p8 = pnand %p4604_p5, %p295_p7  ;;  %s308_s26 = sshll.u32 %s6011_s25, 4  ;;  %s309_s26 = int_to_ptr.vmem [resolvable:$true] %s308_s26 }
  0x18   : > { %8507 = sst [smem:[#allocation21_spill]] %s8506_s20  ;;  %s8489_s30 = smov 64  }
  0x19   : > { %p5602_p9 = pneg %p6116_p8  ;;  %s8510_s7 = sld [smem:[#allocation26_spill]] }
  0x1a   : > { %s8491_s11 = smov 4   ;;  %s6014_s12 = smov [#allocation8]  }
  0x1b   : > { %s306_s23 = sshll.u32 %s8508_s3, 4  ;;  %p5603_p10 = pnand %p5602_p9, %p55_p1  ;;  %s307_s23 = int_to_ptr.hbm [resolvable:$true] %s306_s23 }
  0x1c   : > { %s331_s18 = sshll.u32 %s6014_s12, 4  ;;  %s6135_s21 = sadd.s32 1, %s6009_s16   ;;  %s332_s18 = int_to_ptr.vmem [resolvable:$true] %s331_s18 }
  0x1d   : > { %5605 = dma.hbm_to_vmem [thread:$0]  (!%p5603_p10), %s307_s23, 1024, %s309_s26, [#allocation6], %s8489_s30, %s8489_s30, %s8491_s11  }
  0x1e   : > { %8511 = sst [smem:[#allocation22_spill]] %s6135_s21  ;;  %s41_s22 = sadd.s32 1, %s6005_s15 }
  0x1f   : > { %s329_s29 = sshll.u32 %s8510_s7, 4  ;;  %s38_s25 = ssub.s32 %s6009_s16, %s6135_s21  ;;  %s330_s29 = int_to_ptr.hbm [resolvable:$true] %s329_s29 }
  0x20   : > { %5608 = dma.hbm_to_vmem [thread:$0]  (!%p5603_p10), %s330_s29, 1024, %s332_s18, [#allocation9], %s8489_s30, %s8489_s30, %s8491_s11  }
  0x21   : > { %p48_p12 = scmp.ne.s32.totalorder %s6005_s15, %s6001_s14  ;;  %p39_p13 = scmp.eq.s32.totalorder %s38_s25, 0 }
  0x22   : > { %p49_p0 = scmp.eq.s32.totalorder %s6009_s16, 0  ;;  %p5625_p5 = scmp.lt.s32.totalorder %s6009_s16, 2 }
  0x23   : > { %p6145_p3 = por %p256_p2, %p48_p12  ;;  %s348_s26 = sand.u32 1, %s6005_s15  }
  0x24   : > { %s6151_s23 = scalar_select %p39_p13, %s6005_s15, %s41_s22  }
  0x25   : > { %p50_p7 = por %p49_p0, %p48_p12  ;;  %s6154_s28 = sshll.u32 %s348_s26, 9 }
  0x26   : > { %8513 = sst [smem:[#allocation23_spill]] %s6151_s23  ;;  %s4871_s29 = sshll.u32 %s6009_s16, 9 }
  0x27   : > { %s8514_s0 = sld [smem:[#allocation24_spill]]  ;;  %s352_s25 = scalar_lea.vmem [#allocation2], %s6154_s28 }
  0x28   : > { %s360_s11 = sshll.u32 %s352_s25, 4  ;;  %p6161_p2 = pnand %p5625_p5, %p50_p7  ;;  %s361_s11 = int_to_ptr.vmem [resolvable:$true] %s360_s11 }
  0x29   : > { %s379_s15 = scalar_lea.hbm %s8479_s1, %s4871_s29  ;;  %s349_s20 = scalar_lea.sflag [#allocation3], %s348_s26 }
  0x2a   : > { %s380_s21 = sshll.u32 %s379_s15, 4  ;;  %p5843_p10 = pneg %p6161_p2  ;;  %s381_s21 = int_to_ptr.hbm [resolvable:$true] %s380_s21 }
  0x2d   : > { %s357_s30 = scalar_lea.hbm %s8514_s0, %s4871_s29  ;;  %s5846_s25 = scalar_lea.hbm %s8514_s0, 1024 }
  0x2e   : > { %s358_s3 = sshll.u32 %s357_s30, 4  ;;  %s359_s3 = int_to_ptr.hbm [resolvable:$true] %s358_s3 }
  0x2f   : > { %s5839_s13 = sshra.s32 %s359_s3, 4  ;;  %s5840_s13 = int_to_ptr.hbm [resolvable:$true] %s5839_s13 }
  0x30   : > { %s5841_s12 = scalar_lea.hbm %s5840_s13, 512  ;;  %p5847_p0 = scmp.lt.s32.totalorder %s5840_s13, %s8514_s0 }
  0x31   : > { %p5842_p9 = scmp.ne.s32.totalorder %s5840_s13, %s5841_s12  ;;  %p5848_p5 = scmp.lt.s32.totalorder %s5846_s25, %s5841_s12 }
  0x33   : > { %p5844_p12 = pnand %p5843_p10, %p5842_p9  ;;  %p5849_p7 = por %p5848_p5, %p5847_p0 }
  0x35   : > { %p5845_p13 = pneg %p5844_p12 }
  0x37   : > { %p5850_p11 = pnand %p5849_p7, %p5845_p13 }
  0x39   : > { %5853 = shalt.err (!%p5850_p11)
}
  0x3a   : > { %s8516_s15 = smov 4   ;;  %s8517_s26 = smov 64  }
  0x3b   : > { %5612 = dma.hbm_to_vmem [thread:$0]  (!%p6161_p2), %s359_s3, 8192, %s361_s11, %s349_s20, %s8517_s26, %s8517_s26, %s8516_s15  }
  0x3c   : > { %s374_s29 = scalar_lea.vmem [#allocation5], %s6154_s28  ;;  %s370_s18 = sand.u32 1, %s6009_s16  }
  0x3d   : > { %s382_s30 = sshll.u32 %s374_s29, 4  ;;  %s371_s23 = scalar_lea.sflag [#allocation6], %s370_s18  ;;  %s383_s30 = int_to_ptr.vmem [resolvable:$true] %s382_s30 }
  0x3e   : > { %s5869_s13 = sshra.s32 %s381_s21, 4  ;;  %s5876_s0 = scalar_lea.hbm %s8479_s1, 1024  ;;  %s5870_s13 = int_to_ptr.hbm [resolvable:$true] %s5869_s13 }
  0x3f   : > { %s5871_s12 = scalar_lea.hbm %s5870_s13, 512  ;;  %p5877_p13 = scmp.lt.s32.totalorder %s5870_s13, %s8479_s1 }
  0x40   : > { %p5872_p9 = scmp.ne.s32.totalorder %s5870_s13, %s5871_s12  ;;  %p5878_p0 = scmp.lt.s32.totalorder %s5876_s0, %s5871_s12 }
  0x42   : > { %p5874_p11 = pnand %p5872_p9, %p5843_p10  ;;  %p5879_p5 = por %p5878_p0, %p5877_p13 }
  0x44   : > { %p5875_p12 = pneg %p5874_p11 }
  0x46   : > { %p5880_p7 = pnand %p5879_p5, %p5875_p12 }
  0x48   : > { %5883 = shalt.err (!%p5880_p7)
}
  0x49   : > { %5615 = dma.hbm_to_vmem [thread:$0]  (!%p6161_p2), %s381_s21, 8192, %s383_s30, %s371_s23, %s8517_s26, %s8517_s26, %s8516_s15  }
  0x4a   : > { %403 = sbr.rel (%p6116_p8) target bundleno = 1612 (0x64c), region = 56  ;;  %s6203_s20 = sand.u32 (!%p6116_p8), 1, %s6001_s14  }
  0x4b   : > { %s4615_s10 = sshll.u32 (!%p6116_p8), %s6203_s20, 9  ;;  %s406_s0 = scalar_lea.sflag (!%p6116_p8), [#allocation3], %s6203_s20 }
  0x4c   : > { %s6207_s11 = scalar_lea.vmem (!%p6116_p8), [#allocation2], %s4615_s10 }
  0x4f   : > { %5972 = dma.done.wait (%p6103_p4), %s406_s0, 8192  }
  0x50   : > { %5974 = vsyncadd (%p6103_p4), %s406_s0, 4294959104  ;;  %s415_s7 = sand.u32 1, %s6094_s17   ;;  %s6214_s21 = scalar_lea.vmem [#allocation5], %s4615_s10 }
  0x51   : > { %s416_s24 = scalar_lea.sflag [#allocation6], %s415_s7 }
  0x52   : > { %5976 = dma.done.wait (%p6103_p4), %s416_s24, 8192  }
  0x53   : > { %5978 = vsyncadd (%p6103_p4), %s416_s24, 4294959104 }
  0x54   : > { %5980 = dma.done.wait (%p55_p1), [#allocation6], 1024  }
  0x55   : > { %5982 = vsyncadd (%p55_p1), [#allocation6], 4294966272 }
  0x56   : > { %5984 = dma.done.wait (%p55_p1), [#allocation9], 1024  }
  0x57   : > { %5986 = vsyncadd (%p55_p1), [#allocation9], 4294966272  ;;  %v4880_v0 = vld [vmem:[#allocation7 + $0x38] sm:$0xff]  ;;  %v4879_v1 = vld [vmem:[#allocation7 + $0x30] sm:$0xff]  ;;  %vm2667_vm0 = vcmask 1041409   ;;  %vm2669_vm1 = vcmask 1042434  }
  0x58   : > { %3142 = vmatpush.bf16.msra.mxu0 %v4880_v0  ;;  %v4923_v2 = vld [vmem:[%s6207_s11] sm:$0xff]   ;;  %5560 = vmatpush.bf16.msra.mxu3 %v4880_v0  ;;  %v5434_v5 = vld [vmem:[%s6207_s11 + $0x8] sm:$0xff]   ;;  %v5435_v6 = vld [vmem:[%s6207_s11 + $0x10] sm:$0xff]   ;;  %vm2671_vm2 = vcmask 1043459   ;;  %vm2673_vm3 = vcmask 1044484   ;;  %vm2675_vm4 = vcmask 1045509  }
  0x59   : > { %v4924_v3 = vunpack.c.l.bf16 %v4923_v2  ;;  %v4925_v4 = vunpack.c.h.bf16 %v4923_v2  ;;  %v5436_v7 = vld [vmem:[%s6207_s11 + $0x18] sm:$0xff]   ;;  %v4928_v8 = vunpack.c.l.bf16 %v5434_v5  ;;  %v4929_v9 = vunpack.c.h.bf16 %v5434_v5  ;;  %v6233_v12 = vld [vmem:[%s6207_s11 + $0x20] sm:$0xff]   ;;  %v6236_v13 = vld [vmem:[%s6207_s11 + $0x28] sm:$0xff]   ;;  %s4621_s25 = sshll.u32 %s6094_s17, 4  ;;  %s4619_s7 = sshll.u32 %s6203_s20, 7 }
  0x5a   : > { %v4932_v10 = vunpack.c.l.bf16 %v5435_v6  ;;  %v4933_v11 = vunpack.c.h.bf16 %v5435_v6  ;;  %v6239_v14 = vld [vmem:[%s6207_s11 + $0x30] sm:$0xff]   ;;  %v4936_v15 = vunpack.c.l.bf16 %v5436_v7  ;;  %v4937_v16 = vunpack.c.h.bf16 %v5436_v7  ;;  %v6244_v19 = vld [vmem:[%s6207_s11 + $0x38] sm:$0xff]   ;;  %v4878_v20 = vld [vmem:[#allocation7 + $0x28] sm:$0xff]  ;;  %p485_p1 = scmp.lt.s32.totalorder %s4621_s25, 31  ;;  %s8072_s28 = scalar_lea.vmem [#allocation10], %s4619_s7 }
  0x5b   : > { %v4940_v17 = vunpack.c.l.bf16 %v6233_v12  ;;  %v4941_v18 = vunpack.c.h.bf16 %v6233_v12  ;;  %v4944_v21 = vunpack.c.l.bf16 %v6236_v13  ;;  %v4945_v22 = vunpack.c.h.bf16 %v6236_v13  ;;  %v4877_v37 = vld [vmem:[#allocation7 + $0x20] sm:$0xff]  ;;  %v4876_v54 = vld [vmem:[#allocation7 + $0x18] sm:$0xff]  ;;  %v4875_v7 = vld [vmem:[#allocation7 + $0x10] sm:$0xff]  ;;  %s4863_s15 = sshll.u32 %s6094_s17, 7  ;;  %s4426_s23 = sshll.u32 %s8072_s28, 4  ;;  %s4427_s23 = int_to_ptr.vmem [resolvable:$true] %s4426_s23 }
  0x5c   : > { %3143 = vmatpush.bf16.msra.mxu0 %v4879_v1  ;;  %v4948_v23 = vunpack.c.l.bf16 %v6239_v14  ;;  %v4949_v24 = vunpack.c.h.bf16 %v6239_v14  ;;  %5561 = vmatpush.bf16.msra.mxu3 %v4879_v1  ;;  %v4952_v25 = vunpack.c.l.bf16 %v6244_v19  ;;  %v4953_v26 = vunpack.c.h.bf16 %v6244_v19  ;;  %s8528_s25 = smov (!%p485_p1, %s4621_s25), 31  ;;  %s4425_s30 = scalar_lea.hbm %s8487_s9, %s4863_s15 }
  0x5d   : > { %v747_v27 = vrot.slane %v4924_v3, 4  ;;  %v753_v28 = vrot.slane %v4925_v4, 4  ;;  %v759_v29 = vrot.slane %v4928_v8, 4  ;;  %v765_v30 = vrot.slane %v4929_v9, 4  ;;  %s4622_s22 = sshll.u32 %s8528_s25, 3  ;;  %s4428_s18 = sshll.u32 %s4425_s30, 4  ;;  %s4429_s18 = int_to_ptr.hbm [resolvable:$true] %s4428_s18 }
  0x5e   : > { %v771_v31 = vrot.slane %v4932_v10, 4  ;;  %v777_v32 = vrot.slane %v4933_v11, 4  ;;  %v783_v35 = vrot.slane %v4936_v15, 4  ;;  %v789_v36 = vrot.slane %v4937_v16, 4  ;;  %s7995_s10 = scalar_lea.vmem %s8480_s2, %s4622_s22  ;;  %s4409_s13 = scalar_lea.sflag [#allocation4], %s6203_s20 }
  0x5f   : > { %v748_v33 = vadd.f32 %v4924_v3, %v747_v27  ;;  %v754_v34 = vadd.f32 %v4925_v4, %v753_v28  ;;  %v760_v38 = vadd.f32 %v4928_v8, %v759_v29  ;;  %v766_v39 = vadd.f32 %v4929_v9, %v765_v30  ;;  %s5913_s12 = sshra.s32 %s4429_s18, 4  ;;  %s5919_s3 = scalar_lea.hbm %s8487_s9, 256  ;;  %s5914_s12 = int_to_ptr.hbm [resolvable:$true] %s5913_s12 }
  0x60   : > { %3144 = vmatpush.bf16.msra.mxu0 %v4878_v20  ;;  %v772_v40 = vadd.f32 %v4932_v10, %v771_v31  ;;  %v778_v41 = vadd.f32 %v4933_v11, %v777_v32  ;;  %v784_v44 = vadd.f32 %v4936_v15, %v783_v35  ;;  %v790_v45 = vadd.f32 %v4937_v16, %v789_v36  ;;  %v4874_v36 = vld [vmem:[#allocation7 + $0x8] sm:$0xff]  ;;  %s5915_s25 = scalar_lea.hbm %s5914_s12, 128  ;;  %p5920_p10 = scmp.lt.s32.totalorder %s5914_s12, %s8487_s9 }
  0x61   : > { %v749_v42 = vrot.slane %v748_v33, 2  ;;  %v755_v43 = vrot.slane %v754_v34, 2  ;;  %5562 = vmatpush.bf16.msra.mxu3 %v4878_v20  ;;  %v761_v46 = vrot.slane %v760_v38, 2  ;;  %v767_v47 = vrot.slane %v766_v39, 2  ;;  %p5916_p4 = scmp.ne.s32.totalorder %s5914_s12, %s5915_s25  ;;  %p5921_p9 = scmp.lt.s32.totalorder %s5919_s3, %s5915_s25 }
  0x62   : > { %v773_v48 = vrot.slane %v772_v40, 2  ;;  %v779_v49 = vrot.slane %v778_v41, 2  ;;  %v785_v52 = vrot.slane %v784_v44, 2  ;;  %v791_v53 = vrot.slane %v790_v45, 2 }
  0x63   : > { %v750_v50 = vadd.f32 %v749_v42, %v748_v33  ;;  %v756_v51 = vadd.f32 %v755_v43, %v754_v34  ;;  %v762_v55 = vadd.f32 %v761_v46, %v760_v38  ;;  %v768_v56 = vadd.f32 %v767_v47, %v766_v39  ;;  %p5917_p8 = pnand %p5916_p4, %p6145_p3  ;;  %p5922_p11 = por %p5921_p9, %p5920_p10 }
  0x64   : > { %3145 = vmatpush.bf16.msra.mxu0 %v4877_v37  ;;  %v774_v57 = vadd.f32 %v773_v48, %v772_v40  ;;  %v780_v58 = vadd.f32 %v779_v49, %v778_v41  ;;  %v786_v61 = vadd.f32 %v785_v52, %v784_v44  ;;  %v792_v62 = vadd.f32 %v791_v53, %v790_v45  ;;  %v4873_v44 = vld [vmem:[#allocation7] sm:$0xff] }
  0x65   : > { %v751_v59 = vrot.slane %v750_v50, 1  ;;  %v757_v60 = vrot.slane %v756_v51, 1  ;;  %5563 = vmatpush.bf16.msra.mxu3 %v4877_v37  ;;  %v763_v63 = vrot.slane %v762_v55, 1  ;;  %v769_v0 = vrot.slane %v768_v56, 1  ;;  %p5918_p2 = pneg %p5917_p8 }
  0x66   : > { %v775_v1 = vrot.slane %v774_v57, 1  ;;  %v781_v2 = vrot.slane %v780_v58, 1  ;;  %v787_v5 = vrot.slane %v786_v61, 1  ;;  %v793_v6 = vrot.slane %v792_v62, 1 }
  0x67   : > { %v6252_v3 = vadd.f32 %v751_v59, %v750_v50  ;;  %v6254_v4 = vadd.f32 %v757_v60, %v756_v51  ;;  %v6256_v8 = vadd.f32 %v763_v63, %v762_v55  ;;  %v6258_v9 = vadd.f32 %v769_v0, %v768_v56  ;;  %v5442_v63 = vld [vmem:[%s6207_s11 + $0x48] sm:$0xff]   ;;  %p5923_p12 = pnand %p5922_p11, %p5918_p2 }
  0x68   : > { %3146 = vmatpush.bf16.msra.mxu0 %v4876_v54  ;;  %v6260_v10 = vadd.f32 %v775_v1, %v774_v57  ;;  %v6262_v11 = vadd.f32 %v781_v2, %v780_v58  ;;  %v6264_v15 = vadd.f32 %v787_v5, %v786_v61  ;;  %v6266_v16 = vadd.f32 %v793_v6, %v792_v62  ;;  %v5441_v58 = vld [vmem:[%s6207_s11 + $0x40] sm:$0xff]   ;;  %v5443_v5 = vld [vmem:[%s6207_s11 + $0x50] sm:$0xff]  }
  0x69   : > { %v795_v20 = vrot.slane %v4940_v17, 4  ;;  %v801_v27 = vrot.slane %v4941_v18, 4  ;;  %5564 = vmatpush.bf16.msra.mxu3 %v4876_v54  ;;  %v807_v28 = vrot.slane %v4944_v21, 4  ;;  %v813_v29 = vrot.slane %v4945_v22, 4 }
  0x6a   : > { %v819_v30 = vrot.slane %v4948_v23, 4  ;;  %v825_v31 = vrot.slane %v4949_v24, 4  ;;  %v831_v34 = vrot.slane %v4952_v25, 4  ;;  %v837_v35 = vrot.slane %v4953_v26, 4 }
  0x6b   : > { %v796_v32 = vadd.f32 %v4940_v17, %v795_v20  ;;  %v802_v33 = vadd.f32 %v4941_v18, %v801_v27  ;;  %v808_v37 = vadd.f32 %v4944_v21, %v807_v28  ;;  %v814_v38 = vadd.f32 %v4945_v22, %v813_v29  ;;  %v5444_v28 = vld [vmem:[%s6207_s11 + $0x58] sm:$0xff]  }
  0x6c   : > { %3147 = vmatpush.bf16.msra.mxu0 %v4875_v7  ;;  %v820_v17 = vadd.f32 %v4948_v23, %v819_v30  ;;  %v826_v12 = vadd.f32 %v4949_v24, %v825_v31  ;;  %v832_v40 = vadd.f32 %v4952_v25, %v831_v34  ;;  %v838_v41 = vadd.f32 %v4953_v26, %v837_v35  ;;  %v6314_v31 = vld [vmem:[%s6207_s11 + $0x60] sm:$0xff]   ;;  %v6320_v35 = vld [vmem:[%s6207_s11 + $0x68] sm:$0xff]  }
  0x6d   : > { %v797_v18 = vrot.slane %v796_v32, 2  ;;  %v803_v39 = vrot.slane %v802_v33, 2  ;;  %5565 = vmatpush.bf16.msra.mxu3 %v4875_v7  ;;  %v809_v21 = vrot.slane %v808_v37, 2  ;;  %v815_v13 = vrot.slane %v814_v38, 2 }
  0x6e   : > { %v821_v22 = vrot.slane %v820_v17, 2  ;;  %v827_v42 = vrot.slane %v826_v12, 2  ;;  %v833_v14 = vrot.slane %v832_v40, 2  ;;  %v839_v24 = vrot.slane %v838_v41, 2 }
  0x6f   : > { %v798_v23 = vadd.f32 %v797_v18, %v796_v32  ;;  %v804_v43 = vadd.f32 %v803_v39, %v802_v33  ;;  %vm2677_vm5 = vcmask 1046534   ;;  %v810_v45 = vadd.f32 %v809_v21, %v808_v37 }
  0x70   : > { %3148 = vmatpush.bf16.msra.mxu0 %v4874_v36  ;;  %v816_v46 = vadd.f32 %v815_v13, %v814_v38  ;;  %v822_v25 = vadd.f32 %v821_v22, %v820_v17  ;;  %v828_v19 = vadd.f32 %v827_v42, %v826_v12  ;;  %v834_v48 = vadd.f32 %v833_v14, %v832_v40  ;;  %v6326_v17 = vld [vmem:[%s6207_s11 + $0x70] sm:$0xff]   ;;  %v6329_v12 = vld [vmem:[%s6207_s11 + $0x78] sm:$0xff]  }
  0x71   : > { %v799_v26 = vrot.slane %v798_v23, 1  ;;  %v805_v47 = vrot.slane %v804_v43, 1  ;;  %v840_v49 = vadd.f32 %v839_v24, %v838_v41  ;;  %5566 = vmatpush.bf16.msra.mxu3 %v4874_v36  ;;  %v811_v50 = vrot.slane %v810_v45, 1 }
  0x72   : > { %v817_v51 = vrot.slane %v816_v46, 1  ;;  %v823_v52 = vrot.slane %v822_v25, 1  ;;  %v829_v53 = vrot.slane %v828_v19, 1  ;;  %v835_v56 = vrot.slane %v834_v48, 1 }
  0x73   : > { %v800_v54 = vadd.f32 %v799_v26, %v798_v23  ;;  %v806_v55 = vadd.f32 %v805_v47, %v804_v43  ;;  %v841_v57 = vrot.slane %v840_v49, 1  ;;  %v812_v59 = vadd.f32 %v811_v50, %v810_v45 }
  0x74   : > { %3149 = vmatpush.bf16.msra.mxu0 %v4873_v44  ;;  %v818_v60 = vadd.f32 %v817_v51, %v816_v46  ;;  %v824_v61 = vadd.f32 %v823_v52, %v822_v25  ;;  %v830_v62 = vadd.f32 %v829_v53, %v828_v19  ;;  %v836_v0 = vadd.f32 %v835_v56, %v834_v48 }
  0x75   : > { %v842_v1 = vadd.f32 %v841_v57, %v840_v49  ;;  %v2668_v2 = vsel %vm2667_vm0, %v6254_v4, %v6252_v3  ;;  %vm2679_vm6 = vcmask 1047559   ;;  %5567 = vmatpush.bf16.msra.mxu3 %v4873_v44  ;;  %v2681_v7 = vsel %vm2667_vm0, %v806_v55, %v800_v54 }
  0x76   : > { %v2670_v6 = vsel %vm2669_vm1, %v6256_v8, %v2668_v2  ;;  %v4956_v20 = vunpack.c.l.bf16 %v5441_v58  ;;  %v4957_v27 = vunpack.c.h.bf16 %v5441_v58  ;;  %v2682_v30 = vsel %vm2669_vm1, %v812_v59, %v2681_v7 }
  0x77   : > { %v2672_v29 = vsel %vm2671_vm2, %v6258_v9, %v2670_v6  ;;  %v4960_v3 = vunpack.c.l.bf16 %v5442_v63  ;;  %v4961_v4 = vunpack.c.h.bf16 %v5442_v63  ;;  %v2683_v8 = vsel %vm2671_vm2, %v818_v60, %v2682_v30 }
  0x78   : > { %v2674_v32 = vsel %vm2673_vm3, %v6260_v10, %v2672_v29  ;;  %v4964_v33 = vunpack.c.l.bf16 %v5443_v5  ;;  %v4965_v34 = vunpack.c.h.bf16 %v5443_v5  ;;  %v2684_v9 = vsel %vm2673_vm3, %v824_v61, %v2683_v8 }
  0x79   : > { %v2676_v36 = vsel %vm2675_vm4, %v6262_v11, %v2674_v32  ;;  %v4968_v37 = vunpack.c.l.bf16 %v5444_v28  ;;  %v4969_v38 = vunpack.c.h.bf16 %v5444_v28  ;;  %v2685_v18 = vsel %vm2675_vm4, %v830_v62, %v2684_v9 }
  0x7a   : > { %v2678_v10 = vsel %vm2677_vm5, %v6264_v15, %v2676_v36  ;;  %v4972_v39 = vunpack.c.l.bf16 %v6314_v31  ;;  %v4973_v40 = vunpack.c.h.bf16 %v6314_v31  ;;  %v2686_v41 = vsel %vm2677_vm5, %v836_v0, %v2685_v18 }
  0x7b   : > { %v2680_v11 = vsel %vm2679_vm6, %v6266_v16, %v2678_v10  ;;  %v4976_v21 = vunpack.c.l.bf16 %v6320_v35  ;;  %v4977_v13 = vunpack.c.h.bf16 %v6320_v35  ;;  %v2687_v22 = vsel %vm2679_vm6, %v842_v1, %v2686_v41 }
  0x7c   : > { %v4980_v42 = vunpack.c.l.bf16 %v6326_v17  ;;  %v4981_v15 = vunpack.c.h.bf16 %v6326_v17  ;;  %v4984_v23 = vunpack.c.l.bf16 %v6329_v12  ;;  %v3058_v43 = vpack.c.bf16 %v2687_v22, %v2680_v11 }
  0x7d   : > { %v4985_v14 = vunpack.c.h.bf16 %v6329_v12  ;;  %v843_v24 = vrot.slane %v4956_v20, 4  ;;  %v849_v44 = vrot.slane %v4957_v27, 4  ;;  %v855_v16 = vrot.slane %v4960_v3, 4 }
  0x7e   : > { %v861_v45 = vrot.slane %v4961_v4, 4  ;;  %v867_v46 = vrot.slane %v4964_v33, 4  ;;  %v873_v25 = vrot.slane %v4965_v34, 4  ;;  %3150 = vmatmul.bf16.vlgmr.msra.gmra.mxu0 %v3058_v43  ;;  %v879_v47 = vrot.slane %v4968_v37, 4 }
  0x7f   : > { %v844_v19 = vadd.f32 %v4956_v20, %v843_v24  ;;  %v850_v26 = vadd.f32 %v4957_v27, %v849_v44  ;;  %v885_v48 = vrot.slane %v4969_v38, 4  ;;  %v856_v49 = vadd.f32 %v4960_v3, %v855_v16 }
  0x80   : > { %v862_v50 = vadd.f32 %v4961_v4, %v861_v45  ;;  %v868_v51 = vadd.f32 %v4964_v33, %v867_v46  ;;  %v874_v52 = vadd.f32 %v4965_v34, %v873_v25  ;;  %v880_v55 = vadd.f32 %v4968_v37, %v879_v47 }
  0x81   : > { %v845_v53 = vrot.slane %v844_v19, 2  ;;  %v851_v54 = vrot.slane %v850_v26, 2  ;;  %v886_v56 = vadd.f32 %v4969_v38, %v885_v48  ;;  %v857_v57 = vrot.slane %v856_v49, 2 }
  0x82   : > { %v863_v58 = vrot.slane %v862_v50, 2  ;;  %v869_v59 = vrot.slane %v868_v51, 2  ;;  %v875_v60 = vrot.slane %v874_v52, 2  ;;  %v881_v63 = vrot.slane %v880_v55, 2 }
  0x83   : > { %v846_v61 = vadd.f32 %v845_v53, %v844_v19  ;;  %v852_v62 = vadd.f32 %v851_v54, %v850_v26  ;;  %v887_v0 = vrot.slane %v886_v56, 2  ;;  %v858_v1 = vadd.f32 %v857_v57, %v856_v49 }
  0x84   : > { %v864_v2 = vadd.f32 %v863_v58, %v862_v50  ;;  %v870_v5 = vadd.f32 %v869_v59, %v868_v51  ;;  %v876_v6 = vadd.f32 %v875_v60, %v874_v52  ;;  %v882_v27 = vadd.f32 %v881_v63, %v880_v55 }
  0x85   : > { %v847_v7 = vrot.slane %v846_v61, 1  ;;  %v853_v20 = vrot.slane %v852_v62, 1  ;;  %v888_v28 = vadd.f32 %v887_v0, %v886_v56  ;;  %v859_v29 = vrot.slane %v858_v1, 1 }
  0x86   : > { %v865_v30 = vrot.slane %v864_v2, 1  ;;  %v871_v3 = vrot.slane %v870_v5, 1  ;;  %v877_v4 = vrot.slane %v876_v6, 1  ;;  %v883_v33 = vrot.slane %v882_v27, 1 }
  0x87   : > { %v848_v32 = vadd.f32 %v847_v7, %v846_v61  ;;  %v854_v8 = vadd.f32 %v853_v20, %v852_v62  ;;  %v889_v34 = vrot.slane %v888_v28, 1  ;;  %v860_v36 = vadd.f32 %v859_v29, %v858_v1  ;;  %v5449_v1 = vld [vmem:[%s6207_s11 + $0x80] sm:$0xff]   ;;  %v5450_v20 = vld [vmem:[%s6207_s11 + $0x88] sm:$0xff]  }
  0x88   : > { %v6346_v9 = vadd.f32 %v865_v30, %v864_v2  ;;  %v6348_v37 = vadd.f32 %v871_v3, %v870_v5  ;;  %v6350_v38 = vadd.f32 %v877_v4, %v876_v6  ;;  %v6352_v10 = vadd.f32 %v883_v33, %v882_v27  ;;  %v5451_v3 = vld [vmem:[%s6207_s11 + $0x90] sm:$0xff]  }
  0x89   : > { %v6354_v18 = vadd.f32 %v889_v34, %v888_v28  ;;  %v891_v11 = vrot.slane %v4972_v39, 4  ;;  %v897_v41 = vrot.slane %v4973_v40, 4  ;;  %v903_v22 = vrot.slane %v4976_v21, 4 }
  0x8a   : > { %v909_v43 = vrot.slane %v4977_v13, 4  ;;  %v915_v24 = vrot.slane %v4980_v42, 4  ;;  %v921_v44 = vrot.slane %v4981_v15, 4  ;;  %v927_v46 = vrot.slane %v4984_v23, 4 }
  0x8b   : > { %v892_v16 = vadd.f32 %v4972_v39, %v891_v11  ;;  %v898_v45 = vadd.f32 %v4973_v40, %v897_v41  ;;  %v933_v25 = vrot.slane %v4985_v14, 4  ;;  %v904_v19 = vadd.f32 %v4976_v21, %v903_v22  ;;  %v5452_v41 = vld [vmem:[%s6207_s11 + $0x98] sm:$0xff]  }
  0x8c   : > { %v910_v26 = vadd.f32 %v4977_v13, %v909_v43  ;;  %v916_v47 = vadd.f32 %v4980_v42, %v915_v24  ;;  %v922_v39 = vadd.f32 %v4981_v15, %v921_v44  ;;  %v928_v48 = vadd.f32 %v4984_v23, %v927_v46  ;;  %v6406_v46 = vld [vmem:[%s6207_s11 + $0xa8] sm:$0xff]  }
  0x8d   : > { %v893_v31 = vrot.slane %v892_v16, 2  ;;  %v899_v40 = vrot.slane %v898_v45, 2  ;;  %v934_v49 = vadd.f32 %v4985_v14, %v933_v25  ;;  %v905_v50 = vrot.slane %v904_v19, 2 }
  0x8e   : > { %v911_v51 = vrot.slane %v910_v26, 2  ;;  %v917_v21 = vrot.slane %v916_v47, 2  ;;  %v923_v52 = vrot.slane %v922_v39, 2  ;;  %v929_v53 = vrot.slane %v928_v48, 2 }
  0x8f   : > { %v894_v35 = vadd.f32 %v893_v31, %v892_v16  ;;  %v900_v13 = vadd.f32 %v899_v40, %v898_v45  ;;  %v935_v54 = vrot.slane %v934_v49, 2  ;;  %v906_v42 = vadd.f32 %v905_v50, %v904_v19 }
  0x90   : > { %v912_v17 = vadd.f32 %v911_v51, %v910_v26  ;;  %v918_v15 = vadd.f32 %v917_v21, %v916_v47  ;;  %v924_v55 = vadd.f32 %v923_v52, %v922_v39  ;;  %v930_v23 = vadd.f32 %v929_v53, %v928_v48  ;;  %v6412_v47 = vld [vmem:[%s6207_s11 + $0xb0] sm:$0xff]   ;;  %v6415_v39 = vld [vmem:[%s6207_s11 + $0xb8] sm:$0xff]  }
  0x91   : > { %v895_v56 = vrot.slane %v894_v35, 1  ;;  %v901_v57 = vrot.slane %v900_v13, 1  ;;  %v936_v58 = vadd.f32 %v935_v54, %v934_v49  ;;  %v907_v12 = vrot.slane %v906_v42, 1 }
  0x92   : > { %v913_v14 = vrot.slane %v912_v17, 1  ;;  %v919_v59 = vrot.slane %v918_v15, 1  ;;  %v925_v60 = vrot.slane %v924_v55, 1  ;;  %v931_v63 = vrot.slane %v930_v23, 1 }
  0x93   : > { %v896_v61 = vadd.f32 %v895_v56, %v894_v35  ;;  %v902_v62 = vadd.f32 %v901_v57, %v900_v13  ;;  %v937_v0 = vrot.slane %v936_v58, 1  ;;  %v908_v2 = vadd.f32 %v907_v12, %v906_v42 }
  0x94   : > { %v914_v5 = vadd.f32 %v913_v14, %v912_v17  ;;  %v920_v6 = vadd.f32 %v919_v59, %v918_v15  ;;  %v926_v7 = vadd.f32 %v925_v60, %v924_v55  ;;  %v932_v27 = vadd.f32 %v931_v63, %v930_v23 }
  0x95   : > { %v938_v28 = vadd.f32 %v937_v0, %v936_v58  ;;  %v2688_v29 = vsel %vm2667_vm0, %v854_v8, %v848_v32  ;;  %v2695_v30 = vsel %vm2667_vm0, %v902_v62, %v896_v61  ;;  %v4988_v34 = vunpack.c.l.bf16 %v5449_v1  ;;  %v6400_v8 = vld [vmem:[%s6207_s11 + $0xa0] sm:$0xff]  }
  0x96   : > { %v2689_v4 = vsel %vm2669_vm1, %v860_v36, %v2688_v29  ;;  %v2696_v33 = vsel %vm2669_vm1, %v908_v2, %v2695_v30  ;;  %v4989_v11 = vunpack.c.h.bf16 %v5449_v1  ;;  %v4992_v24 = vunpack.c.l.bf16 %v5450_v20 }
  0x97   : > { %v2690_v22 = vsel %vm2671_vm2, %v6346_v9, %v2689_v4  ;;  %v2697_v43 = vsel %vm2671_vm2, %v914_v5, %v2696_v33  ;;  %v4993_v32 = vunpack.c.h.bf16 %v5450_v20  ;;  %v4996_v16 = vunpack.c.l.bf16 %v5451_v3 }
  0x98   : > { %v2691_v44 = vsel %vm2673_vm3, %v6348_v37, %v2690_v22  ;;  %v2698_v36 = vsel %vm2673_vm3, %v920_v6, %v2697_v43  ;;  %v4997_v45 = vunpack.c.h.bf16 %v5451_v3  ;;  %v5000_v19 = vunpack.c.l.bf16 %v5452_v41 }
  0x99   : > { %v2692_v25 = vsel %vm2675_vm4, %v6350_v38, %v2691_v44  ;;  %v2699_v9 = vsel %vm2675_vm4, %v926_v7, %v2698_v36  ;;  %v5001_v26 = vunpack.c.h.bf16 %v5452_v41  ;;  %v5004_v40 = vunpack.c.l.bf16 %v6400_v8 }
  0x9a   : > { %v2693_v37 = vsel %vm2677_vm5, %v6352_v10, %v2692_v25  ;;  %v2700_v31 = vsel %vm2677_vm5, %v932_v27, %v2699_v9  ;;  %v5005_v48 = vunpack.c.h.bf16 %v6400_v8  ;;  %v5008_v50 = vunpack.c.l.bf16 %v6406_v46 }
  0x9b   : > { %v2694_v38 = vsel %vm2679_vm6, %v6354_v18, %v2693_v37  ;;  %v2701_v49 = vsel %vm2679_vm6, %v938_v28, %v2700_v31  ;;  %v5009_v51 = vunpack.c.h.bf16 %v6406_v46  ;;  %v5012_v52 = vunpack.c.l.bf16 %v6412_v47 }
  0x9c   : > { %v3059_v21 = vpack.c.bf16 %v2701_v49, %v2694_v38  ;;  %v5013_v10 = vunpack.c.h.bf16 %v6412_v47  ;;  %v5016_v35 = vunpack.c.l.bf16 %v6415_v39  ;;  %v5017_v13 = vunpack.c.h.bf16 %v6415_v39 }
  0x9d   : > { %v939_v53 = vrot.slane %v4988_v34, 4  ;;  %v945_v54 = vrot.slane %v4989_v11, 4  ;;  %v951_v42 = vrot.slane %v4992_v24, 4  ;;  %v957_v18 = vrot.slane %v4993_v32, 4 }
  0x9e   : > { %3155 = vmatmul.bf16.gmra.mxu0 %v3059_v21  ;;  %v963_v17 = vrot.slane %v4996_v16, 4  ;;  %v969_v15 = vrot.slane %v4997_v45, 4  ;;  %v975_v55 = vrot.slane %v5000_v19, 4  ;;  %v981_v58 = vrot.slane %v5001_v26, 4 }
  0x9f   : > { %v940_v56 = vadd.f32 %v4988_v34, %v939_v53  ;;  %v946_v57 = vadd.f32 %v4989_v11, %v945_v54  ;;  %v952_v23 = vadd.f32 %v4992_v24, %v951_v42  ;;  %v958_v12 = vadd.f32 %v4993_v32, %v957_v18 }
  0xa0   : > { %v964_v14 = vadd.f32 %v4996_v16, %v963_v17  ;;  %v970_v59 = vadd.f32 %v4997_v45, %v969_v15  ;;  %v976_v60 = vadd.f32 %v5000_v19, %v975_v55  ;;  %v982_v0 = vadd.f32 %v5001_v26, %v981_v58 }
  0xa1   : > { %v941_v61 = vrot.slane %v940_v56, 2  ;;  %v947_v62 = vrot.slane %v946_v57, 2  ;;  %v953_v63 = vrot.slane %v952_v23, 2  ;;  %v959_v1 = vrot.slane %v958_v12, 2 }
  0xa2   : > { %v965_v2 = vrot.slane %v964_v14, 2  ;;  %v971_v5 = vrot.slane %v970_v59, 2  ;;  %v977_v6 = vrot.slane %v976_v60, 2  ;;  %v983_v28 = vrot.slane %v982_v0, 2 }
  0xa3   : > { %v942_v7 = vadd.f32 %v941_v61, %v940_v56  ;;  %v948_v20 = vadd.f32 %v947_v62, %v946_v57  ;;  %v954_v27 = vadd.f32 %v953_v63, %v952_v23  ;;  %v960_v29 = vadd.f32 %v959_v1, %v958_v12 }
  0xa4   : > { %v966_v30 = vadd.f32 %v965_v2, %v964_v14  ;;  %v972_v3 = vadd.f32 %v971_v5, %v970_v59  ;;  %v978_v4 = vadd.f32 %v977_v6, %v976_v60  ;;  %v984_v41 = vadd.f32 %v983_v28, %v982_v0 }
  0xa5   : > { %v943_v33 = vrot.slane %v942_v7, 1  ;;  %v949_v34 = vrot.slane %v948_v20, 1  ;;  %v955_v11 = vrot.slane %v954_v27, 1  ;;  %v961_v22 = vrot.slane %v960_v29, 1 }
  0xa6   : > { %v967_v43 = vrot.slane %v966_v30, 1  ;;  %v973_v24 = vrot.slane %v972_v3, 1  ;;  %v979_v32 = vrot.slane %v978_v4, 1  ;;  %v985_v45 = vrot.slane %v984_v41, 1 }
  0xa7   : > { %v944_v44 = vadd.f32 %v943_v33, %v942_v7  ;;  %v950_v36 = vadd.f32 %v949_v34, %v948_v20  ;;  %v6431_v16 = vadd.f32 %v955_v11, %v954_v27  ;;  %v6433_v25 = vadd.f32 %v961_v22, %v960_v29  ;;  %v5457_v7 = vld [vmem:[%s6207_s11 + $0xc0] sm:$0xff]   ;;  %v5459_v11 = vld [vmem:[%s6207_s11 + $0xd0] sm:$0xff]  }
  0xa8   : > { %v6435_v9 = vadd.f32 %v967_v43, %v966_v30  ;;  %v6437_v19 = vadd.f32 %v973_v24, %v972_v3  ;;  %v6439_v26 = vadd.f32 %v979_v32, %v978_v4  ;;  %v6441_v37 = vadd.f32 %v985_v45, %v984_v41  ;;  %v5458_v30 = vld [vmem:[%s6207_s11 + $0xc8] sm:$0xff]   ;;  %v5460_v32 = vld [vmem:[%s6207_s11 + $0xd8] sm:$0xff]  }
  0xa9   : > { %v987_v31 = vrot.slane %v5004_v40, 4  ;;  %v993_v38 = vrot.slane %v5005_v48, 4  ;;  %v999_v49 = vrot.slane %v5008_v50, 4  ;;  %v1005_v21 = vrot.slane %v5009_v51, 4 }
  0xaa   : > { %v1011_v53 = vrot.slane %v5012_v52, 4  ;;  %v1017_v54 = vrot.slane %v5013_v10, 4  ;;  %v1023_v42 = vrot.slane %v5016_v35, 4  ;;  %v1029_v55 = vrot.slane %v5017_v13, 4 }
  0xab   : > { %v988_v18 = vadd.f32 %v5004_v40, %v987_v31  ;;  %v994_v17 = vadd.f32 %v5005_v48, %v993_v38  ;;  %v1000_v15 = vadd.f32 %v5008_v50, %v999_v49  ;;  %v1006_v56 = vadd.f32 %v5009_v51, %v1005_v21  ;;  %v6485_v21 = vld [vmem:[%s6207_s11 + $0xe0] sm:$0xff]  }
  0xac   : > { %v1012_v57 = vadd.f32 %v5012_v52, %v1011_v53  ;;  %v1018_v23 = vadd.f32 %v5013_v10, %v1017_v54  ;;  %v1024_v40 = vadd.f32 %v5016_v35, %v1023_v42  ;;  %v1030_v50 = vadd.f32 %v5017_v13, %v1029_v55  ;;  %v6491_v42 = vld [vmem:[%s6207_s11 + $0xe8] sm:$0xff]   ;;  %v6497_v55 = vld [vmem:[%s6207_s11 + $0xf0] sm:$0xff]  }
  0xad   : > { %v989_v8 = vrot.slane %v988_v18, 2  ;;  %v995_v48 = vrot.slane %v994_v17, 2  ;;  %v1001_v58 = vrot.slane %v1000_v15, 2  ;;  %v1007_v12 = vrot.slane %v1006_v56, 2 }
  0xae   : > { %v1013_v14 = vrot.slane %v1012_v57, 2  ;;  %v1019_v59 = vrot.slane %v1018_v23, 2  ;;  %v1025_v46 = vrot.slane %v1024_v40, 2  ;;  %v1031_v61 = vrot.slane %v1030_v50, 2 }
  0xaf   : > { %v990_v51 = vadd.f32 %v989_v8, %v988_v18  ;;  %v996_v60 = vadd.f32 %v995_v48, %v994_v17  ;;  %v1002_v52 = vadd.f32 %v1001_v58, %v1000_v15  ;;  %v1008_v47 = vadd.f32 %v1007_v12, %v1006_v56 }
  0xb0   : > { %v1014_v10 = vadd.f32 %v1013_v14, %v1012_v57  ;;  %v1020_v62 = vadd.f32 %v1019_v59, %v1018_v23  ;;  %v1026_v35 = vadd.f32 %v1025_v46, %v1024_v40  ;;  %v1032_v39 = vadd.f32 %v1031_v61, %v1030_v50  ;;  %v6504_v40 = vld [vmem:[%s6207_s11 + $0xf8] sm:$0xff]  }
  0xb1   : > { %v991_v63 = vrot.slane %v990_v51, 1  ;;  %v997_v0 = vrot.slane %v996_v60, 1  ;;  %v1003_v1 = vrot.slane %v1002_v52, 1  ;;  %v1009_v13 = vrot.slane %v1008_v47, 1 }
  0xb2   : > { %v1015_v2 = vrot.slane %v1014_v10, 1  ;;  %v1021_v5 = vrot.slane %v1020_v62, 1  ;;  %v1027_v6 = vrot.slane %v1026_v35, 1  ;;  %v1033_v29 = vrot.slane %v1032_v39, 1 }
  0xb3   : > { %v992_v20 = vadd.f32 %v991_v63, %v990_v51  ;;  %v998_v27 = vadd.f32 %v997_v0, %v996_v60  ;;  %v1004_v28 = vadd.f32 %v1003_v1, %v1002_v52  ;;  %v1010_v3 = vadd.f32 %v1009_v13, %v1008_v47 }
  0xb4   : > { %v1016_v4 = vadd.f32 %v1015_v2, %v1014_v10  ;;  %v1022_v33 = vadd.f32 %v1021_v5, %v1020_v62  ;;  %v1028_v34 = vadd.f32 %v1027_v6, %v1026_v35  ;;  %v1034_v41 = vadd.f32 %v1033_v29, %v1032_v39 }
  0xb5   : > { %v2702_v22 = vsel %vm2667_vm0, %v950_v36, %v944_v44  ;;  %v2709_v43 = vsel %vm2667_vm0, %v998_v27, %v992_v20  ;;  %v5020_v24 = vunpack.c.l.bf16 %v5457_v7  ;;  %v5021_v38 = vunpack.c.h.bf16 %v5457_v7 }
  0xb6   : > { %v2703_v45 = vsel %vm2669_vm1, %v6431_v16, %v2702_v22  ;;  %v2710_v31 = vsel %vm2669_vm1, %v1004_v28, %v2709_v43  ;;  %v5024_v49 = vunpack.c.l.bf16 %v5458_v30  ;;  %v5025_v36 = vunpack.c.h.bf16 %v5458_v30 }
  0xb7   : > { %v2704_v53 = vsel %vm2671_vm2, %v6433_v25, %v2703_v45  ;;  %v2711_v44 = vsel %vm2671_vm2, %v1010_v3, %v2710_v31  ;;  %v5028_v54 = vunpack.c.l.bf16 %v5459_v11  ;;  %v5029_v17 = vunpack.c.h.bf16 %v5459_v11 }
  0xb8   : > { %v2705_v18 = vsel %vm2673_vm3, %v6435_v9, %v2704_v53  ;;  %v2712_v16 = vsel %vm2673_vm3, %v1016_v4, %v2711_v44  ;;  %v5032_v15 = vunpack.c.l.bf16 %v5460_v32  ;;  %v5033_v57 = vunpack.c.h.bf16 %v5460_v32 }
  0xb9   : > { %v2706_v56 = vsel %vm2675_vm4, %v6437_v19, %v2705_v18  ;;  %v2713_v25 = vsel %vm2675_vm4, %v1022_v33, %v2712_v16  ;;  %v5036_v23 = vunpack.c.l.bf16 %v6485_v21  ;;  %v5037_v48 = vunpack.c.h.bf16 %v6485_v21 }
  0xba   : > { %v2707_v8 = vsel %vm2677_vm5, %v6439_v26, %v2706_v56  ;;  %v2714_v9 = vsel %vm2677_vm5, %v1028_v34, %v2713_v25  ;;  %v5040_v58 = vunpack.c.l.bf16 %v6491_v42  ;;  %v5041_v12 = vunpack.c.h.bf16 %v6491_v42 }
  0xbb   : > { %v2708_v50 = vsel %vm2679_vm6, %v6441_v37, %v2707_v8  ;;  %v2715_v19 = vsel %vm2679_vm6, %v1034_v41, %v2714_v9  ;;  %v5044_v14 = vunpack.c.l.bf16 %v6497_v55  ;;  %v5045_v46 = vunpack.c.h.bf16 %v6497_v55 }
  0xbc   : > { %v3060_v59 = vpack.c.bf16 %v2715_v19, %v2708_v50  ;;  %v5048_v26 = vunpack.c.l.bf16 %v6504_v40  ;;  %v5049_v51 = vunpack.c.h.bf16 %v6504_v40  ;;  %v1035_v60 = vrot.slane %v5020_v24, 4 }
  0xbd   : > { %v1041_v52 = vrot.slane %v5021_v38, 4  ;;  %v1047_v61 = vrot.slane %v5024_v49, 4  ;;  %v1053_v47 = vrot.slane %v5025_v36, 4  ;;  %v1059_v10 = vrot.slane %v5028_v54, 4 }
  0xbe   : > { %3160 = vmatmul.bf16.gmra.mxu0 %v3060_v59  ;;  %v1065_v37 = vrot.slane %v5029_v17, 4  ;;  %v1071_v62 = vrot.slane %v5032_v15, 4  ;;  %v1077_v35 = vrot.slane %v5033_v57, 4  ;;  %v1036_v63 = vadd.f32 %v5020_v24, %v1035_v60 }
  0xbf   : > { %v1042_v0 = vadd.f32 %v5021_v38, %v1041_v52  ;;  %v1048_v1 = vadd.f32 %v5024_v49, %v1047_v61  ;;  %v1054_v39 = vadd.f32 %v5025_v36, %v1053_v47  ;;  %v1060_v13 = vadd.f32 %v5028_v54, %v1059_v10 }
  0xc0   : > { %v1066_v2 = vadd.f32 %v5029_v17, %v1065_v37  ;;  %v1072_v5 = vadd.f32 %v5032_v15, %v1071_v62  ;;  %v1078_v6 = vadd.f32 %v5033_v57, %v1077_v35  ;;  %v1037_v7 = vrot.slane %v1036_v63, 2 }
  0xc1   : > { %v1043_v20 = vrot.slane %v1042_v0, 2  ;;  %v1049_v27 = vrot.slane %v1048_v1, 2  ;;  %v1055_v28 = vrot.slane %v1054_v39, 2  ;;  %v1061_v29 = vrot.slane %v1060_v13, 2 }
  0xc2   : > { %v1067_v30 = vrot.slane %v1066_v2, 2  ;;  %v1073_v3 = vrot.slane %v1072_v5, 2  ;;  %v1079_v4 = vrot.slane %v1078_v6, 2  ;;  %v1038_v33 = vadd.f32 %v1037_v7, %v1036_v63 }
  0xc3   : > { %v1044_v34 = vadd.f32 %v1043_v20, %v1042_v0  ;;  %v1050_v11 = vadd.f32 %v1049_v27, %v1048_v1  ;;  %v1056_v41 = vadd.f32 %v1055_v28, %v1054_v39  ;;  %v1062_v22 = vadd.f32 %v1061_v29, %v1060_v13 }
  0xc4   : > { %v1068_v43 = vadd.f32 %v1067_v30, %v1066_v2  ;;  %v1074_v24 = vadd.f32 %v1073_v3, %v1072_v5  ;;  %v1080_v32 = vadd.f32 %v1079_v4, %v1078_v6  ;;  %v1039_v45 = vrot.slane %v1038_v33, 1 }
  0xc5   : > { %v1045_v31 = vrot.slane %v1044_v34, 1  ;;  %v1051_v38 = vrot.slane %v1050_v11, 1  ;;  %v1057_v49 = vrot.slane %v1056_v41, 1  ;;  %v1063_v53 = vrot.slane %v1062_v22, 1 }
  0xc6   : > { %v1069_v44 = vrot.slane %v1068_v43, 1  ;;  %v1075_v36 = vrot.slane %v1074_v24, 1  ;;  %v1081_v54 = vrot.slane %v1080_v32, 1  ;;  %v1040_v18 = vadd.f32 %v1039_v45, %v1038_v33  ;;  %v5544_v33 = vld [vmem:[%s6214_s21 + $0x180] sm:$0xff]  }
  0xc7   : > { %v1046_v16 = vadd.f32 %v1045_v31, %v1044_v34  ;;  %v6519_v17 = vadd.f32 %v1051_v38, %v1050_v11  ;;  %v6521_v15 = vadd.f32 %v1057_v49, %v1056_v41  ;;  %v6523_v56 = vadd.f32 %v1063_v53, %v1062_v22  ;;  %v5546_v38 = vld [vmem:[%s6214_s21 + $0x190] sm:$0xff]  }
  0xc8   : > { %v6525_v25 = vadd.f32 %v1069_v44, %v1068_v43  ;;  %v6527_v57 = vadd.f32 %v1075_v36, %v1074_v24  ;;  %v6529_v8 = vadd.f32 %v1081_v54, %v1080_v32  ;;  %v1083_v9 = vrot.slane %v5036_v23, 4  ;;  %v5545_v43 = vld [vmem:[%s6214_s21 + $0x188] sm:$0xff]   ;;  %v5547_v54 = vld [vmem:[%s6214_s21 + $0x198] sm:$0xff]  }
  0xc9   : > { %v1089_v50 = vrot.slane %v5037_v48, 4  ;;  %v1095_v19 = vrot.slane %v5040_v58, 4  ;;  %v1101_v59 = vrot.slane %v5041_v12, 4  ;;  %v1107_v60 = vrot.slane %v5044_v14, 4 }
  0xca   : > { %v1113_v52 = vrot.slane %v5045_v46, 4  ;;  %v1119_v61 = vrot.slane %v5048_v26, 4  ;;  %v1125_v47 = vrot.slane %v5049_v51, 4  ;;  %v1084_v10 = vadd.f32 %v5036_v23, %v1083_v9 }
  0xcb   : > { %v1090_v37 = vadd.f32 %v5037_v48, %v1089_v50  ;;  %v1096_v62 = vadd.f32 %v5040_v58, %v1095_v19  ;;  %v1102_v35 = vadd.f32 %v5041_v12, %v1101_v59  ;;  %v1108_v63 = vadd.f32 %v5044_v14, %v1107_v60  ;;  %v6573_v60 = vld [vmem:[%s6214_s21 + $0x1a0] sm:$0xff]  }
  0xcc   : > { %v1114_v0 = vadd.f32 %v5045_v46, %v1113_v52  ;;  %v1120_v1 = vadd.f32 %v5048_v26, %v1119_v61  ;;  %v1126_v23 = vadd.f32 %v5049_v51, %v1125_v47  ;;  %v1085_v21 = vrot.slane %v1084_v10, 2  ;;  %v6579_v47 = vld [vmem:[%s6214_s21 + $0x1a8] sm:$0xff]  }
  0xcd   : > { %v1091_v48 = vrot.slane %v1090_v37, 2  ;;  %v1097_v39 = vrot.slane %v1096_v62, 2  ;;  %v1103_v13 = vrot.slane %v1102_v35, 2  ;;  %v1109_v58 = vrot.slane %v1108_v63, 2 }
  0xce   : > { %v1115_v2 = vrot.slane %v1114_v0, 2  ;;  %v1121_v42 = vrot.slane %v1120_v1, 2  ;;  %v1127_v12 = vrot.slane %v1126_v23, 2  ;;  %v1086_v5 = vadd.f32 %v1085_v21, %v1084_v10 }
  0xcf   : > { %v1092_v14 = vadd.f32 %v1091_v48, %v1090_v37  ;;  %v1098_v6 = vadd.f32 %v1097_v39, %v1096_v62  ;;  %v1104_v55 = vadd.f32 %v1103_v13, %v1102_v35  ;;  %v1110_v46 = vadd.f32 %v1109_v58, %v1108_v63  ;;  %v6585_v35 = vld [vmem:[%s6214_s21 + $0x1b0] sm:$0xff]  }
  0xd0   : > { %v1116_v7 = vadd.f32 %v1115_v2, %v1114_v0  ;;  %v1122_v26 = vadd.f32 %v1121_v42, %v1120_v1  ;;  %v1128_v20 = vadd.f32 %v1127_v12, %v1126_v23  ;;  %v1087_v40 = vrot.slane %v1086_v5, 1  ;;  %v6593_v23 = vld [vmem:[%s6214_s21 + $0x1b8] sm:$0xff]  }
  0xd1   : > { %v1093_v51 = vrot.slane %v1092_v14, 1  ;;  %v1099_v27 = vrot.slane %v1098_v6, 1  ;;  %v1105_v28 = vrot.slane %v1104_v55, 1  ;;  %v1111_v29 = vrot.slane %v1110_v46, 1 }
  0xd2   : > { %v1117_v30 = vrot.slane %v1116_v7, 1  ;;  %v1123_v3 = vrot.slane %v1122_v26, 1  ;;  %v1129_v4 = vrot.slane %v1128_v20, 1  ;;  %v1088_v34 = vadd.f32 %v1087_v40, %v1086_v5 }
  0xd3   : > { %v1094_v11 = vadd.f32 %v1093_v51, %v1092_v14  ;;  %v1100_v41 = vadd.f32 %v1099_v27, %v1098_v6  ;;  %v1106_v22 = vadd.f32 %v1105_v28, %v1104_v55  ;;  %v1112_v24 = vadd.f32 %v1111_v29, %v1110_v46 }
  0xd4   : > { %v1118_v32 = vadd.f32 %v1117_v30, %v1116_v7  ;;  %v1124_v45 = vadd.f32 %v1123_v3, %v1122_v26  ;;  %v1130_v31 = vadd.f32 %v1129_v4, %v1128_v20  ;;  %v2716_v49 = vsel %vm2667_vm0, %v1046_v16, %v1040_v18 }
  0xd5   : > { %v2723_v53 = vsel %vm2667_vm0, %v1094_v11, %v1088_v34  ;;  %v5372_v44 = vunpack.c.l.bf16 %v5544_v33  ;;  %v5373_v36 = vunpack.c.h.bf16 %v5544_v33  ;;  %v2717_v9 = vsel %vm2669_vm1, %v6519_v17, %v2716_v49 }
  0xd6   : > { %v2724_v50 = vsel %vm2669_vm1, %v1100_v41, %v2723_v53  ;;  %v5376_v19 = vunpack.c.l.bf16 %v5545_v43  ;;  %v5377_v59 = vunpack.c.h.bf16 %v5545_v43  ;;  %v2718_v52 = vsel %vm2671_vm2, %v6521_v15, %v2717_v9 }
  0xd7   : > { %v2725_v18 = vsel %vm2671_vm2, %v1106_v22, %v2724_v50  ;;  %v5380_v16 = vunpack.c.l.bf16 %v5546_v38  ;;  %v5381_v61 = vunpack.c.h.bf16 %v5546_v38  ;;  %v2719_v10 = vsel %vm2673_vm3, %v6523_v56, %v2718_v52 }
  0xd8   : > { %v2726_v17 = vsel %vm2673_vm3, %v1112_v24, %v2725_v18  ;;  %v5384_v37 = vunpack.c.l.bf16 %v5547_v54  ;;  %v5385_v62 = vunpack.c.h.bf16 %v5547_v54  ;;  %v2720_v63 = vsel %vm2675_vm4, %v6525_v25, %v2719_v10 }
  0xd9   : > { %v2727_v15 = vsel %vm2675_vm4, %v1118_v32, %v2726_v17  ;;  %v5388_v0 = vunpack.c.l.bf16 %v6573_v60  ;;  %v5389_v1 = vunpack.c.h.bf16 %v6573_v60  ;;  %v2721_v56 = vsel %vm2677_vm5, %v6527_v57, %v2720_v63 }
  0xda   : > { %v2728_v21 = vsel %vm2677_vm5, %v1124_v45, %v2727_v15  ;;  %v5392_v48 = vunpack.c.l.bf16 %v6579_v47  ;;  %v5393_v39 = vunpack.c.h.bf16 %v6579_v47  ;;  %v2722_v25 = vsel %vm2679_vm6, %v6529_v8, %v2721_v56 }
  0xdb   : > { %v2729_v13 = vsel %vm2679_vm6, %v1130_v31, %v2728_v21  ;;  %v5396_v58 = vunpack.c.l.bf16 %v6585_v35  ;;  %v5397_v2 = vunpack.c.h.bf16 %v6585_v35  ;;  %v5400_v12 = vunpack.c.l.bf16 %v6593_v23 }
  0xdc   : > { %v3061_v42 = vpack.c.bf16 %v2729_v13, %v2722_v25  ;;  %v5401_v57 = vunpack.c.h.bf16 %v6593_v23  ;;  %v2347_v5 = vrot.slane %v5372_v44, 4  ;;  %v2353_v14 = vrot.slane %v5373_v36, 4 }
  0xdd   : > { %v2359_v6 = vrot.slane %v5376_v19, 4  ;;  %v2365_v55 = vrot.slane %v5377_v59, 4  ;;  %v2371_v46 = vrot.slane %v5380_v16, 4  ;;  %v2377_v26 = vrot.slane %v5381_v61, 4 }
  0xde   : > { %3165 = vmatmul.bf16.gmra.mxu0 %v3061_v42  ;;  %v2348_v7 = vadd.f32 %v5372_v44, %v2347_v5  ;;  %v2383_v8 = vrot.slane %v5384_v37, 4  ;;  %v2389_v20 = vrot.slane %v5385_v62, 4  ;;  %v2354_v40 = vadd.f32 %v5373_v36, %v2353_v14 }
  0xdf   : > { %v2360_v51 = vadd.f32 %v5376_v19, %v2359_v6  ;;  %v2366_v27 = vadd.f32 %v5377_v59, %v2365_v55  ;;  %v2372_v28 = vadd.f32 %v5380_v16, %v2371_v46  ;;  %v2378_v30 = vadd.f32 %v5381_v61, %v2377_v26 }
  0xe0   : > { %v2349_v29 = vrot.slane %v2348_v7, 2  ;;  %v2384_v3 = vadd.f32 %v5384_v37, %v2383_v8  ;;  %v2390_v4 = vadd.f32 %v5385_v62, %v2389_v20  ;;  %v2355_v33 = vrot.slane %v2354_v40, 2 }
  0xe1   : > { %v2361_v34 = vrot.slane %v2360_v51, 2  ;;  %v2367_v11 = vrot.slane %v2366_v27, 2  ;;  %v2373_v41 = vrot.slane %v2372_v28, 2  ;;  %v2379_v43 = vrot.slane %v2378_v30, 2 }
  0xe2   : > { %v2350_v22 = vadd.f32 %v2349_v29, %v2348_v7  ;;  %v2385_v24 = vrot.slane %v2384_v3, 2  ;;  %v2391_v32 = vrot.slane %v2390_v4, 2  ;;  %v2356_v45 = vadd.f32 %v2355_v33, %v2354_v40 }
  0xe3   : > { %v2362_v31 = vadd.f32 %v2361_v34, %v2360_v51  ;;  %v2368_v38 = vadd.f32 %v2367_v11, %v2366_v27  ;;  %v2374_v49 = vadd.f32 %v2373_v41, %v2372_v28  ;;  %v2380_v44 = vadd.f32 %v2379_v43, %v2378_v30 }
  0xe4   : > { %v2351_v53 = vrot.slane %v2350_v22, 1  ;;  %v2386_v36 = vadd.f32 %v2385_v24, %v2384_v3  ;;  %v2392_v54 = vadd.f32 %v2391_v32, %v2390_v4  ;;  %v2357_v9 = vrot.slane %v2356_v45, 1 }
  0xe5   : > { %v2363_v50 = vrot.slane %v2362_v31, 1  ;;  %v2369_v19 = vrot.slane %v2368_v38, 1  ;;  %v2375_v59 = vrot.slane %v2374_v49, 1  ;;  %v2381_v18 = vrot.slane %v2380_v44, 1 }
  0xe6   : > { %v2352_v52 = vadd.f32 %v2351_v53, %v2350_v22  ;;  %v2387_v16 = vrot.slane %v2386_v36, 1  ;;  %v2393_v61 = vrot.slane %v2392_v54, 1  ;;  %v2358_v10 = vadd.f32 %v2357_v9, %v2356_v45  ;;  %v5465_v45 = vld [vmem:[%s6207_s11 + $0x100] sm:$0xff]  }
  0xe7   : > { %v2364_v17 = vadd.f32 %v2363_v50, %v2362_v31  ;;  %v6607_v37 = vadd.f32 %v2369_v19, %v2368_v38  ;;  %v6609_v62 = vadd.f32 %v2375_v59, %v2374_v49  ;;  %v6611_v63 = vadd.f32 %v2381_v18, %v2380_v44  ;;  %v5466_v44 = vld [vmem:[%s6207_s11 + $0x108] sm:$0xff]   ;;  %v5467_v19 = vld [vmem:[%s6207_s11 + $0x110] sm:$0xff]  }
  0xe8   : > { %v6613_v15 = vadd.f32 %v2387_v16, %v2386_v36  ;;  %v6615_v56 = vadd.f32 %v2393_v61, %v2392_v54  ;;  %v2395_v21 = vrot.slane %v5388_v0, 4  ;;  %v2401_v25 = vrot.slane %v5389_v1, 4 }
  0xe9   : > { %v2407_v13 = vrot.slane %v5392_v48, 4  ;;  %v2413_v42 = vrot.slane %v5393_v39, 4  ;;  %v2419_v5 = vrot.slane %v5396_v58, 4  ;;  %v2425_v6 = vrot.slane %v5397_v2, 4 }
  0xea   : > { %v2396_v14 = vadd.f32 %v5388_v0, %v2395_v21  ;;  %v2431_v55 = vrot.slane %v5400_v12, 4  ;;  %v2437_v46 = vrot.slane %v5401_v57, 4  ;;  %v2402_v7 = vadd.f32 %v5389_v1, %v2401_v25  ;;  %v5468_v21 = vld [vmem:[%s6207_s11 + $0x118] sm:$0xff]  }
  0xeb   : > { %v2408_v26 = vadd.f32 %v5392_v48, %v2407_v13  ;;  %v2414_v8 = vadd.f32 %v5393_v39, %v2413_v42  ;;  %v2420_v0 = vadd.f32 %v5396_v58, %v2419_v5  ;;  %v2426_v40 = vadd.f32 %v5397_v2, %v2425_v6 }
  0xec   : > { %v2397_v20 = vrot.slane %v2396_v14, 2  ;;  %v2432_v51 = vadd.f32 %v5400_v12, %v2431_v55  ;;  %v2438_v60 = vadd.f32 %v5401_v57, %v2437_v46  ;;  %v2403_v1 = vrot.slane %v2402_v7, 2  ;;  %v6666_v55 = vld [vmem:[%s6207_s11 + $0x128] sm:$0xff]  }
  0xed   : > { %v2409_v27 = vrot.slane %v2408_v26, 2  ;;  %v2415_v28 = vrot.slane %v2414_v8, 2  ;;  %v2421_v48 = vrot.slane %v2420_v0, 2  ;;  %v2427_v47 = vrot.slane %v2426_v40, 2 }
  0xee   : > { %v2398_v29 = vadd.f32 %v2397_v20, %v2396_v14  ;;  %v2433_v39 = vrot.slane %v2432_v51, 2  ;;  %v2439_v30 = vrot.slane %v2438_v60, 2  ;;  %v2404_v3 = vadd.f32 %v2403_v1, %v2402_v7  ;;  %v6660_v14 = vld [vmem:[%s6207_s11 + $0x120] sm:$0xff]  }
  0xef   : > { %v2410_v58 = vadd.f32 %v2409_v27, %v2408_v26  ;;  %v2416_v4 = vadd.f32 %v2415_v28, %v2414_v8  ;;  %v2422_v35 = vadd.f32 %v2421_v48, %v2420_v0  ;;  %v2428_v33 = vadd.f32 %v2427_v47, %v2426_v40  ;;  %v6672_v8 = vld [vmem:[%s6207_s11 + $0x130] sm:$0xff]   ;;  %v6675_v0 = vld [vmem:[%s6207_s11 + $0x138] sm:$0xff]  }
  0xf0   : > { %v2399_v2 = vrot.slane %v2398_v29, 1  ;;  %v2434_v12 = vadd.f32 %v2433_v39, %v2432_v51  ;;  %v2440_v34 = vadd.f32 %v2439_v30, %v2438_v60  ;;  %v2405_v23 = vrot.slane %v2404_v3, 1 }
  0xf1   : > { %v2411_v57 = vrot.slane %v2410_v58, 1  ;;  %v2417_v11 = vrot.slane %v2416_v4, 1  ;;  %v2423_v41 = vrot.slane %v2422_v35, 1  ;;  %v2429_v43 = vrot.slane %v2428_v33, 1 }
  0xf2   : > { %v2400_v22 = vadd.f32 %v2399_v2, %v2398_v29  ;;  %v2435_v24 = vrot.slane %v2434_v12, 1  ;;  %v2441_v32 = vrot.slane %v2440_v34, 1  ;;  %v2406_v31 = vadd.f32 %v2405_v23, %v2404_v3 }
  0xf3   : > { %v2412_v38 = vadd.f32 %v2411_v57, %v2410_v58  ;;  %v2418_v49 = vadd.f32 %v2417_v11, %v2416_v4  ;;  %v2424_v53 = vadd.f32 %v2423_v41, %v2422_v35  ;;  %v2430_v36 = vadd.f32 %v2429_v43, %v2428_v33 }
  0xf4   : > { %v2436_v54 = vadd.f32 %v2435_v24, %v2434_v12  ;;  %v2442_v9 = vadd.f32 %v2441_v32, %v2440_v34  ;;  %v3014_v50 = vsel %vm2667_vm0, %v2358_v10, %v2352_v52  ;;  %v3021_v18 = vsel %vm2667_vm0, %v2406_v31, %v2400_v22 }
  0xf5   : > { %v3015_v59 = vsel %vm2669_vm1, %v2364_v17, %v3014_v50  ;;  %v5052_v16 = vunpack.c.l.bf16 %v5465_v45  ;;  %v5053_v61 = vunpack.c.h.bf16 %v5465_v45  ;;  %v3022_v13 = vsel %vm2669_vm1, %v2412_v38, %v3021_v18 }
  0xf6   : > { %v3016_v25 = vsel %vm2671_vm2, %v6607_v37, %v3015_v59  ;;  %v5056_v42 = vunpack.c.l.bf16 %v5466_v44  ;;  %v5057_v5 = vunpack.c.h.bf16 %v5466_v44  ;;  %v3023_v10 = vsel %vm2671_vm2, %v2418_v49, %v3022_v13 }
  0xf7   : > { %v3017_v52 = vsel %vm2673_vm3, %v6609_v62, %v3016_v25  ;;  %v5060_v17 = vunpack.c.l.bf16 %v5467_v19  ;;  %v5061_v6 = vunpack.c.h.bf16 %v5467_v19  ;;  %v3024_v37 = vsel %vm2673_vm3, %v2424_v53, %v3023_v10 }
  0xf8   : > { %v3018_v46 = vsel %vm2675_vm4, %v6611_v63, %v3017_v52  ;;  %v5064_v7 = vunpack.c.l.bf16 %v5468_v21  ;;  %v5065_v26 = vunpack.c.h.bf16 %v5468_v21  ;;  %v3025_v20 = vsel %vm2675_vm4, %v2430_v36, %v3024_v37 }
  0xf9   : > { %v3019_v62 = vsel %vm2677_vm5, %v6613_v15, %v3018_v46  ;;  %v5068_v40 = vunpack.c.l.bf16 %v6660_v14  ;;  %v5069_v51 = vunpack.c.h.bf16 %v6660_v14  ;;  %v3026_v60 = vsel %vm2677_vm5, %v2436_v54, %v3025_v20 }
  0xfa   : > { %v3020_v63 = vsel %vm2679_vm6, %v6615_v56, %v3019_v62  ;;  %v5072_v1 = vunpack.c.l.bf16 %v6666_v55  ;;  %v5073_v27 = vunpack.c.h.bf16 %v6666_v55  ;;  %v3027_v28 = vsel %vm2679_vm6, %v2442_v9, %v3026_v60 }
  0xfb   : > { %v5076_v48 = vunpack.c.l.bf16 %v6672_v8  ;;  %v5077_v15 = vunpack.c.h.bf16 %v6672_v8  ;;  %v5080_v29 = vunpack.c.l.bf16 %v6675_v0  ;;  %v3072_v47 = vpack.c.bf16 %v3027_v28, %v3020_v63 }
  0xfc   : > { %v5081_v39 = vunpack.c.h.bf16 %v6675_v0  ;;  %v1131_v30 = vrot.slane %v5052_v16, 4  ;;  %v1137_v3 = vrot.slane %v5053_v61, 4  ;;  %v1143_v56 = vrot.slane %v5056_v42, 4 }
  0xfd   : > { %v1149_v58 = vrot.slane %v5057_v5, 4  ;;  %v1155_v4 = vrot.slane %v5060_v17, 4  ;;  %v1161_v35 = vrot.slane %v5061_v6, 4  ;;  %3220 = vmatmul.bf16.vlgmr.msra.gmra.mxu3 %v3072_v47  ;;  %v1167_v12 = vrot.slane %v5064_v7, 4 }
  0xfe   : > { %v1132_v2 = vadd.f32 %v5052_v16, %v1131_v30  ;;  %v1138_v33 = vadd.f32 %v5053_v61, %v1137_v3  ;;  %v1173_v34 = vrot.slane %v5065_v26, 4  ;;  %v1144_v23 = vadd.f32 %v5056_v42, %v1143_v56 }
  0xff   : > { %v1150_v57 = vadd.f32 %v5057_v5, %v1149_v58  ;;  %v1156_v11 = vadd.f32 %v5060_v17, %v1155_v4  ;;  %v1162_v41 = vadd.f32 %v5061_v6, %v1161_v35  ;;  %v1168_v24 = vadd.f32 %v5064_v7, %v1167_v12 }
 0x100   : > { %v1133_v22 = vrot.slane %v1132_v2, 2  ;;  %v1139_v43 = vrot.slane %v1138_v33, 2  ;;  %v1174_v32 = vadd.f32 %v5065_v26, %v1173_v34  ;;  %v1145_v45 = vrot.slane %v1144_v23, 2 }
 0x101   : > { %v1151_v31 = vrot.slane %v1150_v57, 2  ;;  %v1157_v38 = vrot.slane %v1156_v11, 2  ;;  %v1163_v49 = vrot.slane %v1162_v41, 2  ;;  %v1169_v36 = vrot.slane %v1168_v24, 2 }
 0x102   : > { %v1134_v53 = vadd.f32 %v1133_v22, %v1132_v2  ;;  %v1140_v44 = vadd.f32 %v1139_v43, %v1138_v33  ;;  %v1175_v54 = vrot.slane %v1174_v32, 2  ;;  %v1146_v9 = vadd.f32 %v1145_v45, %v1144_v23 }
 0x103   : > { %v1152_v50 = vadd.f32 %v1151_v31, %v1150_v57  ;;  %v1158_v19 = vadd.f32 %v1157_v38, %v1156_v11  ;;  %v1164_v59 = vadd.f32 %v1163_v49, %v1162_v41  ;;  %v1170_v61 = vadd.f32 %v1169_v36, %v1168_v24 }
 0x104   : > { %v1135_v18 = vrot.slane %v1134_v53, 1  ;;  %v1141_v16 = vrot.slane %v1140_v44, 1  ;;  %v1176_v21 = vadd.f32 %v1175_v54, %v1174_v32  ;;  %v1147_v25 = vrot.slane %v1146_v9, 1 }
 0x105   : > { %v1153_v13 = vrot.slane %v1152_v50, 1  ;;  %v1159_v42 = vrot.slane %v1158_v19, 1  ;;  %v1165_v5 = vrot.slane %v1164_v59, 1  ;;  %v1171_v17 = vrot.slane %v1170_v61, 1 }
 0x106   : > { %v1136_v52 = vadd.f32 %v1135_v18, %v1134_v53  ;;  %v1142_v10 = vadd.f32 %v1141_v16, %v1140_v44  ;;  %v1177_v6 = vrot.slane %v1176_v21, 1  ;;  %v1148_v46 = vadd.f32 %v1147_v25, %v1146_v9  ;;  %v5552_v9 = vld [vmem:[%s6214_s21 + $0x1c0] sm:$0xff]   ;;  %v5553_v16 = vld [vmem:[%s6214_s21 + $0x1c8] sm:$0xff]  }
 0x107   : > { %v6692_v37 = vadd.f32 %v1153_v13, %v1152_v50  ;;  %v6694_v7 = vadd.f32 %v1159_v42, %v1158_v19  ;;  %v6696_v26 = vadd.f32 %v1165_v5, %v1164_v59  ;;  %v6698_v62 = vadd.f32 %v1171_v17, %v1170_v61  ;;  %v5554_v42 = vld [vmem:[%s6214_s21 + $0x1d0] sm:$0xff]  }
 0x108   : > { %v6700_v20 = vadd.f32 %v1177_v6, %v1176_v21  ;;  %v1179_v63 = vrot.slane %v5068_v40, 4  ;;  %v1185_v60 = vrot.slane %v5069_v51, 4  ;;  %v1191_v28 = vrot.slane %v5072_v1, 4 }
 0x109   : > { %v1197_v47 = vrot.slane %v5073_v27, 4  ;;  %v1203_v30 = vrot.slane %v5076_v48, 4  ;;  %v1209_v3 = vrot.slane %v5077_v15, 4  ;;  %v1215_v4 = vrot.slane %v5080_v29, 4 }
 0x10a   : > { %v1180_v56 = vadd.f32 %v5068_v40, %v1179_v63  ;;  %v1186_v58 = vadd.f32 %v5069_v51, %v1185_v60  ;;  %v1221_v35 = vrot.slane %v5081_v39, 4  ;;  %v1192_v2 = vadd.f32 %v5072_v1, %v1191_v28  ;;  %v5555_v60 = vld [vmem:[%s6214_s21 + $0x1d8] sm:$0xff]  }
 0x10b   : > { %v1198_v33 = vadd.f32 %v5073_v27, %v1197_v47  ;;  %v1204_v12 = vadd.f32 %v5076_v48, %v1203_v30  ;;  %v1210_v40 = vadd.f32 %v5077_v15, %v1209_v3  ;;  %v1216_v34 = vadd.f32 %v5080_v29, %v1215_v4  ;;  %v6752_v4 = vld [vmem:[%s6214_s21 + $0x1e8] sm:$0xff]  }
 0x10c   : > { %v1181_v14 = vrot.slane %v1180_v56, 2  ;;  %v1187_v51 = vrot.slane %v1186_v58, 2  ;;  %v1222_v23 = vadd.f32 %v5081_v39, %v1221_v35  ;;  %v1193_v57 = vrot.slane %v1192_v2, 2 }
 0x10d   : > { %v1199_v11 = vrot.slane %v1198_v33, 2  ;;  %v1205_v1 = vrot.slane %v1204_v12, 2  ;;  %v1211_v41 = vrot.slane %v1210_v40, 2  ;;  %v1217_v22 = vrot.slane %v1216_v34, 2 }
 0x10e   : > { %v1182_v55 = vadd.f32 %v1181_v14, %v1180_v56  ;;  %v1188_v27 = vadd.f32 %v1187_v51, %v1186_v58  ;;  %v1223_v43 = vrot.slane %v1222_v23, 2  ;;  %v1194_v48 = vadd.f32 %v1193_v57, %v1192_v2 }
 0x10f   : > { %v1200_v8 = vadd.f32 %v1199_v11, %v1198_v33  ;;  %v1206_v15 = vadd.f32 %v1205_v1, %v1204_v12  ;;  %v1212_v24 = vadd.f32 %v1211_v41, %v1210_v40  ;;  %v1218_v29 = vadd.f32 %v1217_v22, %v1216_v34  ;;  %v6758_v12 = vld [vmem:[%s6214_s21 + $0x1f0] sm:$0xff]   ;;  %v6761_v40 = vld [vmem:[%s6214_s21 + $0x1f8] sm:$0xff]  }
 0x110   : > { %v1183_v32 = vrot.slane %v1182_v55, 1  ;;  %v1189_v45 = vrot.slane %v1188_v27, 1  ;;  %v1224_v31 = vadd.f32 %v1223_v43, %v1222_v23  ;;  %v1195_v0 = vrot.slane %v1194_v48, 1 }
 0x111   : > { %v1201_v39 = vrot.slane %v1200_v8, 1  ;;  %v1207_v38 = vrot.slane %v1206_v15, 1  ;;  %v1213_v49 = vrot.slane %v1212_v24, 1  ;;  %v1219_v36 = vrot.slane %v1218_v29, 1 }
 0x112   : > { %v1184_v53 = vadd.f32 %v1183_v32, %v1182_v55  ;;  %v1190_v44 = vadd.f32 %v1189_v45, %v1188_v27  ;;  %v1225_v54 = vrot.slane %v1224_v31, 1  ;;  %v1196_v50 = vadd.f32 %v1195_v0, %v1194_v48 }
 0x113   : > { %v1202_v19 = vadd.f32 %v1201_v39, %v1200_v8  ;;  %v1208_v59 = vadd.f32 %v1207_v38, %v1206_v15  ;;  %v1214_v18 = vadd.f32 %v1213_v49, %v1212_v24  ;;  %v1220_v61 = vadd.f32 %v1219_v36, %v1218_v29 }
 0x114   : > { %v1226_v21 = vadd.f32 %v1225_v54, %v1224_v31  ;;  %v2730_v25 = vsel %vm2667_vm0, %v1142_v10, %v1136_v52  ;;  %v2737_v13 = vsel %vm2667_vm0, %v1190_v44, %v1184_v53  ;;  %v5404_v6 = vunpack.c.l.bf16 %v5552_v9  ;;  %v6746_v10 = vld [vmem:[%s6214_s21 + $0x1e0] sm:$0xff]  }
 0x115   : > { %v2731_v5 = vsel %vm2669_vm1, %v1148_v46, %v2730_v25  ;;  %v2738_v17 = vsel %vm2669_vm1, %v1196_v50, %v2737_v13  ;;  %v5405_v63 = vunpack.c.h.bf16 %v5552_v9  ;;  %v5408_v30 = vunpack.c.l.bf16 %v5553_v16 }
 0x116   : > { %v2732_v28 = vsel %vm2671_vm2, %v6692_v37, %v2731_v5  ;;  %v2739_v47 = vsel %vm2671_vm2, %v1202_v19, %v2738_v17  ;;  %v5409_v52 = vunpack.c.h.bf16 %v5553_v16  ;;  %v5412_v56 = vunpack.c.l.bf16 %v5554_v42 }
 0x117   : > { %v2733_v3 = vsel %vm2673_vm3, %v6694_v7, %v2732_v28  ;;  %v2740_v46 = vsel %vm2673_vm3, %v1208_v59, %v2739_v47  ;;  %v5413_v58 = vunpack.c.h.bf16 %v5554_v42  ;;  %v5416_v2 = vunpack.c.l.bf16 %v5555_v60 }
 0x118   : > { %v2734_v35 = vsel %vm2675_vm4, %v6696_v26, %v2733_v3  ;;  %v2741_v37 = vsel %vm2675_vm4, %v1214_v18, %v2740_v46  ;;  %v5417_v33 = vunpack.c.h.bf16 %v5555_v60  ;;  %v5420_v51 = vunpack.c.l.bf16 %v6746_v10 }
 0x119   : > { %v2735_v7 = vsel %vm2677_vm5, %v6698_v62, %v2734_v35  ;;  %v2742_v14 = vsel %vm2677_vm5, %v1220_v61, %v2741_v37  ;;  %v5421_v34 = vunpack.c.h.bf16 %v6746_v10  ;;  %v5424_v57 = vunpack.c.l.bf16 %v6752_v4 }
 0x11a   : > { %v2736_v26 = vsel %vm2679_vm6, %v6700_v20, %v2735_v7  ;;  %v2743_v23 = vsel %vm2679_vm6, %v1226_v21, %v2742_v14  ;;  %v5425_v11 = vunpack.c.h.bf16 %v6752_v4  ;;  %v5428_v41 = vunpack.c.l.bf16 %v6758_v12 }
 0x11b   : > { %v3062_v1 = vpack.c.bf16 %v2743_v23, %v2736_v26  ;;  %v5429_v62 = vunpack.c.h.bf16 %v6758_v12  ;;  %v5432_v55 = vunpack.c.l.bf16 %v6761_v40  ;;  %v5433_v27 = vunpack.c.h.bf16 %v6761_v40 }
 0x11c   : > { %v2443_v22 = vrot.slane %v5404_v6, 4  ;;  %v2449_v43 = vrot.slane %v5405_v63, 4  ;;  %v2455_v48 = vrot.slane %v5408_v30, 4  ;;  %v2461_v20 = vrot.slane %v5409_v52, 4 }
 0x11d   : > { %3170 = vmatmul.bf16.gmra.mxu0 %v3062_v1  ;;  %v2467_v8 = vrot.slane %v5412_v56, 4  ;;  %v2473_v15 = vrot.slane %v5413_v58, 4  ;;  %v2479_v24 = vrot.slane %v5416_v2, 4  ;;  %v2485_v31 = vrot.slane %v5417_v33, 4 }
 0x11e   : > { %v2444_v32 = vadd.f32 %v5404_v6, %v2443_v22  ;;  %v2450_v45 = vadd.f32 %v5405_v63, %v2449_v43  ;;  %v2456_v29 = vadd.f32 %v5408_v30, %v2455_v48  ;;  %v2462_v0 = vadd.f32 %v5409_v52, %v2461_v20 }
 0x11f   : > { %v2468_v39 = vadd.f32 %v5412_v56, %v2467_v8  ;;  %v2474_v38 = vadd.f32 %v5413_v58, %v2473_v15  ;;  %v2480_v49 = vadd.f32 %v5416_v2, %v2479_v24  ;;  %v2486_v54 = vadd.f32 %v5417_v33, %v2485_v31 }
 0x120   : > { %v2445_v53 = vrot.slane %v2444_v32, 2  ;;  %v2451_v44 = vrot.slane %v2450_v45, 2  ;;  %v2457_v36 = vrot.slane %v2456_v29, 2  ;;  %v2463_v9 = vrot.slane %v2462_v0, 2 }
 0x121   : > { %v2469_v50 = vrot.slane %v2468_v39, 2  ;;  %v2475_v19 = vrot.slane %v2474_v38, 2  ;;  %v2481_v59 = vrot.slane %v2480_v49, 2  ;;  %v2487_v21 = vrot.slane %v2486_v54, 2 }
 0x122   : > { %v2446_v18 = vadd.f32 %v2445_v53, %v2444_v32  ;;  %v2452_v16 = vadd.f32 %v2451_v44, %v2450_v45  ;;  %v2458_v61 = vadd.f32 %v2457_v36, %v2456_v29  ;;  %v2464_v25 = vadd.f32 %v2463_v9, %v2462_v0 }
 0x123   : > { %v2470_v13 = vadd.f32 %v2469_v50, %v2468_v39  ;;  %v2476_v42 = vadd.f32 %v2475_v19, %v2474_v38  ;;  %v2482_v5 = vadd.f32 %v2481_v59, %v2480_v49  ;;  %v2488_v60 = vadd.f32 %v2487_v21, %v2486_v54 }
 0x124   : > { %v2447_v17 = vrot.slane %v2446_v18, 1  ;;  %v2453_v6 = vrot.slane %v2452_v16, 1  ;;  %v2459_v63 = vrot.slane %v2458_v61, 1  ;;  %v2465_v28 = vrot.slane %v2464_v25, 1 }
 0x125   : > { %v2471_v47 = vrot.slane %v2470_v13, 1  ;;  %v2477_v30 = vrot.slane %v2476_v42, 1  ;;  %v2483_v52 = vrot.slane %v2482_v5, 1  ;;  %v2489_v58 = vrot.slane %v2488_v60, 1 }
 0x126   : > { %v2448_v3 = vadd.f32 %v2447_v17, %v2446_v18  ;;  %v2454_v46 = vadd.f32 %v2453_v6, %v2452_v16  ;;  %v6777_v56 = vadd.f32 %v2459_v63, %v2458_v61  ;;  %v6779_v35 = vadd.f32 %v2465_v28, %v2464_v25  ;;  %v5473_v18 = vld [vmem:[%s6207_s11 + $0x140] sm:$0xff]   ;;  %v5475_v63 = vld [vmem:[%s6207_s11 + $0x150] sm:$0xff]  }
 0x127   : > { %v6781_v37 = vadd.f32 %v2471_v47, %v2470_v13  ;;  %v6783_v2 = vadd.f32 %v2477_v30, %v2476_v42  ;;  %v6785_v33 = vadd.f32 %v2483_v52, %v2482_v5  ;;  %v6787_v7 = vadd.f32 %v2489_v58, %v2488_v60  ;;  %v5474_v13 = vld [vmem:[%s6207_s11 + $0x148] sm:$0xff]   ;;  %v5476_v52 = vld [vmem:[%s6207_s11 + $0x158] sm:$0xff]  }
 0x128   : > { %v2491_v14 = vrot.slane %v5420_v51, 4  ;;  %v2497_v26 = vrot.slane %v5421_v34, 4  ;;  %v2503_v23 = vrot.slane %v5424_v57, 4  ;;  %v2509_v1 = vrot.slane %v5425_v11, 4 }
 0x129   : > { %v2515_v22 = vrot.slane %v5428_v41, 4  ;;  %v2521_v43 = vrot.slane %v5429_v62, 4  ;;  %v2527_v48 = vrot.slane %v5432_v55, 4  ;;  %v2533_v24 = vrot.slane %v5433_v27, 4 }
 0x12a   : > { %v2492_v20 = vadd.f32 %v5420_v51, %v2491_v14  ;;  %v2498_v8 = vadd.f32 %v5421_v34, %v2497_v26  ;;  %v2504_v15 = vadd.f32 %v5424_v57, %v2503_v23  ;;  %v2510_v32 = vadd.f32 %v5425_v11, %v2509_v1  ;;  %v6831_v1 = vld [vmem:[%s6207_s11 + $0x160] sm:$0xff]  }
 0x12b   : > { %v2516_v45 = vadd.f32 %v5428_v41, %v2515_v22  ;;  %v2522_v29 = vadd.f32 %v5429_v62, %v2521_v43  ;;  %v2528_v51 = vadd.f32 %v5432_v55, %v2527_v48  ;;  %v2534_v57 = vadd.f32 %v5433_v27, %v2533_v24  ;;  %v6837_v48 = vld [vmem:[%s6207_s11 + $0x168] sm:$0xff]   ;;  %v6843_v24 = vld [vmem:[%s6207_s11 + $0x170] sm:$0xff]  }
 0x12c   : > { %v2493_v10 = vrot.slane %v2492_v20, 2  ;;  %v2499_v34 = vrot.slane %v2498_v8, 2  ;;  %v2505_v31 = vrot.slane %v2504_v15, 2  ;;  %v2511_v0 = vrot.slane %v2510_v32, 2 }
 0x12d   : > { %v2517_v39 = vrot.slane %v2516_v45, 2  ;;  %v2523_v38 = vrot.slane %v2522_v29, 2  ;;  %v2529_v4 = vrot.slane %v2528_v51, 2  ;;  %v2535_v53 = vrot.slane %v2534_v57, 2 }
 0x12e   : > { %v2494_v11 = vadd.f32 %v2493_v10, %v2492_v20  ;;  %v2500_v49 = vadd.f32 %v2499_v34, %v2498_v8  ;;  %v2506_v41 = vadd.f32 %v2505_v31, %v2504_v15  ;;  %v2512_v12 = vadd.f32 %v2511_v0, %v2510_v32 }
 0x12f   : > { %v2518_v62 = vadd.f32 %v2517_v39, %v2516_v45  ;;  %v2524_v44 = vadd.f32 %v2523_v38, %v2522_v29  ;;  %v2530_v55 = vadd.f32 %v2529_v4, %v2528_v51  ;;  %v2536_v40 = vadd.f32 %v2535_v53, %v2534_v57  ;;  %v6850_v51 = vld [vmem:[%s6207_s11 + $0x178] sm:$0xff]  }
 0x130   : > { %v2495_v36 = vrot.slane %v2494_v11, 1  ;;  %v2501_v54 = vrot.slane %v2500_v49, 1  ;;  %v2507_v9 = vrot.slane %v2506_v41, 1  ;;  %v2513_v27 = vrot.slane %v2512_v12, 1 }
 0x131   : > { %v2519_v50 = vrot.slane %v2518_v62, 1  ;;  %v2525_v19 = vrot.slane %v2524_v44, 1  ;;  %v2531_v59 = vrot.slane %v2530_v55, 1  ;;  %v2537_v25 = vrot.slane %v2536_v40, 1 }
 0x132   : > { %v2496_v16 = vadd.f32 %v2495_v36, %v2494_v11  ;;  %v2502_v61 = vadd.f32 %v2501_v54, %v2500_v49  ;;  %v2508_v21 = vadd.f32 %v2507_v9, %v2506_v41  ;;  %v2514_v42 = vadd.f32 %v2513_v27, %v2512_v12 }
 0x133   : > { %v2520_v5 = vadd.f32 %v2519_v50, %v2518_v62  ;;  %v2526_v17 = vadd.f32 %v2525_v19, %v2524_v44  ;;  %v2532_v6 = vadd.f32 %v2531_v59, %v2530_v55  ;;  %v2538_v60 = vadd.f32 %v2537_v25, %v2536_v40 }
 0x134   : > { %v3028_v28 = vsel %vm2667_vm0, %v2454_v46, %v2448_v3  ;;  %v3035_v47 = vsel %vm2667_vm0, %v2502_v61, %v2496_v16  ;;  %v5084_v30 = vunpack.c.l.bf16 %v5473_v18  ;;  %v5085_v26 = vunpack.c.h.bf16 %v5473_v18 }
 0x135   : > { %v3029_v58 = vsel %vm2669_vm1, %v6777_v56, %v3028_v28  ;;  %v3036_v14 = vsel %vm2669_vm1, %v2508_v21, %v3035_v47  ;;  %v5088_v23 = vunpack.c.l.bf16 %v5474_v13  ;;  %v5089_v46 = vunpack.c.h.bf16 %v5474_v13 }
 0x136   : > { %v3030_v22 = vsel %vm2671_vm2, %v6779_v35, %v3029_v58  ;;  %v3037_v3 = vsel %vm2671_vm2, %v2514_v42, %v3036_v14  ;;  %v5092_v43 = vunpack.c.l.bf16 %v5475_v63  ;;  %v5093_v8 = vunpack.c.h.bf16 %v5475_v63 }
 0x137   : > { %v3031_v20 = vsel %vm2673_vm3, %v6781_v37, %v3030_v22  ;;  %v3038_v56 = vsel %vm2673_vm3, %v2520_v5, %v3037_v3  ;;  %v5096_v15 = vunpack.c.l.bf16 %v5476_v52  ;;  %v5097_v45 = vunpack.c.h.bf16 %v5476_v52 }
 0x138   : > { %v3032_v32 = vsel %vm2675_vm4, %v6783_v2, %v3031_v20  ;;  %v3039_v35 = vsel %vm2675_vm4, %v2526_v17, %v3038_v56  ;;  %v5100_v29 = vunpack.c.l.bf16 %v6831_v1  ;;  %v5101_v34 = vunpack.c.h.bf16 %v6831_v1 }
 0x139   : > { %v3033_v10 = vsel %vm2677_vm5, %v6785_v33, %v3032_v32  ;;  %v3040_v37 = vsel %vm2677_vm5, %v2532_v6, %v3039_v35  ;;  %v5104_v31 = vunpack.c.l.bf16 %v6837_v48  ;;  %v5105_v0 = vunpack.c.h.bf16 %v6837_v48 }
 0x13a   : > { %v3034_v57 = vsel %vm2679_vm6, %v6787_v7, %v3033_v10  ;;  %v3041_v2 = vsel %vm2679_vm6, %v2538_v60, %v3040_v37  ;;  %v5108_v39 = vunpack.c.l.bf16 %v6843_v24  ;;  %v5109_v4 = vunpack.c.h.bf16 %v6843_v24 }
 0x13b   : > { %v3073_v38 = vpack.c.bf16 %v3041_v2, %v3034_v57  ;;  %v5112_v33 = vunpack.c.l.bf16 %v6850_v51  ;;  %v5113_v11 = vunpack.c.h.bf16 %v6850_v51  ;;  %v1227_v49 = vrot.slane %v5084_v30, 4 }
 0x13c   : > { %v1233_v41 = vrot.slane %v5085_v26, 4  ;;  %v1239_v53 = vrot.slane %v5088_v23, 4  ;;  %v1245_v12 = vrot.slane %v5089_v46, 4  ;;  %v1251_v62 = vrot.slane %v5092_v43, 4 }
 0x13d   : > { %3225 = vmatmul.bf16.gmra.mxu3 %v3073_v38  ;;  %v1257_v7 = vrot.slane %v5093_v8, 4  ;;  %v1263_v44 = vrot.slane %v5096_v15, 4  ;;  %v1269_v55 = vrot.slane %v5097_v45, 4  ;;  %v1228_v36 = vadd.f32 %v5084_v30, %v1227_v49 }
 0x13e   : > { %v1234_v54 = vadd.f32 %v5085_v26, %v1233_v41  ;;  %v1240_v9 = vadd.f32 %v5088_v23, %v1239_v53  ;;  %v1246_v40 = vadd.f32 %v5089_v46, %v1245_v12  ;;  %v1252_v27 = vadd.f32 %v5092_v43, %v1251_v62 }
 0x13f   : > { %v1258_v50 = vadd.f32 %v5093_v8, %v1257_v7  ;;  %v1264_v19 = vadd.f32 %v5096_v15, %v1263_v44  ;;  %v1270_v59 = vadd.f32 %v5097_v45, %v1269_v55  ;;  %v1229_v18 = vrot.slane %v1228_v36, 2 }
 0x140   : > { %v1235_v16 = vrot.slane %v1234_v54, 2  ;;  %v1241_v61 = vrot.slane %v1240_v9, 2  ;;  %v1247_v21 = vrot.slane %v1246_v40, 2  ;;  %v1253_v25 = vrot.slane %v1252_v27, 2 }
 0x141   : > { %v1259_v13 = vrot.slane %v1258_v50, 2  ;;  %v1265_v42 = vrot.slane %v1264_v19, 2  ;;  %v1271_v5 = vrot.slane %v1270_v59, 2  ;;  %v1230_v17 = vadd.f32 %v1229_v18, %v1228_v36 }
 0x142   : > { %v1236_v6 = vadd.f32 %v1235_v16, %v1234_v54  ;;  %v1242_v63 = vadd.f32 %v1241_v61, %v1240_v9  ;;  %v1248_v60 = vadd.f32 %v1247_v21, %v1246_v40  ;;  %v1254_v28 = vadd.f32 %v1253_v25, %v1252_v27 }
 0x143   : > { %v1260_v47 = vadd.f32 %v1259_v13, %v1258_v50  ;;  %v1266_v30 = vadd.f32 %v1265_v42, %v1264_v19  ;;  %v1272_v52 = vadd.f32 %v1271_v5, %v1270_v59  ;;  %v1231_v58 = vrot.slane %v1230_v17, 1 }
 0x144   : > { %v1237_v14 = vrot.slane %v1236_v6, 1  ;;  %v1243_v26 = vrot.slane %v1242_v63, 1  ;;  %v1249_v23 = vrot.slane %v1248_v60, 1  ;;  %v1255_v22 = vrot.slane %v1254_v28, 1 }
 0x145   : > { %v1261_v3 = vrot.slane %v1260_v47, 1  ;;  %v1267_v46 = vrot.slane %v1266_v30, 1  ;;  %v1273_v43 = vrot.slane %v1272_v52, 1  ;;  %v1232_v20 = vadd.f32 %v1231_v58, %v1230_v17  ;;  %v5481_v17 = vld [vmem:[%s6207_s11 + $0x180] sm:$0xff]  }
 0x146   : > { %v1238_v56 = vadd.f32 %v1237_v14, %v1236_v6  ;;  %v6865_v8 = vadd.f32 %v1243_v26, %v1242_v63  ;;  %v6867_v15 = vadd.f32 %v1249_v23, %v1248_v60  ;;  %v6869_v32 = vadd.f32 %v1255_v22, %v1254_v28  ;;  %v5483_v26 = vld [vmem:[%s6207_s11 + $0x190] sm:$0xff]  }
 0x147   : > { %v6871_v35 = vadd.f32 %v1261_v3, %v1260_v47  ;;  %v6873_v45 = vadd.f32 %v1267_v46, %v1266_v30  ;;  %v6875_v10 = vadd.f32 %v1273_v43, %v1272_v52  ;;  %v1275_v37 = vrot.slane %v5100_v29, 4  ;;  %v5482_v47 = vld [vmem:[%s6207_s11 + $0x188] sm:$0xff]   ;;  %v5484_v43 = vld [vmem:[%s6207_s11 + $0x198] sm:$0xff]  }
 0x148   : > { %v1281_v57 = vrot.slane %v5101_v34, 4  ;;  %v1287_v2 = vrot.slane %v5104_v31, 4  ;;  %v1293_v38 = vrot.slane %v5105_v0, 4  ;;  %v1299_v49 = vrot.slane %v5108_v39, 4 }
 0x149   : > { %v1305_v41 = vrot.slane %v5109_v4, 4  ;;  %v1311_v53 = vrot.slane %v5112_v33, 4  ;;  %v1317_v12 = vrot.slane %v5113_v11, 4  ;;  %v1276_v62 = vadd.f32 %v5100_v29, %v1275_v37 }
 0x14a   : > { %v1282_v7 = vadd.f32 %v5101_v34, %v1281_v57  ;;  %v1288_v44 = vadd.f32 %v5104_v31, %v1287_v2  ;;  %v1294_v55 = vadd.f32 %v5105_v0, %v1293_v38  ;;  %v1300_v36 = vadd.f32 %v5108_v39, %v1299_v49  ;;  %v6919_v49 = vld [vmem:[%s6207_s11 + $0x1a0] sm:$0xff]  }
 0x14b   : > { %v1306_v54 = vadd.f32 %v5109_v4, %v1305_v41  ;;  %v1312_v9 = vadd.f32 %v5112_v33, %v1311_v53  ;;  %v1318_v29 = vadd.f32 %v5113_v11, %v1317_v12  ;;  %v1277_v1 = vrot.slane %v1276_v62, 2  ;;  %v6925_v12 = vld [vmem:[%s6207_s11 + $0x1a8] sm:$0xff]  }
 0x14c   : > { %v1283_v34 = vrot.slane %v1282_v7, 2  ;;  %v1289_v40 = vrot.slane %v1288_v44, 2  ;;  %v1295_v27 = vrot.slane %v1294_v55, 2  ;;  %v1301_v31 = vrot.slane %v1300_v36, 2 }
 0x14d   : > { %v1307_v50 = vrot.slane %v1306_v54, 2  ;;  %v1313_v48 = vrot.slane %v1312_v9, 2  ;;  %v1319_v0 = vrot.slane %v1318_v29, 2  ;;  %v1278_v19 = vadd.f32 %v1277_v1, %v1276_v62 }
 0x14e   : > { %v1284_v39 = vadd.f32 %v1283_v34, %v1282_v7  ;;  %v1290_v59 = vadd.f32 %v1289_v40, %v1288_v44  ;;  %v1296_v24 = vadd.f32 %v1295_v27, %v1294_v55  ;;  %v1302_v4 = vadd.f32 %v1301_v31, %v1300_v36  ;;  %v6931_v55 = vld [vmem:[%s6207_s11 + $0x1b0] sm:$0xff]  }
 0x14f   : > { %v1308_v18 = vadd.f32 %v1307_v50, %v1306_v54  ;;  %v1314_v33 = vadd.f32 %v1313_v48, %v1312_v9  ;;  %v1320_v16 = vadd.f32 %v1319_v0, %v1318_v29  ;;  %v1279_v51 = vrot.slane %v1278_v19, 1  ;;  %v6939_v29 = vld [vmem:[%s6207_s11 + $0x1b8] sm:$0xff]  }
 0x150   : > { %v1285_v11 = vrot.slane %v1284_v39, 1  ;;  %v1291_v61 = vrot.slane %v1290_v59, 1  ;;  %v1297_v21 = vrot.slane %v1296_v24, 1  ;;  %v1303_v25 = vrot.slane %v1302_v4, 1 }
 0x151   : > { %v1309_v13 = vrot.slane %v1308_v18, 1  ;;  %v1315_v42 = vrot.slane %v1314_v33, 1  ;;  %v1321_v5 = vrot.slane %v1320_v16, 1  ;;  %v1280_v6 = vadd.f32 %v1279_v51, %v1278_v19  ;;  %v4888_v51 = vld [vmem:[%s8483_s5 + $0x38] sm:$0xff] }
 0x152   : > { %v1286_v63 = vadd.f32 %v1285_v11, %v1284_v39  ;;  %v1292_v60 = vadd.f32 %v1291_v61, %v1290_v59  ;;  %v1298_v28 = vadd.f32 %v1297_v21, %v1296_v24  ;;  %v1304_v30 = vadd.f32 %v1303_v25, %v1302_v4  ;;  %3425 = vmatpush.bf16.msra.mxu2 %v4888_v51 }
 0x153   : > { %v1310_v52 = vadd.f32 %v1309_v13, %v1308_v18  ;;  %v1316_v58 = vadd.f32 %v1315_v42, %v1314_v33  ;;  %v1322_v14 = vadd.f32 %v1321_v5, %v1320_v16  ;;  %v2744_v23 = vsel %vm2667_vm0, %v1238_v56, %v1232_v20 }
 0x154   : > { %v2751_v22 = vsel %vm2667_vm0, %v1286_v63, %v1280_v6  ;;  %v5116_v3 = vunpack.c.l.bf16 %v5481_v17  ;;  %v5117_v46 = vunpack.c.h.bf16 %v5481_v17  ;;  %v2745_v37 = vsel %vm2669_vm1, %v6865_v8, %v2744_v23  ;;  %v4887_v6 = vld [vmem:[%s8483_s5 + $0x30] sm:$0xff] }
 0x155   : > { %v2752_v57 = vsel %vm2669_vm1, %v1292_v60, %v2751_v22  ;;  %v5120_v2 = vunpack.c.l.bf16 %v5482_v47  ;;  %v5121_v38 = vunpack.c.h.bf16 %v5482_v47  ;;  %v2746_v41 = vsel %vm2671_vm2, %v6867_v15, %v2745_v37 }
 0x156   : > { %v2753_v20 = vsel %vm2671_vm2, %v1298_v28, %v2752_v57  ;;  %v5124_v56 = vunpack.c.l.bf16 %v5483_v26  ;;  %v5125_v53 = vunpack.c.h.bf16 %v5483_v26  ;;  %v2747_v62 = vsel %vm2673_vm3, %v6869_v32, %v2746_v41  ;;  %3426 = vmatpush.bf16.msra.mxu2 %v4887_v6 }
 0x157   : > { %v2754_v8 = vsel %vm2673_vm3, %v1304_v30, %v2753_v20  ;;  %v5128_v7 = vunpack.c.l.bf16 %v5484_v43  ;;  %v5129_v44 = vunpack.c.h.bf16 %v5484_v43  ;;  %v2748_v36 = vsel %vm2675_vm4, %v6871_v35, %v2747_v62 }
 0x158   : > { %v2755_v15 = vsel %vm2675_vm4, %v1310_v52, %v2754_v8  ;;  %v5132_v54 = vunpack.c.l.bf16 %v6919_v49  ;;  %v5133_v9 = vunpack.c.h.bf16 %v6919_v49  ;;  %v2749_v32 = vsel %vm2677_vm5, %v6873_v45, %v2748_v36 }
 0x159   : > { %v2756_v1 = vsel %vm2677_vm5, %v1316_v58, %v2755_v15  ;;  %v5136_v34 = vunpack.c.l.bf16 %v6925_v12  ;;  %v5137_v40 = vunpack.c.h.bf16 %v6925_v12  ;;  %v2750_v35 = vsel %vm2679_vm6, %v6875_v10, %v2749_v32 }
 0x15a   : > { %v2757_v27 = vsel %vm2679_vm6, %v1322_v14, %v2756_v1  ;;  %v5140_v31 = vunpack.c.l.bf16 %v6931_v55  ;;  %v5141_v50 = vunpack.c.h.bf16 %v6931_v55  ;;  %v5144_v0 = vunpack.c.l.bf16 %v6939_v29 }
 0x15b   : > { %v3063_v48 = vpack.c.bf16 %v2757_v27, %v2750_v35  ;;  %v5145_v45 = vunpack.c.h.bf16 %v6939_v29  ;;  %v1323_v19 = vrot.slane %v5116_v3, 4  ;;  %v1329_v39 = vrot.slane %v5117_v46, 4 }
 0x15c   : > { %v1335_v59 = vrot.slane %v5120_v2, 4  ;;  %v1341_v24 = vrot.slane %v5121_v38, 4  ;;  %v1347_v4 = vrot.slane %v5124_v56, 4  ;;  %v1353_v33 = vrot.slane %v5125_v53, 4 }
 0x15d   : > { %3175 = vmatmul.bf16.gmra.mxu0 %v3063_v48  ;;  %v1324_v18 = vadd.f32 %v5116_v3, %v1323_v19  ;;  %v1359_v10 = vrot.slane %v5128_v7, 4  ;;  %v1365_v16 = vrot.slane %v5129_v44, 4  ;;  %v1330_v11 = vadd.f32 %v5117_v46, %v1329_v39 }
 0x15e   : > { %v1336_v61 = vadd.f32 %v5120_v2, %v1335_v59  ;;  %v1342_v21 = vadd.f32 %v5121_v38, %v1341_v24  ;;  %v1348_v25 = vadd.f32 %v5124_v56, %v1347_v4  ;;  %v1354_v42 = vadd.f32 %v5125_v53, %v1353_v33 }
 0x15f   : > { %v1325_v13 = vrot.slane %v1324_v18, 2  ;;  %v1360_v5 = vadd.f32 %v5128_v7, %v1359_v10  ;;  %v1366_v17 = vadd.f32 %v5129_v44, %v1365_v16  ;;  %v1331_v63 = vrot.slane %v1330_v11, 2 }
 0x160   : > { %v1337_v60 = vrot.slane %v1336_v61, 2  ;;  %v1343_v28 = vrot.slane %v1342_v21, 2  ;;  %v1349_v47 = vrot.slane %v1348_v25, 2  ;;  %v1355_v52 = vrot.slane %v1354_v42, 2 }
 0x161   : > { %v1326_v30 = vadd.f32 %v1325_v13, %v1324_v18  ;;  %v1361_v58 = vrot.slane %v1360_v5, 2  ;;  %v1367_v14 = vrot.slane %v1366_v17, 2  ;;  %v1332_v26 = vadd.f32 %v1331_v63, %v1330_v11 }
 0x162   : > { %v1338_v23 = vadd.f32 %v1337_v60, %v1336_v61  ;;  %v1344_v22 = vadd.f32 %v1343_v28, %v1342_v21  ;;  %v1350_v3 = vadd.f32 %v1349_v47, %v1348_v25  ;;  %v1356_v43 = vadd.f32 %v1355_v52, %v1354_v42 }
 0x163   : > { %v1327_v46 = vrot.slane %v1326_v30, 1  ;;  %v1362_v37 = vadd.f32 %v1361_v58, %v1360_v5  ;;  %v1368_v57 = vadd.f32 %v1367_v14, %v1366_v17  ;;  %v1333_v2 = vrot.slane %v1332_v26, 1 }
 0x164   : > { %v1339_v38 = vrot.slane %v1338_v23, 1  ;;  %v1345_v41 = vrot.slane %v1344_v22, 1  ;;  %v1351_v20 = vrot.slane %v1350_v3, 1  ;;  %v1357_v53 = vrot.slane %v1356_v43, 1 }
 0x165   : > { %v1328_v56 = vadd.f32 %v1327_v46, %v1326_v30  ;;  %v1363_v62 = vrot.slane %v1362_v37, 1  ;;  %v1369_v8 = vrot.slane %v1368_v57, 1  ;;  %v1334_v7 = vadd.f32 %v1333_v2, %v1332_v26  ;;  %v5489_v26 = vld [vmem:[%s6207_s11 + $0x1c0] sm:$0xff]  }
 0x166   : > { %v1340_v44 = vadd.f32 %v1339_v38, %v1338_v23  ;;  %v6959_v36 = vadd.f32 %v1345_v41, %v1344_v22  ;;  %v6961_v15 = vadd.f32 %v1351_v20, %v1350_v3  ;;  %v6963_v32 = vadd.f32 %v1357_v53, %v1356_v43  ;;  %v5490_v43 = vld [vmem:[%s6207_s11 + $0x1c8] sm:$0xff]   ;;  %v5491_v41 = vld [vmem:[%s6207_s11 + $0x1d0] sm:$0xff]  }
 0x167   : > { %v6965_v1 = vadd.f32 %v1363_v62, %v1362_v37  ;;  %v6967_v35 = vadd.f32 %v1369_v8, %v1368_v57  ;;  %v1371_v27 = vrot.slane %v5132_v54, 4  ;;  %v1377_v48 = vrot.slane %v5133_v9, 4 }
 0x168   : > { %v1383_v19 = vrot.slane %v5136_v34, 4  ;;  %v1389_v39 = vrot.slane %v5137_v40, 4  ;;  %v1395_v59 = vrot.slane %v5140_v31, 4  ;;  %v1401_v4 = vrot.slane %v5141_v50, 4 }
 0x169   : > { %v1372_v24 = vadd.f32 %v5132_v54, %v1371_v27  ;;  %v1407_v18 = vrot.slane %v5144_v0, 4  ;;  %v1413_v33 = vrot.slane %v5145_v45, 4  ;;  %v1378_v10 = vadd.f32 %v5133_v9, %v1377_v48  ;;  %v5492_v27 = vld [vmem:[%s6207_s11 + $0x1d8] sm:$0xff]  }
 0x16a   : > { %v1384_v16 = vadd.f32 %v5136_v34, %v1383_v19  ;;  %v1390_v51 = vadd.f32 %v5137_v40, %v1389_v39  ;;  %v1396_v54 = vadd.f32 %v5140_v31, %v1395_v59  ;;  %v1402_v61 = vadd.f32 %v5141_v50, %v1401_v4 }
 0x16b   : > { %v1373_v11 = vrot.slane %v1372_v24, 2  ;;  %v1408_v21 = vadd.f32 %v5144_v0, %v1407_v18  ;;  %v1414_v49 = vadd.f32 %v5145_v45, %v1413_v33  ;;  %v1379_v9 = vrot.slane %v1378_v10, 2  ;;  %v7018_v18 = vld [vmem:[%s6207_s11 + $0x1e8] sm:$0xff]  }
 0x16c   : > { %v1385_v25 = vrot.slane %v1384_v16, 2  ;;  %v1391_v13 = vrot.slane %v1390_v51, 2  ;;  %v1397_v34 = vrot.slane %v1396_v54, 2  ;;  %v1403_v12 = vrot.slane %v1402_v61, 2 }
 0x16d   : > { %v1374_v42 = vadd.f32 %v1373_v11, %v1372_v24  ;;  %v1409_v40 = vrot.slane %v1408_v21, 2  ;;  %v1415_v5 = vrot.slane %v1414_v49, 2  ;;  %v1380_v17 = vadd.f32 %v1379_v9, %v1378_v10  ;;  %v7012_v24 = vld [vmem:[%s6207_s11 + $0x1e0] sm:$0xff]  }
 0x16e   : > { %v1386_v31 = vadd.f32 %v1385_v25, %v1384_v16  ;;  %v1392_v6 = vadd.f32 %v1391_v13, %v1390_v51  ;;  %v1398_v55 = vadd.f32 %v1397_v34, %v1396_v54  ;;  %v1404_v63 = vadd.f32 %v1403_v12, %v1402_v61  ;;  %v7024_v51 = vld [vmem:[%s6207_s11 + $0x1f0] sm:$0xff]   ;;  %v7027_v54 = vld [vmem:[%s6207_s11 + $0x1f8] sm:$0xff]  }
 0x16f   : > { %v1375_v50 = vrot.slane %v1374_v42, 1  ;;  %v1410_v0 = vadd.f32 %v1409_v40, %v1408_v21  ;;  %v1416_v60 = vadd.f32 %v1415_v5, %v1414_v49  ;;  %v1381_v29 = vrot.slane %v1380_v17, 1 }
 0x170   : > { %v1387_v45 = vrot.slane %v1386_v31, 1  ;;  %v1393_v28 = vrot.slane %v1392_v6, 1  ;;  %v1399_v47 = vrot.slane %v1398_v55, 1  ;;  %v1405_v52 = vrot.slane %v1404_v63, 1 }
 0x171   : > { %v1376_v30 = vadd.f32 %v1375_v50, %v1374_v42  ;;  %v1411_v58 = vrot.slane %v1410_v0, 1  ;;  %v1417_v14 = vrot.slane %v1416_v60, 1  ;;  %v1382_v23 = vadd.f32 %v1381_v29, %v1380_v17  ;;  %v4886_v50 = vld [vmem:[%s8483_s5 + $0x28] sm:$0xff] }
 0x172   : > { %v1388_v22 = vadd.f32 %v1387_v45, %v1386_v31  ;;  %v1394_v3 = vadd.f32 %v1393_v28, %v1392_v6  ;;  %v1400_v46 = vadd.f32 %v1399_v47, %v1398_v55  ;;  %v1406_v37 = vadd.f32 %v1405_v52, %v1404_v63  ;;  %3427 = vmatpush.bf16.msra.mxu2 %v4886_v50  ;;  %v4885_v52 = vld [vmem:[%s8483_s5 + $0x20] sm:$0xff] }
 0x173   : > { %v1412_v57 = vadd.f32 %v1411_v58, %v1410_v0  ;;  %v1418_v2 = vadd.f32 %v1417_v14, %v1416_v60  ;;  %v2758_v38 = vsel %vm2667_vm0, %v1334_v7, %v1328_v56  ;;  %v2765_v53 = vsel %vm2667_vm0, %v1382_v23, %v1376_v30 }
 0x174   : > { %v2759_v20 = vsel %vm2669_vm1, %v1340_v44, %v2758_v38  ;;  %v5148_v62 = vunpack.c.l.bf16 %v5489_v26  ;;  %v5149_v8 = vunpack.c.h.bf16 %v5489_v26  ;;  %v2766_v19 = vsel %vm2669_vm1, %v1388_v22, %v2765_v53 }
 0x175   : > { %v2760_v48 = vsel %vm2671_vm2, %v6959_v36, %v2759_v20  ;;  %v5152_v39 = vunpack.c.l.bf16 %v5490_v43  ;;  %v5153_v59 = vunpack.c.h.bf16 %v5490_v43  ;;  %v2767_v7 = vsel %vm2671_vm2, %v1394_v3, %v2766_v19 }
 0x176   : > { %v2761_v56 = vsel %vm2673_vm3, %v6961_v15, %v2760_v48  ;;  %v5156_v44 = vunpack.c.l.bf16 %v5491_v41  ;;  %v5157_v4 = vunpack.c.h.bf16 %v5491_v41  ;;  %v2768_v36 = vsel %vm2673_vm3, %v1400_v46, %v2767_v7  ;;  %3428 = vmatpush.bf16.msra.mxu2 %v4885_v52 }
 0x177   : > { %v2762_v33 = vsel %vm2675_vm4, %v6963_v32, %v2761_v56  ;;  %v5160_v10 = vunpack.c.l.bf16 %v5492_v27  ;;  %v5161_v16 = vunpack.c.h.bf16 %v5492_v27  ;;  %v2769_v11 = vsel %vm2675_vm4, %v1406_v37, %v2768_v36 }
 0x178   : > { %v2763_v15 = vsel %vm2677_vm5, %v6965_v1, %v2762_v33  ;;  %v5164_v61 = vunpack.c.l.bf16 %v7012_v24  ;;  %v5165_v21 = vunpack.c.h.bf16 %v7012_v24  ;;  %v2770_v49 = vsel %vm2677_vm5, %v1412_v57, %v2769_v11 }
 0x179   : > { %v2764_v32 = vsel %vm2679_vm6, %v6967_v35, %v2763_v15  ;;  %v5168_v9 = vunpack.c.l.bf16 %v7018_v18  ;;  %v5169_v25 = vunpack.c.h.bf16 %v7018_v18  ;;  %v2771_v13 = vsel %vm2679_vm6, %v1418_v2, %v2770_v49  ;;  %v4883_v49 = vld [vmem:[%s8483_s5 + $0x10] sm:$0xff] }
 0x17a   : > { %v5172_v34 = vunpack.c.l.bf16 %v7024_v51  ;;  %v5173_v1 = vunpack.c.h.bf16 %v7024_v51  ;;  %v5176_v42 = vunpack.c.l.bf16 %v7027_v54  ;;  %v3064_v12 = vpack.c.bf16 %v2771_v13, %v2764_v32 }
 0x17b   : > { %v5177_v40 = vunpack.c.h.bf16 %v7027_v54  ;;  %v1419_v5 = vrot.slane %v5148_v62, 4  ;;  %v1425_v17 = vrot.slane %v5149_v8, 4  ;;  %v1431_v35 = vrot.slane %v5152_v39, 4 }
 0x17c   : > { %v1437_v31 = vrot.slane %v5153_v59, 4  ;;  %v1443_v6 = vrot.slane %v5156_v44, 4  ;;  %v1449_v55 = vrot.slane %v5157_v4, 4  ;;  %3180 = vmatmul.bf16.gmra.mxu0 %v3064_v12  ;;  %v1455_v60 = vrot.slane %v5160_v10, 4 }
 0x17d   : > { %v1420_v63 = vadd.f32 %v5148_v62, %v1419_v5  ;;  %v1426_v0 = vadd.f32 %v5149_v8, %v1425_v17  ;;  %v1461_v29 = vrot.slane %v5161_v16, 4  ;;  %v1432_v45 = vadd.f32 %v5152_v39, %v1431_v35  ;;  %v4884_v8 = vld [vmem:[%s8483_s5 + $0x18] sm:$0xff] }
 0x17e   : > { %v1438_v28 = vadd.f32 %v5153_v59, %v1437_v31  ;;  %v1444_v47 = vadd.f32 %v5156_v44, %v1443_v6  ;;  %v1450_v30 = vadd.f32 %v5157_v4, %v1449_v55  ;;  %v1456_v26 = vadd.f32 %v5160_v10, %v1455_v60  ;;  %3429 = vmatpush.bf16.msra.mxu2 %v4884_v8  ;;  %v5179_v8 = vld [vmem:[%s6214_s21] sm:$0xff]  }
 0x17f   : > { %v1421_v58 = vrot.slane %v1420_v63, 2  ;;  %v1427_v14 = vrot.slane %v1426_v0, 2  ;;  %v1462_v23 = vadd.f32 %v5161_v16, %v1461_v29  ;;  %v1433_v22 = vrot.slane %v1432_v45, 2 }
 0x180   : > { %v1439_v3 = vrot.slane %v1438_v28, 2  ;;  %v1445_v46 = vrot.slane %v1444_v47, 2  ;;  %v1451_v43 = vrot.slane %v1450_v30, 2  ;;  %v1457_v2 = vrot.slane %v1456_v26, 2 }
 0x181   : > { %v1422_v37 = vadd.f32 %v1421_v58, %v1420_v63  ;;  %v1428_v57 = vadd.f32 %v1427_v14, %v1426_v0  ;;  %v1463_v38 = vrot.slane %v1462_v23, 2  ;;  %v1434_v41 = vadd.f32 %v1433_v22, %v1432_v45 }
 0x182   : > { %v1440_v20 = vadd.f32 %v1439_v3, %v1438_v28  ;;  %v1446_v53 = vadd.f32 %v1445_v46, %v1444_v47  ;;  %v1452_v62 = vadd.f32 %v1451_v43, %v1450_v30  ;;  %v1458_v19 = vadd.f32 %v1457_v2, %v1456_v26  ;;  %3430 = vmatpush.bf16.msra.mxu2 %v4883_v49  ;;  %v7107_v2 = vld [vmem:[%s8482_s4] ss:$0 sm:$0xff] }
 0x183   : > { %v1423_v27 = vrot.slane %v1422_v37, 1  ;;  %v1429_v48 = vrot.slane %v1428_v57, 1  ;;  %v1464_v39 = vadd.f32 %v1463_v38, %v1462_v23  ;;  %v1435_v59 = vrot.slane %v1434_v41, 1 }
 0x184   : > { %v1441_v56 = vrot.slane %v1440_v20, 1  ;;  %v1447_v7 = vrot.slane %v1446_v53, 1  ;;  %v1453_v44 = vrot.slane %v1452_v62, 1  ;;  %v1459_v36 = vrot.slane %v1458_v19, 1 }
 0x185   : > { %v7053_v4 = vadd.f32 %v1423_v27, %v1422_v37  ;;  %v7055_v33 = vadd.f32 %v1429_v48, %v1428_v57  ;;  %v1465_v10 = vrot.slane %v1464_v39, 1  ;;  %v7057_v16 = vadd.f32 %v1435_v59, %v1434_v41  ;;  %v5497_v59 = vld [vmem:[%s6214_s21 + $0x8] sm:$0xff]  }
 0x186   : > { %v7059_v15 = vadd.f32 %v1441_v56, %v1440_v20  ;;  %v7061_v11 = vadd.f32 %v1447_v7, %v1446_v53  ;;  %v7063_v32 = vadd.f32 %v1453_v44, %v1452_v62  ;;  %v7068_v13 = vadd.f32 %v1459_v36, %v1458_v19  ;;  %v3151_v62 = vpop.f32.mrf.mxu0 }
 0x187   : > { %v7070_v12 = vadd.f32 %v1465_v10, %v1464_v39  ;;  %v1467_v5 = vrot.slane %v5164_v61, 4  ;;  %v1473_v17 = vrot.slane %v5165_v21, 4  ;;  %v1479_v35 = vrot.slane %v5168_v9, 4  ;;  %v5498_v10 = vld [vmem:[%s6214_s21 + $0x10] sm:$0xff]  }
 0x188   : > { %v1485_v31 = vrot.slane %v5169_v25, 4  ;;  %v1491_v6 = vrot.slane %v5172_v34, 4  ;;  %v1497_v55 = vrot.slane %v5173_v1, 4  ;;  %v1503_v0 = vrot.slane %v5176_v42, 4 }
 0x189   : > { %v1468_v50 = vadd.f32 %v5164_v61, %v1467_v5  ;;  %v1474_v63 = vadd.f32 %v5165_v21, %v1473_v17  ;;  %v1509_v60 = vrot.slane %v5177_v40, 4  ;;  %v1480_v29 = vadd.f32 %v5168_v9, %v1479_v35 }
 0x18a   : > { %v1486_v45 = vadd.f32 %v5169_v25, %v1485_v31  ;;  %v1492_v28 = vadd.f32 %v5172_v34, %v1491_v6  ;;  %v1498_v61 = vadd.f32 %v5173_v1, %v1497_v55  ;;  %v1504_v47 = vadd.f32 %v5176_v42, %v1503_v0  ;;  %v5499_v31 = vld [vmem:[%s6214_s21 + $0x18] sm:$0xff]  }
 0x18b   : > { %v1469_v24 = vrot.slane %v1468_v50, 2  ;;  %v1475_v21 = vrot.slane %v1474_v63, 2  ;;  %v1510_v30 = vadd.f32 %v5177_v40, %v1509_v60  ;;  %v1481_v52 = vrot.slane %v1480_v29, 2 }
 0x18c   : > { %v1487_v9 = vrot.slane %v1486_v45, 2  ;;  %v1493_v58 = vrot.slane %v1492_v28, 2  ;;  %v1499_v18 = vrot.slane %v1498_v61, 2  ;;  %v1505_v26 = vrot.slane %v1504_v47, 2 }
 0x18d   : > { %v1470_v25 = vadd.f32 %v1469_v24, %v1468_v50  ;;  %v1476_v14 = vadd.f32 %v1475_v21, %v1474_v63  ;;  %v1511_v34 = vrot.slane %v1510_v30, 2  ;;  %v1482_v23 = vadd.f32 %v1481_v52, %v1480_v29  ;;  %v7127_v50 = vld [vmem:[%s6214_s21 + $0x20] sm:$0xff]   ;;  %v7133_v29 = vld [vmem:[%s6214_s21 + $0x28] sm:$0xff]   ;;  %v7139_v24 = vld [vmem:[%s6214_s21 + $0x30] sm:$0xff]  }
 0x18e   : > { %v1488_v51 = vadd.f32 %v1487_v9, %v1486_v45  ;;  %v1494_v1 = vadd.f32 %v1493_v58, %v1492_v28  ;;  %v1500_v22 = vadd.f32 %v1499_v18, %v1498_v61  ;;  %v1506_v43 = vadd.f32 %v1505_v26, %v1504_v47  ;;  %v7146_v52 = vld [vmem:[%s6214_s21 + $0x38] sm:$0xff]  }
 0x18f   : > { %v1471_v3 = vrot.slane %v1470_v25, 1  ;;  %v1477_v46 = vrot.slane %v1476_v14, 1  ;;  %v1512_v42 = vadd.f32 %v1511_v34, %v1510_v30  ;;  %v1483_v54 = vrot.slane %v1482_v23, 1 }
 0x190   : > { %v1489_v40 = vrot.slane %v1488_v51, 1  ;;  %v1495_v37 = vrot.slane %v1494_v1, 1  ;;  %v1501_v57 = vrot.slane %v1500_v22, 1  ;;  %v1507_v20 = vrot.slane %v1506_v43, 1 }
 0x191   : > { %v1472_v38 = vadd.f32 %v1471_v3, %v1470_v25  ;;  %v1478_v41 = vadd.f32 %v1477_v46, %v1476_v14  ;;  %v1513_v53 = vrot.slane %v1512_v42, 1  ;;  %v1484_v27 = vadd.f32 %v1483_v54, %v1482_v23 }
 0x192   : > { %v1490_v48 = vadd.f32 %v1489_v40, %v1488_v51  ;;  %v1496_v19 = vadd.f32 %v1495_v37, %v1494_v1  ;;  %v1502_v39 = vadd.f32 %v1501_v57, %v1500_v22  ;;  %v1508_v56 = vadd.f32 %v1507_v20, %v1506_v43  ;;  %v4882_v43 = vld [vmem:[%s8483_s5 + $0x8] sm:$0xff] }
 0x193   : > { %v1514_v7 = vadd.f32 %v1513_v53, %v1512_v42  ;;  %v2772_v44 = vsel %vm2667_vm0, %v7055_v33, %v7053_v4  ;;  %v2779_v36 = vsel %vm2667_vm0, %v1478_v41, %v1472_v38  ;;  %v7120_v17 = vadd.f32 %v7107_v2, %v3151_v62  ;;  %3431 = vmatpush.bf16.msra.mxu2 %v4882_v43  ;;  %v4881_v53 = vld [vmem:[%s8483_s5] sm:$0xff] }
 0x194   : > { %v2773_v49 = vsel %vm2669_vm1, %v7057_v16, %v2772_v44  ;;  %v2780_v5 = vsel %vm2669_vm1, %v1484_v27, %v2779_v36  ;;  %v5180_v35 = vunpack.c.l.bf16 %v5179_v8  ;;  %v5181_v33 = vunpack.c.h.bf16 %v5179_v8 }
 0x195   : > { %v2774_v6 = vsel %vm2671_vm2, %v7059_v15, %v2773_v49  ;;  %v2781_v4 = vsel %vm2671_vm2, %v1490_v48, %v2780_v5  ;;  %v5184_v55 = vunpack.c.l.bf16 %v5497_v59  ;;  %v5185_v0 = vunpack.c.h.bf16 %v5497_v59 }
 0x196   : > { %v2775_v16 = vsel %vm2673_vm3, %v7061_v11, %v2774_v6  ;;  %v2782_v63 = vsel %vm2673_vm3, %v1496_v19, %v2781_v4  ;;  %v5188_v60 = vunpack.c.l.bf16 %v5498_v10  ;;  %v5189_v28 = vunpack.c.h.bf16 %v5498_v10 }
 0x197   : > { %v2776_v45 = vsel %vm2675_vm4, %v7063_v32, %v2775_v16  ;;  %v2783_v15 = vsel %vm2675_vm4, %v1502_v39, %v2782_v63  ;;  %v5192_v61 = vunpack.c.l.bf16 %v5499_v31  ;;  %v5193_v47 = vunpack.c.h.bf16 %v5499_v31  ;;  %3432 = vmatpush.bf16.msra.mxu2 %v4881_v53 }
 0x198   : > { %v2777_v21 = vsel %vm2677_vm5, %v7068_v13, %v2776_v45  ;;  %v2784_v11 = vsel %vm2677_vm5, %v1508_v56, %v2783_v15  ;;  %v5196_v30 = vunpack.c.l.bf16 %v7127_v50  ;;  %v5197_v58 = vunpack.c.h.bf16 %v7127_v50 }
 0x199   : > { %v2778_v9 = vsel %vm2679_vm6, %v7070_v12, %v2777_v21  ;;  %v2785_v32 = vsel %vm2679_vm6, %v1514_v7, %v2784_v11  ;;  %v5200_v18 = vunpack.c.l.bf16 %v7133_v29  ;;  %v5201_v14 = vunpack.c.h.bf16 %v7133_v29 }
 0x19a   : > { %v3065_v25 = vpack.c.bf16 %v2785_v32, %v2778_v9  ;;  %v5204_v13 = vunpack.c.l.bf16 %v7139_v24  ;;  %v5205_v26 = vunpack.c.h.bf16 %v7139_v24  ;;  %v5208_v34 = vunpack.c.l.bf16 %v7146_v52 }
 0x19b   : > { %v5209_v23 = vunpack.c.h.bf16 %v7146_v52  ;;  %v1771_v51 = vrot.slane %v5180_v35, 4  ;;  %v1777_v1 = vrot.slane %v5181_v33, 4  ;;  %v1783_v12 = vrot.slane %v5184_v55, 4 }
 0x19c   : > { %3185 = vmatmul.bf16.gmra.mxu0 %v3065_v25  ;;  %v1789_v22 = vrot.slane %v5185_v0, 4  ;;  %v1795_v3 = vrot.slane %v5188_v60, 4  ;;  %v1801_v46 = vrot.slane %v5189_v28, 4  ;;  %v1807_v40 = vrot.slane %v5192_v61, 4 }
 0x19d   : > { %v1772_v42 = vadd.f32 %v5180_v35, %v1771_v51  ;;  %v1778_v54 = vadd.f32 %v5181_v33, %v1777_v1  ;;  %v1813_v37 = vrot.slane %v5193_v47, 4  ;;  %v1784_v57 = vadd.f32 %v5184_v55, %v1783_v12  ;;  %v3153_v12 = vpop.f32.mrf.mxu0 }
 0x19e   : > { %v1790_v38 = vadd.f32 %v5185_v0, %v1789_v22  ;;  %v1796_v41 = vadd.f32 %v5188_v60, %v1795_v3  ;;  %v1802_v20 = vadd.f32 %v5189_v28, %v1801_v46  ;;  %v1808_v27 = vadd.f32 %v5192_v61, %v1807_v40 }
 0x19f   : > { %v1773_v62 = vrot.slane %v1772_v42, 2  ;;  %v1779_v8 = vrot.slane %v1778_v54, 2  ;;  %v1814_v48 = vadd.f32 %v5193_v47, %v1813_v37  ;;  %v1785_v19 = vrot.slane %v1784_v57, 2 }
 0x1a0   : > { %v1791_v39 = vrot.slane %v1790_v38, 2  ;;  %v1797_v59 = vrot.slane %v1796_v41, 2  ;;  %v1803_v56 = vrot.slane %v1802_v20, 2  ;;  %v1809_v36 = vrot.slane %v1808_v27, 2 }
 0x1a1   : > { %v1774_v7 = vadd.f32 %v1773_v62, %v1772_v42  ;;  %v1780_v44 = vadd.f32 %v1779_v8, %v1778_v54  ;;  %v1815_v10 = vrot.slane %v1814_v48, 2  ;;  %v1786_v49 = vadd.f32 %v1785_v19, %v1784_v57 }
 0x1a2   : > { %v1792_v5 = vadd.f32 %v1791_v39, %v1790_v38  ;;  %v1798_v35 = vadd.f32 %v1797_v59, %v1796_v41  ;;  %v1804_v31 = vadd.f32 %v1803_v56, %v1802_v20  ;;  %v1810_v33 = vadd.f32 %v1809_v36, %v1808_v27 }
 0x1a3   : > { %v1775_v6 = vrot.slane %v1774_v7, 1  ;;  %v1781_v4 = vrot.slane %v1780_v44, 1  ;;  %v1816_v55 = vadd.f32 %v1815_v10, %v1814_v48  ;;  %v1787_v16 = vrot.slane %v1786_v49, 1 }
 0x1a4   : > { %v1793_v63 = vrot.slane %v1792_v5, 1  ;;  %v1799_v0 = vrot.slane %v1798_v35, 1  ;;  %v1805_v60 = vrot.slane %v1804_v31, 1  ;;  %v1811_v28 = vrot.slane %v1810_v33, 1 }
 0x1a5   : > { %v1776_v45 = vadd.f32 %v1775_v6, %v1774_v7  ;;  %v1782_v15 = vadd.f32 %v1781_v4, %v1780_v44  ;;  %v1817_v61 = vrot.slane %v1816_v55, 1  ;;  %v1788_v21 = vadd.f32 %v1787_v16, %v1786_v49  ;;  %v5504_v16 = vld [vmem:[%s6214_s21 + $0x40] sm:$0xff]  }
 0x1a6   : > { %v7164_v11 = vadd.f32 %v1793_v63, %v1792_v5  ;;  %v7166_v47 = vadd.f32 %v1799_v0, %v1798_v35  ;;  %v7168_v9 = vadd.f32 %v1805_v60, %v1804_v31  ;;  %v7170_v32 = vadd.f32 %v1811_v28, %v1810_v33  ;;  %v3156_v31 = vpop.f32.mrf.mxu0 }
 0x1a7   : > { %v7172_v25 = vadd.f32 %v1817_v61, %v1816_v55  ;;  %v1819_v51 = vrot.slane %v5196_v30, 4  ;;  %v1825_v1 = vrot.slane %v5197_v58, 4  ;;  %v1831_v22 = vrot.slane %v5200_v18, 4  ;;  %v5505_v61 = vld [vmem:[%s6214_s21 + $0x48] sm:$0xff]  }
 0x1a8   : > { %v1837_v3 = vrot.slane %v5201_v14, 4  ;;  %v1843_v46 = vrot.slane %v5204_v13, 4  ;;  %v1849_v43 = vrot.slane %v5205_v26, 4  ;;  %v1855_v40 = vrot.slane %v5208_v34, 4 }
 0x1a9   : > { %v1820_v42 = vadd.f32 %v5196_v30, %v1819_v51  ;;  %v1826_v54 = vadd.f32 %v5197_v58, %v1825_v1  ;;  %v1861_v37 = vrot.slane %v5209_v23, 4  ;;  %v1832_v57 = vadd.f32 %v5200_v18, %v1831_v22 }
 0x1aa   : > { %v1838_v38 = vadd.f32 %v5201_v14, %v1837_v3  ;;  %v1844_v41 = vadd.f32 %v5204_v13, %v1843_v46  ;;  %v1850_v30 = vadd.f32 %v5205_v26, %v1849_v43  ;;  %v1856_v20 = vadd.f32 %v5208_v34, %v1855_v40  ;;  %v5506_v46 = vld [vmem:[%s6214_s21 + $0x50] sm:$0xff]  }
 0x1ab   : > { %v1821_v50 = vrot.slane %v1820_v42, 2  ;;  %v1827_v58 = vrot.slane %v1826_v54, 2  ;;  %v1862_v53 = vadd.f32 %v5209_v23, %v1861_v37  ;;  %v1833_v62 = vrot.slane %v1832_v57, 2 }
 0x1ac   : > { %v1839_v8 = vrot.slane %v1838_v38, 2  ;;  %v1845_v18 = vrot.slane %v1844_v41, 2  ;;  %v1851_v27 = vrot.slane %v1850_v30, 2  ;;  %v1857_v48 = vrot.slane %v1856_v20, 2 }
 0x1ad   : > { %v1822_v29 = vadd.f32 %v1821_v50, %v1820_v42  ;;  %v1828_v14 = vadd.f32 %v1827_v58, %v1826_v54  ;;  %v1863_v19 = vrot.slane %v1862_v53, 2  ;;  %v1834_v13 = vadd.f32 %v1833_v62, %v1832_v57  ;;  %v5507_v54 = vld [vmem:[%s6214_s21 + $0x58] sm:$0xff]   ;;  %v7229_v57 = vld [vmem:[%s6214_s21 + $0x60] sm:$0xff]   ;;  %v7235_v50 = vld [vmem:[%s6214_s21 + $0x68] sm:$0xff]  }
 0x1ae   : > { %v1840_v39 = vadd.f32 %v1839_v8, %v1838_v38  ;;  %v1846_v24 = vadd.f32 %v1845_v18, %v1844_v41  ;;  %v1852_v26 = vadd.f32 %v1851_v27, %v1850_v30  ;;  %v1858_v7 = vadd.f32 %v1857_v48, %v1856_v20  ;;  %v7241_v62 = vld [vmem:[%s6214_s21 + $0x70] sm:$0xff]   ;;  %v7244_v8 = vld [vmem:[%s6214_s21 + $0x78] sm:$0xff]  }
 0x1af   : > { %v1823_v59 = vrot.slane %v1822_v29, 1  ;;  %v1829_v56 = vrot.slane %v1828_v14, 1  ;;  %v1864_v34 = vadd.f32 %v1863_v19, %v1862_v53  ;;  %v1835_v44 = vrot.slane %v1834_v13, 1 }
 0x1b0   : > { %v1841_v52 = vrot.slane %v1840_v39, 1  ;;  %v1847_v23 = vrot.slane %v1846_v24, 1  ;;  %v1853_v36 = vrot.slane %v1852_v26, 1  ;;  %v1859_v5 = vrot.slane %v1858_v7, 1 }
 0x1b1   : > { %v1824_v10 = vadd.f32 %v1823_v59, %v1822_v29  ;;  %v1830_v49 = vadd.f32 %v1829_v56, %v1828_v14  ;;  %v1865_v35 = vrot.slane %v1864_v34, 1  ;;  %v1836_v6 = vadd.f32 %v1835_v44, %v1834_v13 }
 0x1b2   : > { %v1842_v4 = vadd.f32 %v1841_v52, %v1840_v39  ;;  %v1848_v33 = vadd.f32 %v1847_v23, %v1846_v24  ;;  %v1854_v55 = vadd.f32 %v1853_v36, %v1852_v26  ;;  %v1860_v63 = vadd.f32 %v1859_v5, %v1858_v7 }
 0x1b3   : > { %v1866_v0 = vadd.f32 %v1865_v35, %v1864_v34  ;;  %v2930_v60 = vsel %vm2667_vm0, %v1782_v15, %v1776_v45  ;;  %v2937_v28 = vsel %vm2667_vm0, %v1830_v49, %v1824_v10  ;;  %v7213_v22 = vadd.f32 %v7107_v2, %v3153_v12 }
 0x1b4   : > { %v2931_v51 = vsel %vm2669_vm1, %v1788_v21, %v2930_v60  ;;  %v2938_v1 = vsel %vm2669_vm1, %v1836_v6, %v2937_v28  ;;  %v7216_v3 = vadd.f32 %v7107_v2, %v3156_v31  ;;  %v5212_v15 = vunpack.c.l.bf16 %v5504_v16 }
 0x1b5   : > { %v2932_v43 = vsel %vm2671_vm2, %v7164_v11, %v2931_v51  ;;  %v2939_v45 = vsel %vm2671_vm2, %v1842_v4, %v2938_v1  ;;  %v5213_v42 = vunpack.c.h.bf16 %v5504_v16  ;;  %v3231_v40 = vpack.c.bf16 %v7213_v22, %v7120_v17 }
 0x1b6   : > { %v2933_v21 = vsel %vm2673_vm3, %v7166_v47, %v2932_v43  ;;  %v2940_v12 = vsel %vm2673_vm3, %v1848_v33, %v2939_v45  ;;  %v5216_v37 = vunpack.c.l.bf16 %v5505_v61  ;;  %v5217_v41 = vunpack.c.h.bf16 %v5505_v61 }
 0x1b7   : > { %v2934_v11 = vsel %vm2675_vm4, %v7168_v9, %v2933_v21  ;;  %v2941_v38 = vsel %vm2675_vm4, %v1854_v55, %v2940_v12  ;;  %v5220_v30 = vunpack.c.l.bf16 %v5506_v46  ;;  %3433 = vmatmul.bf16.vlgmr.msra.gmra.mxu2 %v3231_v40  ;;  %v5221_v20 = vunpack.c.h.bf16 %v5506_v46 }
 0x1b8   : > { %v2935_v47 = vsel %vm2677_vm5, %v7170_v32, %v2934_v11  ;;  %v2942_v58 = vsel %vm2677_vm5, %v1860_v63, %v2941_v38  ;;  %v5224_v53 = vunpack.c.l.bf16 %v5507_v54  ;;  %v5225_v27 = vunpack.c.h.bf16 %v5507_v54 }
 0x1b9   : > { %v2936_v9 = vsel %vm2679_vm6, %v7172_v25, %v2935_v47  ;;  %v2943_v18 = vsel %vm2679_vm6, %v1866_v0, %v2942_v58  ;;  %v5228_v29 = vunpack.c.l.bf16 %v7229_v57  ;;  %v5229_v32 = vunpack.c.h.bf16 %v7229_v57 }
 0x1ba   : > { %v3066_v14 = vpack.c.bf16 %v2943_v18, %v2936_v9  ;;  %v5232_v48 = vunpack.c.l.bf16 %v7235_v50  ;;  %v5233_v19 = vunpack.c.h.bf16 %v7235_v50  ;;  %v5236_v13 = vunpack.c.l.bf16 %v7241_v62 }
 0x1bb   : > { %v5237_v39 = vunpack.c.h.bf16 %v7241_v62  ;;  %v5240_v24 = vunpack.c.l.bf16 %v7244_v8  ;;  %v5241_v25 = vunpack.c.h.bf16 %v7244_v8  ;;  %v1867_v26 = vrot.slane %v5212_v15, 4 }
 0x1bc   : > { %3190 = vmatmul.bf16.gmra.mxu0 %v3066_v14  ;;  %v1873_v59 = vrot.slane %v5213_v42, 4  ;;  %v1879_v56 = vrot.slane %v5216_v37, 4  ;;  %v1885_v7 = vrot.slane %v5217_v41, 4  ;;  %v1891_v34 = vrot.slane %v5220_v30, 4 }
 0x1bd   : > { %v1897_v44 = vrot.slane %v5221_v20, 4  ;;  %v1903_v52 = vrot.slane %v5224_v53, 4  ;;  %v1909_v23 = vrot.slane %v5225_v27, 4  ;;  %v1868_v36 = vadd.f32 %v5212_v15, %v1867_v26  ;;  %v3158_v26 = vpop.f32.mrf.mxu0 }
 0x1be   : > { %v1874_v10 = vadd.f32 %v5213_v42, %v1873_v59  ;;  %v1880_v49 = vadd.f32 %v5216_v37, %v1879_v56  ;;  %v1886_v5 = vadd.f32 %v5217_v41, %v1885_v7  ;;  %v1892_v35 = vadd.f32 %v5220_v30, %v1891_v34 }
 0x1bf   : > { %v1898_v31 = vadd.f32 %v5221_v20, %v1897_v44  ;;  %v1904_v6 = vadd.f32 %v5224_v53, %v1903_v52  ;;  %v1910_v4 = vadd.f32 %v5225_v27, %v1909_v23  ;;  %v1869_v33 = vrot.slane %v1868_v36, 2 }
 0x1c0   : > { %v1875_v55 = vrot.slane %v1874_v10, 2  ;;  %v1881_v16 = vrot.slane %v1880_v49, 2  ;;  %v1887_v63 = vrot.slane %v1886_v5, 2  ;;  %v1893_v0 = vrot.slane %v1892_v35, 2 }
 0x1c1   : > { %v1899_v60 = vrot.slane %v1898_v31, 2  ;;  %v1905_v28 = vrot.slane %v1904_v6, 2  ;;  %v1911_v61 = vrot.slane %v1910_v4, 2  ;;  %v1870_v51 = vadd.f32 %v1869_v33, %v1868_v36 }
 0x1c2   : > { %v1876_v1 = vadd.f32 %v1875_v55, %v1874_v10  ;;  %v1882_v46 = vadd.f32 %v1881_v16, %v1880_v49  ;;  %v1888_v43 = vadd.f32 %v1887_v63, %v1886_v5  ;;  %v1894_v45 = vadd.f32 %v1893_v0, %v1892_v35 }
 0x1c3   : > { %v1900_v15 = vadd.f32 %v1899_v60, %v1898_v31  ;;  %v1906_v42 = vadd.f32 %v1905_v28, %v1904_v6  ;;  %v1912_v54 = vadd.f32 %v1911_v61, %v1910_v4  ;;  %v1871_v21 = vrot.slane %v1870_v51, 1 }
 0x1c4   : > { %v1877_v12 = vrot.slane %v1876_v1, 1  ;;  %v1883_v40 = vrot.slane %v1882_v46, 1  ;;  %v1889_v37 = vrot.slane %v1888_v43, 1  ;;  %v1895_v11 = vrot.slane %v1894_v45, 1 }
 0x1c5   : > { %v1901_v38 = vrot.slane %v1900_v15, 1  ;;  %v1907_v41 = vrot.slane %v1906_v42, 1  ;;  %v1913_v30 = vrot.slane %v1912_v54, 1  ;;  %v1872_v47 = vadd.f32 %v1871_v21, %v1870_v51 }
 0x1c6   : > { %v1878_v58 = vadd.f32 %v1877_v12, %v1876_v1  ;;  %v7257_v20 = vadd.f32 %v1883_v40, %v1882_v46  ;;  %v7259_v53 = vadd.f32 %v1889_v37, %v1888_v43  ;;  %v7261_v9 = vadd.f32 %v1895_v11, %v1894_v45  ;;  %v5512_v40 = vld [vmem:[%s6214_s21 + $0x80] sm:$0xff]  }
 0x1c7   : > { %v7263_v18 = vadd.f32 %v1901_v38, %v1900_v15  ;;  %v7265_v27 = vadd.f32 %v1907_v41, %v1906_v42  ;;  %v7267_v14 = vadd.f32 %v1913_v30, %v1912_v54  ;;  %v1915_v59 = vrot.slane %v5228_v29, 4  ;;  %v3161_v15 = vpop.f32.mrf.mxu0  ;;  %v5513_v30 = vld [vmem:[%s6214_s21 + $0x88] sm:$0xff]  }
 0x1c8   : > { %v1921_v56 = vrot.slane %v5229_v32, 4  ;;  %v1927_v7 = vrot.slane %v5232_v48, 4  ;;  %v1933_v34 = vrot.slane %v5233_v19, 4  ;;  %v1939_v44 = vrot.slane %v5236_v13, 4 }
 0x1c9   : > { %v1945_v52 = vrot.slane %v5237_v39, 4  ;;  %v1951_v23 = vrot.slane %v5240_v24, 4  ;;  %v1957_v36 = vrot.slane %v5241_v25, 4  ;;  %v1916_v10 = vadd.f32 %v5228_v29, %v1915_v59 }
 0x1ca   : > { %v1922_v49 = vadd.f32 %v5229_v32, %v1921_v56  ;;  %v1928_v5 = vadd.f32 %v5232_v48, %v1927_v7  ;;  %v1934_v35 = vadd.f32 %v5233_v19, %v1933_v34  ;;  %v1940_v31 = vadd.f32 %v5236_v13, %v1939_v44  ;;  %v5514_v44 = vld [vmem:[%s6214_s21 + $0x90] sm:$0xff]  }
 0x1cb   : > { %v1946_v6 = vadd.f32 %v5237_v39, %v1945_v52  ;;  %v1952_v4 = vadd.f32 %v5240_v24, %v1951_v23  ;;  %v1958_v29 = vadd.f32 %v5241_v25, %v1957_v36  ;;  %v1917_v57 = vrot.slane %v1916_v10, 2 }
 0x1cc   : > { %v1923_v32 = vrot.slane %v1922_v49, 2  ;;  %v1929_v33 = vrot.slane %v1928_v5, 2  ;;  %v1935_v55 = vrot.slane %v1934_v35, 2  ;;  %v1941_v48 = vrot.slane %v1940_v31, 2 }
 0x1cd   : > { %v1947_v16 = vrot.slane %v1946_v6, 2  ;;  %v1953_v50 = vrot.slane %v1952_v4, 2  ;;  %v1959_v19 = vrot.slane %v1958_v29, 2  ;;  %v1918_v63 = vadd.f32 %v1917_v57, %v1916_v10 }
 0x1ce   : > { %v1924_v0 = vadd.f32 %v1923_v32, %v1922_v49  ;;  %v1930_v13 = vadd.f32 %v1929_v33, %v1928_v5  ;;  %v1936_v60 = vadd.f32 %v1935_v55, %v1934_v35  ;;  %v1942_v62 = vadd.f32 %v1941_v48, %v1940_v31  ;;  %v5515_v49 = vld [vmem:[%s6214_s21 + $0x98] sm:$0xff]   ;;  %v7322_v35 = vld [vmem:[%s6214_s21 + $0xa0] sm:$0xff]   ;;  %v7334_v55 = vld [vmem:[%s6214_s21 + $0xb0] sm:$0xff]  }
 0x1cf   : > { %v1948_v39 = vadd.f32 %v1947_v16, %v1946_v6  ;;  %v1954_v28 = vadd.f32 %v1953_v50, %v1952_v4  ;;  %v1960_v24 = vadd.f32 %v1959_v19, %v1958_v29  ;;  %v1919_v61 = vrot.slane %v1918_v63, 1  ;;  %v7328_v29 = vld [vmem:[%s6214_s21 + $0xa8] sm:$0xff]   ;;  %v7341_v19 = vld [vmem:[%s6214_s21 + $0xb8] sm:$0xff]  }
 0x1d0   : > { %v1925_v8 = vrot.slane %v1924_v0, 1  ;;  %v1931_v25 = vrot.slane %v1930_v13, 1  ;;  %v1937_v51 = vrot.slane %v1936_v60, 1  ;;  %v1943_v1 = vrot.slane %v1942_v62, 1 }
 0x1d1   : > { %v1949_v46 = vrot.slane %v1948_v39, 1  ;;  %v1955_v43 = vrot.slane %v1954_v28, 1  ;;  %v1961_v45 = vrot.slane %v1960_v24, 1  ;;  %v1920_v42 = vadd.f32 %v1919_v61, %v1918_v63 }
 0x1d2   : > { %v1926_v54 = vadd.f32 %v1925_v8, %v1924_v0  ;;  %v1932_v21 = vadd.f32 %v1931_v25, %v1930_v13  ;;  %v1938_v12 = vadd.f32 %v1937_v51, %v1936_v60  ;;  %v1944_v37 = vadd.f32 %v1943_v1, %v1942_v62 }
 0x1d3   : > { %v1950_v11 = vadd.f32 %v1949_v46, %v1948_v39  ;;  %v1956_v38 = vadd.f32 %v1955_v43, %v1954_v28  ;;  %v1962_v41 = vadd.f32 %v1961_v45, %v1960_v24  ;;  %v2944_v59 = vsel %vm2667_vm0, %v1878_v58, %v1872_v47  ;;  %v4896_v46 = vld [vmem:[%s8483_s5 + $0x78] sm:$0xff] }
 0x1d4   : > { %v2951_v56 = vsel %vm2667_vm0, %v1926_v54, %v1920_v42  ;;  %v7306_v7 = vadd.f32 %v7107_v2, %v3158_v26  ;;  %v7309_v34 = vadd.f32 %v7107_v2, %v3161_v15  ;;  %v2945_v52 = vsel %vm2669_vm1, %v7257_v20, %v2944_v59  ;;  %5568 = vmatpush.bf16.msrb.mxu3 %v4896_v46 }
 0x1d5   : > { %v2952_v23 = vsel %vm2669_vm1, %v1932_v21, %v2951_v56  ;;  %v5244_v36 = vunpack.c.l.bf16 %v5512_v40  ;;  %v5245_v10 = vunpack.c.h.bf16 %v5512_v40  ;;  %v2946_v47 = vsel %vm2671_vm2, %v7259_v53, %v2945_v52  ;;  %3328 = vmatpush.bf16.msra.mxu1 %v4896_v46  ;;  %v3163_v46 = vpop.f32.mrf.mxu0 }
 0x1d6   : > { %v2953_v58 = vsel %vm2671_vm2, %v1938_v12, %v2952_v23  ;;  %v3232_v26 = vpack.c.bf16 %v7306_v7, %v7216_v3  ;;  %v5248_v5 = vunpack.c.l.bf16 %v5513_v30  ;;  %v2947_v20 = vsel %vm2673_vm3, %v7261_v9, %v2946_v47 }
 0x1d7   : > { %v2954_v31 = vsel %vm2673_vm3, %v1944_v37, %v2953_v58  ;;  %v5249_v6 = vunpack.c.h.bf16 %v5513_v30  ;;  %v5252_v4 = vunpack.c.l.bf16 %v5514_v44  ;;  %v2948_v53 = vsel %vm2675_vm4, %v7263_v18, %v2947_v20  ;;  %v4895_v37 = vld [vmem:[%s8483_s5 + $0x70] sm:$0xff] }
 0x1d8   : > { %v2955_v57 = vsel %vm2675_vm4, %v1950_v11, %v2954_v31  ;;  %3438 = vmatmul.bf16.gmra.mxu2 %v3232_v26  ;;  %v5253_v32 = vunpack.c.h.bf16 %v5514_v44  ;;  %v5256_v33 = vunpack.c.l.bf16 %v5515_v49  ;;  %v2949_v48 = vsel %vm2677_vm5, %v7265_v27, %v2948_v53  ;;  %5569 = vmatpush.bf16.msrb.mxu3 %v4895_v37 }
 0x1d9   : > { %v2956_v9 = vsel %vm2677_vm5, %v1956_v38, %v2955_v57  ;;  %v5257_v16 = vunpack.c.h.bf16 %v5515_v49  ;;  %v5260_v50 = vunpack.c.l.bf16 %v7322_v35  ;;  %v2950_v18 = vsel %vm2679_vm6, %v7267_v14, %v2949_v48  ;;  %3329 = vmatpush.bf16.msra.mxu1 %v4895_v37 }
 0x1da   : > { %v2957_v63 = vsel %vm2679_vm6, %v1962_v41, %v2956_v9  ;;  %v5261_v0 = vunpack.c.h.bf16 %v7322_v35  ;;  %v5264_v13 = vunpack.c.l.bf16 %v7328_v29  ;;  %v5265_v62 = vunpack.c.h.bf16 %v7328_v29 }
 0x1db   : > { %v3067_v60 = vpack.c.bf16 %v2957_v63, %v2950_v18  ;;  %v5268_v27 = vunpack.c.l.bf16 %v7334_v55  ;;  %v5269_v39 = vunpack.c.h.bf16 %v7334_v55  ;;  %v5272_v28 = vunpack.c.l.bf16 %v7341_v19 }
 0x1dc   : > { %v5273_v24 = vunpack.c.h.bf16 %v7341_v19  ;;  %v1963_v61 = vrot.slane %v5244_v36, 4  ;;  %v1969_v8 = vrot.slane %v5245_v10, 4  ;;  %v1975_v14 = vrot.slane %v5248_v5, 4 }
 0x1dd   : > { %3195 = vmatmul.bf16.gmra.mxu0 %v3067_v60  ;;  %v1981_v25 = vrot.slane %v5249_v6, 4  ;;  %v1987_v51 = vrot.slane %v5252_v4, 4  ;;  %v1993_v1 = vrot.slane %v5253_v32, 4  ;;  %v1999_v15 = vrot.slane %v5256_v33, 4 }
 0x1de   : > { %v1964_v43 = vadd.f32 %v5244_v36, %v1963_v61  ;;  %v1970_v45 = vadd.f32 %v5245_v10, %v1969_v8  ;;  %v2005_v42 = vrot.slane %v5257_v16, 4  ;;  %v1976_v54 = vadd.f32 %v5248_v5, %v1975_v14 }
 0x1df   : > { %v1982_v21 = vadd.f32 %v5249_v6, %v1981_v25  ;;  %v1988_v12 = vadd.f32 %v5252_v4, %v1987_v51  ;;  %v1994_v40 = vadd.f32 %v5253_v32, %v1993_v1  ;;  %v2000_v41 = vadd.f32 %v5256_v33, %v1999_v15 }
 0x1e0   : > { %v1965_v11 = vrot.slane %v1964_v43, 2  ;;  %v1971_v38 = vrot.slane %v1970_v45, 2  ;;  %v2006_v30 = vadd.f32 %v5257_v16, %v2005_v42  ;;  %v1977_v59 = vrot.slane %v1976_v54, 2 }
 0x1e1   : > { %v1983_v56 = vrot.slane %v1982_v21, 2  ;;  %v1989_v44 = vrot.slane %v1988_v12, 2  ;;  %v1995_v52 = vrot.slane %v1994_v40, 2  ;;  %v2001_v10 = vrot.slane %v2000_v41, 2 }
 0x1e2   : > { %v1966_v23 = vadd.f32 %v1965_v11, %v1964_v43  ;;  %v1972_v36 = vadd.f32 %v1971_v38, %v1970_v45  ;;  %v2007_v49 = vrot.slane %v2006_v30, 2  ;;  %v1978_v47 = vadd.f32 %v1977_v59, %v1976_v54 }
 0x1e3   : > { %v1984_v58 = vadd.f32 %v1983_v56, %v1982_v21  ;;  %v1990_v26 = vadd.f32 %v1989_v44, %v1988_v12  ;;  %v1996_v5 = vadd.f32 %v1995_v52, %v1994_v40  ;;  %v2002_v6 = vadd.f32 %v2001_v10, %v2000_v41 }
 0x1e4   : > { %v1967_v20 = vrot.slane %v1966_v23, 1  ;;  %v1973_v31 = vrot.slane %v1972_v36, 1  ;;  %v2008_v4 = vadd.f32 %v2007_v49, %v2006_v30  ;;  %v1979_v53 = vrot.slane %v1978_v47, 1 }
 0x1e5   : > { %v1985_v57 = vrot.slane %v1984_v58, 1  ;;  %v1991_v32 = vrot.slane %v1990_v26, 1  ;;  %v1997_v33 = vrot.slane %v1996_v5, 1  ;;  %v2003_v16 = vrot.slane %v2002_v6, 1 }
 0x1e6   : > { %v1968_v48 = vadd.f32 %v1967_v20, %v1966_v23  ;;  %v1974_v9 = vadd.f32 %v1973_v31, %v1972_v36  ;;  %v2009_v18 = vrot.slane %v2008_v4, 1  ;;  %v1980_v63 = vadd.f32 %v1979_v53, %v1978_v47 }
 0x1e7   : > { %v7359_v60 = vadd.f32 %v1985_v57, %v1984_v58  ;;  %v7361_v61 = vadd.f32 %v1991_v32, %v1990_v26  ;;  %v7363_v8 = vadd.f32 %v1997_v33, %v1996_v5  ;;  %v7365_v14 = vadd.f32 %v2003_v16, %v2002_v6  ;;  %v5520_v16 = vld [vmem:[%s6214_s21 + $0xc0] sm:$0xff]  }
 0x1e8   : > { %v7367_v25 = vadd.f32 %v2009_v18, %v2008_v4  ;;  %v2011_v51 = vrot.slane %v5260_v50, 4  ;;  %v2017_v1 = vrot.slane %v5261_v0, 4  ;;  %v2023_v43 = vrot.slane %v5264_v13, 4  ;;  %v3166_v4 = vpop.f32.mrf.mxu0 }
 0x1e9   : > { %v2029_v45 = vrot.slane %v5265_v62, 4  ;;  %v2035_v15 = vrot.slane %v5268_v27, 4  ;;  %v2041_v42 = vrot.slane %v5269_v39, 4  ;;  %v2047_v12 = vrot.slane %v5272_v28, 4 }
 0x1ea   : > { %v2012_v54 = vadd.f32 %v5260_v50, %v2011_v51  ;;  %v2018_v21 = vadd.f32 %v5261_v0, %v2017_v1  ;;  %v2053_v40 = vrot.slane %v5273_v24, 4  ;;  %v2024_v37 = vadd.f32 %v5264_v13, %v2023_v43 }
 0x1eb   : > { %v2030_v11 = vadd.f32 %v5265_v62, %v2029_v45  ;;  %v2036_v38 = vadd.f32 %v5268_v27, %v2035_v15  ;;  %v2042_v50 = vadd.f32 %v5269_v39, %v2041_v42  ;;  %v2048_v41 = vadd.f32 %v5272_v28, %v2047_v12  ;;  %v5521_v45 = vld [vmem:[%s6214_s21 + $0xc8] sm:$0xff]   ;;  %v5522_v12 = vld [vmem:[%s6214_s21 + $0xd0] sm:$0xff]  }
 0x1ec   : > { %v2013_v35 = vrot.slane %v2012_v54, 2  ;;  %v2019_v0 = vrot.slane %v2018_v21, 2  ;;  %v2054_v30 = vadd.f32 %v5273_v24, %v2053_v40  ;;  %v2025_v59 = vrot.slane %v2024_v37, 2 }
 0x1ed   : > { %v2031_v56 = vrot.slane %v2030_v11, 2  ;;  %v2037_v13 = vrot.slane %v2036_v38, 2  ;;  %v2043_v44 = vrot.slane %v2042_v50, 2  ;;  %v2049_v52 = vrot.slane %v2048_v41, 2 }
 0x1ee   : > { %v2014_v29 = vadd.f32 %v2013_v35, %v2012_v54  ;;  %v2020_v62 = vadd.f32 %v2019_v0, %v2018_v21  ;;  %v2055_v23 = vrot.slane %v2054_v30, 2  ;;  %v2026_v27 = vadd.f32 %v2025_v59, %v2024_v37 }
 0x1ef   : > { %v2032_v36 = vadd.f32 %v2031_v56, %v2030_v11  ;;  %v2038_v55 = vadd.f32 %v2037_v13, %v2036_v38  ;;  %v2044_v39 = vadd.f32 %v2043_v44, %v2042_v50  ;;  %v2050_v47 = vadd.f32 %v2049_v52, %v2048_v41  ;;  %v5523_v11 = vld [vmem:[%s6214_s21 + $0xd8] sm:$0xff]   ;;  %v7424_v50 = vld [vmem:[%s6214_s21 + $0xe0] sm:$0xff]   ;;  %v7436_v44 = vld [vmem:[%s6214_s21 + $0xf0] sm:$0xff]  }
 0x1f0   : > { %v2015_v10 = vrot.slane %v2014_v29, 1  ;;  %v2021_v49 = vrot.slane %v2020_v62, 1  ;;  %v2056_v28 = vadd.f32 %v2055_v23, %v2054_v30  ;;  %v2027_v58 = vrot.slane %v2026_v27, 1  ;;  %v7430_v30 = vld [vmem:[%s6214_s21 + $0xe8] sm:$0xff]  }
 0x1f1   : > { %v2033_v19 = vrot.slane %v2032_v36, 1  ;;  %v2039_v24 = vrot.slane %v2038_v55, 1  ;;  %v2045_v26 = vrot.slane %v2044_v39, 1  ;;  %v2051_v31 = vrot.slane %v2050_v47, 1 }
 0x1f2   : > { %v2016_v5 = vadd.f32 %v2015_v10, %v2014_v29  ;;  %v2022_v20 = vadd.f32 %v2021_v49, %v2020_v62  ;;  %v2057_v6 = vrot.slane %v2056_v28, 1  ;;  %v2028_v53 = vadd.f32 %v2027_v58, %v2026_v27  ;;  %v7439_v29 = vld [vmem:[%s6214_s21 + $0xf8] sm:$0xff]  }
 0x1f3   : > { %v2034_v57 = vadd.f32 %v2033_v19, %v2032_v36  ;;  %v2040_v32 = vadd.f32 %v2039_v24, %v2038_v55  ;;  %v2046_v33 = vadd.f32 %v2045_v26, %v2044_v39  ;;  %v2052_v18 = vadd.f32 %v2051_v31, %v2050_v47  ;;  %v4894_v31 = vld [vmem:[%s8483_s5 + $0x68] sm:$0xff] }
 0x1f4   : > { %v2058_v51 = vadd.f32 %v2057_v6, %v2056_v28  ;;  %v2958_v1 = vsel %vm2667_vm0, %v1974_v9, %v1968_v48  ;;  %v2965_v43 = vsel %vm2667_vm0, %v2022_v20, %v2016_v5  ;;  %v7408_v54 = vadd.f32 %v7107_v2, %v3163_v46  ;;  %5570 = vmatpush.bf16.msrb.mxu3 %v4894_v31 }
 0x1f5   : > { %v2959_v15 = vsel %vm2669_vm1, %v1980_v63, %v2958_v1  ;;  %v2966_v42 = vsel %vm2669_vm1, %v2028_v53, %v2965_v43  ;;  %v7411_v21 = vadd.f32 %v7107_v2, %v3166_v4  ;;  %v5276_v9 = vunpack.c.l.bf16 %v5520_v16  ;;  %3330 = vmatpush.bf16.msra.mxu1 %v4894_v31 }
 0x1f6   : > { %v2960_v40 = vsel %vm2671_vm2, %v7359_v60, %v2959_v15  ;;  %v2967_v48 = vsel %vm2671_vm2, %v2034_v57, %v2966_v42  ;;  %v5277_v37 = vunpack.c.h.bf16 %v5520_v16  ;;  %v3233_v2 = vpack.c.bf16 %v7408_v54, %v7309_v34 }
 0x1f7   : > { %v2961_v63 = vsel %vm2673_vm3, %v7361_v61, %v2960_v40  ;;  %v2968_v46 = vsel %vm2673_vm3, %v2040_v32, %v2967_v48  ;;  %v5280_v38 = vunpack.c.l.bf16 %v5521_v45  ;;  %v5281_v0 = vunpack.c.h.bf16 %v5521_v45 }
 0x1f8   : > { %v2962_v60 = vsel %vm2675_vm4, %v7363_v8, %v2961_v63  ;;  %v2969_v35 = vsel %vm2675_vm4, %v2046_v33, %v2968_v46  ;;  %v5284_v41 = vunpack.c.l.bf16 %v5522_v12  ;;  %3443 = vmatmul.bf16.gmra.mxu2 %v3233_v2  ;;  %v5285_v56 = vunpack.c.h.bf16 %v5522_v12 }
 0x1f9   : > { %v2963_v61 = vsel %vm2677_vm5, %v7365_v14, %v2962_v60  ;;  %v2970_v59 = vsel %vm2677_vm5, %v2052_v18, %v2969_v35  ;;  %v5288_v13 = vunpack.c.l.bf16 %v5523_v11  ;;  %v5289_v52 = vunpack.c.h.bf16 %v5523_v11  ;;  %v4892_v35 = vld [vmem:[%s8483_s5 + $0x58] sm:$0xff] }
 0x1fa   : > { %v2964_v8 = vsel %vm2679_vm6, %v7367_v25, %v2963_v61  ;;  %v2971_v62 = vsel %vm2679_vm6, %v2058_v51, %v2970_v59  ;;  %v5292_v23 = vunpack.c.l.bf16 %v7424_v50  ;;  %v5293_v14 = vunpack.c.h.bf16 %v7424_v50  ;;  %v4893_v51 = vld [vmem:[%s8483_s5 + $0x60] sm:$0xff] }
 0x1fb   : > { %v3068_v27 = vpack.c.bf16 %v2971_v62, %v2964_v8  ;;  %v5296_v36 = vunpack.c.l.bf16 %v7430_v30  ;;  %v5297_v55 = vunpack.c.h.bf16 %v7430_v30  ;;  %v5300_v39 = vunpack.c.l.bf16 %v7436_v44  ;;  %5571 = vmatpush.bf16.msrb.mxu3 %v4893_v51  ;;  %3331 = vmatpush.bf16.msra.mxu1 %v4893_v51 }
 0x1fc   : > { %v5301_v10 = vunpack.c.h.bf16 %v7436_v44  ;;  %v5304_v49 = vunpack.c.l.bf16 %v7439_v29  ;;  %v5305_v25 = vunpack.c.h.bf16 %v7439_v29  ;;  %v2059_v47 = vrot.slane %v5276_v9, 4 }
 0x1fd   : > { %3200 = vmatmul.bf16.gmra.mxu0 %v3068_v27  ;;  %v2065_v28 = vrot.slane %v5277_v37, 4  ;;  %v2071_v58 = vrot.slane %v5280_v38, 4  ;;  %v2077_v19 = vrot.slane %v5281_v0, 4  ;;  %v2083_v24 = vrot.slane %v5284_v41, 4 }
 0x1fe   : > { %v2089_v26 = vrot.slane %v5285_v56, 4  ;;  %v2095_v5 = vrot.slane %v5288_v13, 4  ;;  %v2101_v20 = vrot.slane %v5289_v52, 4  ;;  %v2060_v6 = vadd.f32 %v5276_v9, %v2059_v47 }
 0x1ff   : > { %v2066_v4 = vadd.f32 %v5277_v37, %v2065_v28  ;;  %v2072_v53 = vadd.f32 %v5280_v38, %v2071_v58  ;;  %v2078_v57 = vadd.f32 %v5281_v0, %v2077_v19  ;;  %v2084_v32 = vadd.f32 %v5284_v41, %v2083_v24  ;;  %5572 = vmatpush.bf16.msrb.mxu3 %v4892_v35 }
 0x200   : > { %v2090_v33 = vadd.f32 %v5285_v56, %v2089_v26  ;;  %v2096_v16 = vadd.f32 %v5288_v13, %v2095_v5  ;;  %v2102_v18 = vadd.f32 %v5289_v52, %v2101_v20  ;;  %v2061_v1 = vrot.slane %v2060_v6, 2  ;;  %v3168_v5 = vpop.f32.mrf.mxu0  ;;  %v4891_v20 = vld [vmem:[%s8483_s5 + $0x50] sm:$0xff]  ;;  %3332 = vmatpush.bf16.msra.mxu1 %v4892_v35 }
 0x201   : > { %v2067_v43 = vrot.slane %v2066_v4, 2  ;;  %v2073_v45 = vrot.slane %v2072_v53, 2  ;;  %v2079_v15 = vrot.slane %v2078_v57, 2  ;;  %v2085_v42 = vrot.slane %v2084_v32, 2 }
 0x202   : > { %v2091_v12 = vrot.slane %v2090_v33, 2  ;;  %v2097_v40 = vrot.slane %v2096_v16, 2  ;;  %v2103_v48 = vrot.slane %v2102_v18, 2  ;;  %v2062_v9 = vadd.f32 %v2061_v1, %v2060_v6 }
 0x203   : > { %v2068_v37 = vadd.f32 %v2067_v43, %v2066_v4  ;;  %v2074_v11 = vadd.f32 %v2073_v45, %v2072_v53  ;;  %v2080_v63 = vadd.f32 %v2079_v15, %v2078_v57  ;;  %v2086_v46 = vadd.f32 %v2085_v42, %v2084_v32  ;;  %5573 = vmatpush.bf16.msrb.mxu3 %v4891_v20 }
 0x204   : > { %v2092_v2 = vadd.f32 %v2091_v12, %v2090_v33  ;;  %v2098_v38 = vadd.f32 %v2097_v40, %v2096_v16  ;;  %v2104_v60 = vadd.f32 %v2103_v48, %v2102_v18  ;;  %v2063_v0 = vrot.slane %v2062_v9, 1  ;;  %3333 = vmatpush.bf16.msra.mxu1 %v4891_v20 }
 0x205   : > { %v2069_v41 = vrot.slane %v2068_v37, 1  ;;  %v2075_v61 = vrot.slane %v2074_v11, 1  ;;  %v2081_v59 = vrot.slane %v2080_v63, 1  ;;  %v2087_v56 = vrot.slane %v2086_v46, 1 }
 0x206   : > { %v2093_v13 = vrot.slane %v2092_v2, 1  ;;  %v2099_v8 = vrot.slane %v2098_v38, 1  ;;  %v2105_v62 = vrot.slane %v2104_v60, 1  ;;  %v7461_v52 = vadd.f32 %v2063_v0, %v2062_v9 }
 0x207   : > { %v7463_v27 = vadd.f32 %v2069_v41, %v2068_v37  ;;  %v7465_v47 = vadd.f32 %v2075_v61, %v2074_v11  ;;  %v7467_v28 = vadd.f32 %v2081_v59, %v2080_v63  ;;  %v7469_v58 = vadd.f32 %v2087_v56, %v2086_v46 }
 0x208   : > { %v7471_v19 = vadd.f32 %v2093_v13, %v2092_v2  ;;  %v7473_v24 = vadd.f32 %v2099_v8, %v2098_v38  ;;  %v7475_v26 = vadd.f32 %v2105_v62, %v2104_v60  ;;  %v2107_v31 = vrot.slane %v5292_v23, 4  ;;  %v3171_v41 = vpop.f32.mrf.mxu0  ;;  %v5528_v8 = vld [vmem:[%s6214_s21 + $0x100] sm:$0xff]  }
 0x209   : > { %v2113_v6 = vrot.slane %v5293_v14, 4  ;;  %v2119_v4 = vrot.slane %v5296_v36, 4  ;;  %v2125_v53 = vrot.slane %v5297_v55, 4  ;;  %v2131_v57 = vrot.slane %v5300_v39, 4 }
 0x20a   : > { %v2137_v32 = vrot.slane %v5301_v10, 4  ;;  %v2143_v33 = vrot.slane %v5304_v49, 4  ;;  %v2149_v16 = vrot.slane %v5305_v25, 4  ;;  %v2108_v18 = vadd.f32 %v5292_v23, %v2107_v31 }
 0x20b   : > { %v2114_v51 = vadd.f32 %v5293_v14, %v2113_v6  ;;  %v2120_v1 = vadd.f32 %v5296_v36, %v2119_v4  ;;  %v2126_v43 = vadd.f32 %v5297_v55, %v2125_v53  ;;  %v2132_v45 = vadd.f32 %v5300_v39, %v2131_v57  ;;  %v7520_v57 = vld [vmem:[%s8482_s4] ss:$0 sm:$0xff] }
 0x20c   : > { %v2138_v15 = vadd.f32 %v5301_v10, %v2137_v32  ;;  %v2144_v42 = vadd.f32 %v5304_v49, %v2143_v33  ;;  %v2150_v23 = vadd.f32 %v5305_v25, %v2149_v16  ;;  %v2109_v50 = vrot.slane %v2108_v18, 2  ;;  %v3221_v16 = vpop.f32.mrf.mxu3 }
 0x20d   : > { %v2115_v14 = vrot.slane %v2114_v51, 2  ;;  %v2121_v12 = vrot.slane %v2120_v1, 2  ;;  %v2127_v36 = vrot.slane %v2126_v43, 2  ;;  %v2133_v30 = vrot.slane %v2132_v45, 2 }
 0x20e   : > { %v2139_v55 = vrot.slane %v2138_v15, 2  ;;  %v2145_v40 = vrot.slane %v2144_v42, 2  ;;  %v2151_v48 = vrot.slane %v2150_v23, 2  ;;  %v2110_v39 = vadd.f32 %v2109_v50, %v2108_v18  ;;  %v5529_v18 = vld [vmem:[%s6214_s21 + $0x108] sm:$0xff]  }
 0x20f   : > { %v2116_v9 = vadd.f32 %v2115_v14, %v2114_v51  ;;  %v2122_v44 = vadd.f32 %v2121_v12, %v2120_v1  ;;  %v2128_v10 = vadd.f32 %v2127_v36, %v2126_v43  ;;  %v2134_v37 = vadd.f32 %v2133_v30, %v2132_v45  ;;  %v5530_v43 = vld [vmem:[%s6214_s21 + $0x110] sm:$0xff]   ;;  %v7546_v36 = vld [vmem:[%s6214_s21 + $0x120] sm:$0xff]  }
 0x210   : > { %v2140_v11 = vadd.f32 %v2139_v55, %v2138_v15  ;;  %v2146_v49 = vadd.f32 %v2145_v40, %v2144_v42  ;;  %v2152_v29 = vadd.f32 %v2151_v48, %v2150_v23  ;;  %v2111_v25 = vrot.slane %v2110_v39, 1  ;;  %v5531_v23 = vld [vmem:[%s6214_s21 + $0x118] sm:$0xff]   ;;  %v7552_v48 = vld [vmem:[%s6214_s21 + $0x128] sm:$0xff]  }
 0x211   : > { %v2117_v63 = vrot.slane %v2116_v9, 1  ;;  %v2123_v46 = vrot.slane %v2122_v44, 1  ;;  %v2129_v2 = vrot.slane %v2128_v10, 1  ;;  %v2135_v38 = vrot.slane %v2134_v37, 1 }
 0x212   : > { %v2141_v60 = vrot.slane %v2140_v11, 1  ;;  %v2147_v35 = vrot.slane %v2146_v49, 1  ;;  %v2153_v0 = vrot.slane %v2152_v29, 1  ;;  %v2112_v61 = vadd.f32 %v2111_v25, %v2110_v39  ;;  %v7555_v39 = vld [vmem:[%s6214_s21 + $0x130] sm:$0xff]  }
 0x213   : > { %v2118_v59 = vadd.f32 %v2117_v63, %v2116_v9  ;;  %v2124_v56 = vadd.f32 %v2123_v46, %v2122_v44  ;;  %v2130_v13 = vadd.f32 %v2129_v2, %v2128_v10  ;;  %v2136_v62 = vadd.f32 %v2135_v38, %v2134_v37  ;;  %v7561_v37 = vld [vmem:[%s6214_s21 + $0x138] sm:$0xff]  }
 0x214   : > { %v2142_v20 = vadd.f32 %v2141_v60, %v2140_v11  ;;  %v2148_v31 = vadd.f32 %v2147_v35, %v2146_v49  ;;  %v2154_v6 = vadd.f32 %v2153_v0, %v2152_v29  ;;  %v2972_v4 = vsel %vm2667_vm0, %v7463_v27, %v7461_v52 }
 0x215   : > { %v2979_v53 = vsel %vm2667_vm0, %v2118_v59, %v2112_v61  ;;  %v7523_v32 = vadd.f32 %v7520_v57, %v3168_v5  ;;  %v7526_v33 = vadd.f32 %v7520_v57, %v3171_v41  ;;  %v2973_v52 = vsel %vm2669_vm1, %v7465_v47, %v2972_v4 }
 0x216   : > { %v2980_v27 = vsel %vm2669_vm1, %v2124_v56, %v2979_v53  ;;  %v7533_v51 = vadd.f32 %v7520_v57, %v3221_v16  ;;  %v5308_v1 = vunpack.c.l.bf16 %v5528_v8  ;;  %v2974_v5 = vsel %vm2671_vm2, %v7467_v28, %v2973_v52 }
 0x217   : > { %v2981_v45 = vsel %vm2671_vm2, %v2130_v13, %v2980_v27  ;;  %v3234_v15 = vpack.c.bf16 %v7523_v32, %v7411_v21  ;;  %v5309_v42 = vunpack.c.h.bf16 %v5528_v8  ;;  %v2975_v47 = vsel %vm2673_vm3, %v7469_v58, %v2974_v5  ;;  %v4889_v27 = vld [vmem:[%s8483_s5 + $0x40] sm:$0xff] }
 0x218   : > { %v2982_v50 = vsel %vm2673_vm3, %v2136_v62, %v2981_v45  ;;  %v5312_v14 = vunpack.c.l.bf16 %v5529_v18  ;;  %v5313_v12 = vunpack.c.h.bf16 %v5529_v18  ;;  %v2976_v28 = vsel %vm2675_vm4, %v7471_v19, %v2975_v47  ;;  %v4890_v62 = vld [vmem:[%s8483_s5 + $0x48] sm:$0xff] }
 0x219   : > { %v2983_v30 = vsel %vm2675_vm4, %v2142_v20, %v2982_v50  ;;  %3448 = vmatmul.bf16.gmra.mxu2 %v3234_v15  ;;  %v5316_v55 = vunpack.c.l.bf16 %v5530_v43  ;;  %v5317_v40 = vunpack.c.h.bf16 %v5530_v43  ;;  %v2977_v58 = vsel %vm2677_vm5, %v7473_v24, %v2976_v28  ;;  %5574 = vmatpush.bf16.msrb.mxu3 %v4890_v62 }
 0x21a   : > { %v2984_v9 = vsel %vm2677_vm5, %v2148_v31, %v2983_v30  ;;  %v5320_v44 = vunpack.c.l.bf16 %v5531_v23  ;;  %v5321_v10 = vunpack.c.h.bf16 %v5531_v23  ;;  %v2978_v19 = vsel %vm2679_vm6, %v7475_v26, %v2977_v58  ;;  %3334 = vmatpush.bf16.msra.mxu1 %v4890_v62 }
 0x21b   : > { %v2985_v11 = vsel %vm2679_vm6, %v2154_v6, %v2984_v9  ;;  %v5324_v49 = vunpack.c.l.bf16 %v7546_v36  ;;  %v5325_v29 = vunpack.c.h.bf16 %v7546_v36  ;;  %v5328_v63 = vunpack.c.l.bf16 %v7552_v48 }
 0x21c   : > { %v3069_v25 = vpack.c.bf16 %v2985_v11, %v2978_v19  ;;  %v5329_v24 = vunpack.c.h.bf16 %v7552_v48  ;;  %v5332_v46 = vunpack.c.l.bf16 %v7555_v39  ;;  %v5333_v2 = vunpack.c.h.bf16 %v7555_v39  ;;  %v5771_v11 = vld [vmem:[%s8483_s5 + $0x38] sm:$0xff]  ;;  %v5773_v48 = vld [vmem:[%s8483_s5 + $0x28] sm:$0xff] }
 0x21d   : > { %v5336_v38 = vunpack.c.l.bf16 %v7561_v37  ;;  %v5337_v60 = vunpack.c.h.bf16 %v7561_v37  ;;  %v2155_v26 = vrot.slane %v5308_v1, 4  ;;  %v2161_v35 = vrot.slane %v5309_v42, 4  ;;  %5575 = vmatpush.bf16.msrb.mxu3 %v4889_v27 }
 0x21e   : > { %3205 = vmatmul.bf16.gmra.mxu0 %v3069_v25  ;;  %v2167_v0 = vrot.slane %v5312_v14, 4  ;;  %v2173_v41 = vrot.slane %v5313_v12, 4  ;;  %v2179_v61 = vrot.slane %v5316_v55, 4  ;;  %v2185_v56 = vrot.slane %v5317_v40, 4  ;;  %3335 = vmatpush.bf16.msra.mxu1 %v4889_v27 }
 0x21f   : > { %v2156_v59 = vadd.f32 %v5308_v1, %v2155_v26  ;;  %v2191_v13 = vrot.slane %v5320_v44, 4  ;;  %v2197_v8 = vrot.slane %v5321_v10, 4  ;;  %v2162_v20 = vadd.f32 %v5309_v42, %v2161_v35 }
 0x220   : > { %v2168_v31 = vadd.f32 %v5312_v14, %v2167_v0  ;;  %v2174_v6 = vadd.f32 %v5313_v12, %v2173_v41  ;;  %v2180_v4 = vadd.f32 %v5316_v55, %v2179_v61  ;;  %v2186_v16 = vadd.f32 %v5317_v40, %v2185_v56 }
 0x221   : > { %v2157_v53 = vrot.slane %v2156_v59, 2  ;;  %v2192_v18 = vadd.f32 %v5320_v44, %v2191_v13  ;;  %v2198_v52 = vadd.f32 %v5321_v10, %v2197_v8  ;;  %v2163_v1 = vrot.slane %v2162_v20, 2  ;;  %5576 = vmatpush.bf16.msra.mxu3 %v5771_v11  ;;  %v5774_v11 = vld [vmem:[%s8483_s5 + $0x20] sm:$0xff] }
 0x222   : > { %v2169_v43 = vrot.slane %v2168_v31, 2  ;;  %v2175_v5 = vrot.slane %v2174_v6, 2  ;;  %v2181_v45 = vrot.slane %v2180_v4, 2  ;;  %v2187_v23 = vrot.slane %v2186_v16, 2 }
 0x223   : > { %v2158_v15 = vadd.f32 %v2157_v53, %v2156_v59  ;;  %v2193_v42 = vrot.slane %v2192_v18, 2  ;;  %v2199_v47 = vrot.slane %v2198_v52, 2  ;;  %v2164_v50 = vadd.f32 %v2163_v1, %v2162_v20 }
 0x224   : > { %v2170_v14 = vadd.f32 %v2169_v43, %v2168_v31  ;;  %v2176_v12 = vadd.f32 %v2175_v5, %v2174_v6  ;;  %v2182_v28 = vadd.f32 %v2181_v45, %v2180_v4  ;;  %v2188_v55 = vadd.f32 %v2187_v23, %v2186_v16  ;;  %v3173_v16 = vpop.f32.mrf.mxu0  ;;  %v3223_v23 = vpop.f32.mrf.mxu3 }
 0x225   : > { %v2159_v30 = vrot.slane %v2158_v15, 1  ;;  %v2194_v40 = vadd.f32 %v2193_v42, %v2192_v18  ;;  %v2200_v58 = vadd.f32 %v2199_v47, %v2198_v52  ;;  %v2165_v9 = vrot.slane %v2164_v50, 1  ;;  %v5772_v18 = vld [vmem:[%s8483_s5 + $0x30] sm:$0xff] }
 0x226   : > { %v2171_v44 = vrot.slane %v2170_v14, 1  ;;  %v2177_v10 = vrot.slane %v2176_v12, 1  ;;  %v2183_v19 = vrot.slane %v2182_v28, 1  ;;  %v2189_v26 = vrot.slane %v2188_v55, 1  ;;  %5577 = vmatpush.bf16.msra.mxu3 %v5772_v18 }
 0x227   : > { %v7583_v25 = vadd.f32 %v2159_v30, %v2158_v15  ;;  %v2195_v35 = vrot.slane %v2194_v40, 1  ;;  %v2201_v0 = vrot.slane %v2200_v58, 1  ;;  %v7585_v41 = vadd.f32 %v2165_v9, %v2164_v50 }
 0x228   : > { %v7587_v61 = vadd.f32 %v2171_v44, %v2170_v14  ;;  %v7589_v59 = vadd.f32 %v2177_v10, %v2176_v12  ;;  %v7591_v56 = vadd.f32 %v2183_v19, %v2182_v28  ;;  %v7593_v13 = vadd.f32 %v2189_v26, %v2188_v55 }
 0x229   : > { %v7595_v8 = vadd.f32 %v2195_v35, %v2194_v40  ;;  %v7597_v62 = vadd.f32 %v2201_v0, %v2200_v58  ;;  %v2203_v20 = vrot.slane %v5324_v49, 4  ;;  %v2209_v31 = vrot.slane %v5325_v29, 4 }
 0x22a   : > { %v2215_v6 = vrot.slane %v5328_v63, 4  ;;  %v2221_v4 = vrot.slane %v5329_v24, 4  ;;  %v2227_v53 = vrot.slane %v5332_v46, 4  ;;  %v2233_v27 = vrot.slane %v5333_v2, 4  ;;  %5578 = vmatpush.bf16.msra.mxu3 %v5773_v48 }
 0x22b   : > { %v2204_v52 = vadd.f32 %v5324_v49, %v2203_v20  ;;  %v2239_v1 = vrot.slane %v5336_v38, 4  ;;  %v2245_v43 = vrot.slane %v5337_v60, 4  ;;  %v2210_v5 = vadd.f32 %v5325_v29, %v2209_v31 }
 0x22c   : > { %v2216_v45 = vadd.f32 %v5328_v63, %v2215_v6  ;;  %v2222_v15 = vadd.f32 %v5329_v24, %v2221_v4  ;;  %v2228_v49 = vadd.f32 %v5332_v46, %v2227_v53  ;;  %v2234_v47 = vadd.f32 %v5333_v2, %v2233_v27  ;;  %v3176_v18 = vpop.f32.mrf.mxu0 }
 0x22d   : > { %v2205_v42 = vrot.slane %v2204_v52, 2  ;;  %v2240_v50 = vadd.f32 %v5336_v38, %v2239_v1  ;;  %v2246_v36 = vadd.f32 %v5337_v60, %v2245_v43  ;;  %v2211_v29 = vrot.slane %v2210_v5, 2 }
 0x22e   : > { %v2217_v14 = vrot.slane %v2216_v45, 2  ;;  %v2223_v63 = vrot.slane %v2222_v15, 2  ;;  %v2229_v12 = vrot.slane %v2228_v49, 2  ;;  %v2235_v46 = vrot.slane %v2234_v47, 2  ;;  %5579 = vmatpush.bf16.msra.mxu3 %v5774_v11 }
 0x22f   : > { %v2206_v24 = vadd.f32 %v2205_v42, %v2204_v52  ;;  %v2241_v28 = vrot.slane %v2240_v50, 2  ;;  %v2247_v39 = vrot.slane %v2246_v36, 2  ;;  %v2212_v2 = vadd.f32 %v2211_v29, %v2210_v5  ;;  %v3226_v42 = vpop.f32.mrf.mxu3 }
 0x230   : > { %v2218_v30 = vadd.f32 %v2217_v14, %v2216_v45  ;;  %v2224_v55 = vadd.f32 %v2223_v63, %v2222_v15  ;;  %v2230_v38 = vadd.f32 %v2229_v12, %v2228_v49  ;;  %v2236_v37 = vadd.f32 %v2235_v46, %v2234_v47  ;;  %v5536_v47 = vld [vmem:[%s6214_s21 + $0x140] sm:$0xff]   ;;  %v5538_v63 = vld [vmem:[%s6214_s21 + $0x150] sm:$0xff]  }
 0x231   : > { %v2207_v40 = vrot.slane %v2206_v24, 1  ;;  %v2242_v60 = vadd.f32 %v2241_v28, %v2240_v50  ;;  %v2248_v58 = vadd.f32 %v2247_v39, %v2246_v36  ;;  %v2213_v9 = vrot.slane %v2212_v2, 1  ;;  %v5775_v50 = vld [vmem:[%s8483_s5 + $0x18] sm:$0xff]  ;;  %v7679_v28 = vld [vmem:[%s6214_s21 + $0x160] sm:$0xff]  }
 0x232   : > { %v2219_v44 = vrot.slane %v2218_v30, 1  ;;  %v2225_v10 = vrot.slane %v2224_v55, 1  ;;  %v2231_v19 = vrot.slane %v2230_v38, 1  ;;  %v2237_v35 = vrot.slane %v2236_v37, 1  ;;  %5580 = vmatpush.bf16.msra.mxu3 %v5775_v50 }
 0x233   : > { %v2208_v26 = vadd.f32 %v2207_v40, %v2206_v24  ;;  %v2243_v0 = vrot.slane %v2242_v60, 1  ;;  %v2249_v20 = vrot.slane %v2248_v58, 1  ;;  %v2214_v31 = vadd.f32 %v2213_v9, %v2212_v2  ;;  %v7694_v9 = vld [vmem:[%s6214_s21 + $0x178] sm:$0xff]  }
 0x234   : > { %v2220_v6 = vadd.f32 %v2219_v44, %v2218_v30  ;;  %v2226_v4 = vadd.f32 %v2225_v10, %v2224_v55  ;;  %v2232_v53 = vadd.f32 %v2231_v19, %v2230_v38  ;;  %v2238_v52 = vadd.f32 %v2237_v35, %v2236_v37  ;;  %v7685_v38 = vld [vmem:[%s6214_s21 + $0x168] sm:$0xff]  }
 0x235   : > { %v2244_v27 = vadd.f32 %v2243_v0, %v2242_v60  ;;  %v2250_v1 = vadd.f32 %v2249_v20, %v2248_v58  ;;  %v2986_v43 = vsel %vm2667_vm0, %v7585_v41, %v7583_v25  ;;  %v2993_v45 = vsel %vm2667_vm0, %v2214_v31, %v2208_v26  ;;  %v7691_v58 = vld [vmem:[%s6214_s21 + $0x170] sm:$0xff]  }
 0x236   : > { %v2987_v5 = vsel %vm2669_vm1, %v7587_v61, %v2986_v43  ;;  %v7647_v15 = vadd.f32 %v7520_v57, %v3173_v16  ;;  %v7650_v49 = vadd.f32 %v7520_v57, %v3223_v23  ;;  %v2994_v41 = vsel %vm2669_vm1, %v2220_v6, %v2993_v45  ;;  %v5537_v23 = vld [vmem:[%s6214_s21 + $0x148] sm:$0xff]  }
 0x237   : > { %v2988_v25 = vsel %vm2671_vm2, %v7589_v59, %v2987_v5  ;;  %v7660_v61 = vadd.f32 %v7520_v57, %v3176_v18  ;;  %v7663_v16 = vadd.f32 %v7520_v57, %v3226_v42  ;;  %v2995_v29 = vsel %vm2671_vm2, %v2226_v4, %v2994_v41 }
 0x238   : > { %v2989_v36 = vsel %vm2673_vm3, %v7591_v56, %v2988_v25  ;;  %v3261_v14 = vpack.c.bf16 %v7650_v49, %v7533_v51  ;;  %v3235_v59 = vpack.c.bf16 %v7647_v15, %v7526_v33  ;;  %v2996_v48 = vsel %vm2673_vm3, %v2232_v53, %v2995_v29  ;;  %v5539_v56 = vld [vmem:[%s6214_s21 + $0x158] sm:$0xff]  }
 0x239   : > { %v2990_v12 = vsel %vm2675_vm4, %v7593_v13, %v2989_v36  ;;  %v5340_v24 = vunpack.c.l.bf16 %v5536_v47  ;;  %v5341_v46 = vunpack.c.h.bf16 %v5536_v47  ;;  %v2997_v2 = vsel %vm2675_vm4, %v2238_v52, %v2996_v48  ;;  %v7711_v47 = vpop.f32.mrf.mxu0 }
 0x23a   : > { %v2991_v39 = vsel %vm2677_vm5, %v7595_v8, %v2990_v12  ;;  %3366 = vmatmul.bf16.vlgmr.msrb.gmra.mxu3 %v3261_v14  ;;  %3453 = vmatmul.bf16.gmra.mxu2 %v3235_v59  ;;  %v5344_v30 = vunpack.c.l.bf16 %v5537_v23  ;;  %v5345_v55 = vunpack.c.h.bf16 %v5537_v23  ;;  %v2998_v40 = vsel %vm2677_vm5, %v2244_v27, %v2997_v2  ;;  %v5776_v8 = vld [vmem:[%s8483_s5 + $0x10] sm:$0xff] }
 0x23b   : > { %v2992_v13 = vsel %vm2679_vm6, %v7597_v62, %v2991_v39  ;;  %v5348_v37 = vunpack.c.l.bf16 %v5538_v63  ;;  %v5349_v60 = vunpack.c.h.bf16 %v5538_v63  ;;  %5581 = vmatpush.bf16.msra.mxu3 %v5776_v8  ;;  %v2999_v44 = vsel %vm2679_vm6, %v2250_v1, %v2998_v40  ;;  %v5777_v1 = vld [vmem:[%s8483_s5 + $0x8] sm:$0xff]  ;;  %v5778_v39 = vld [vmem:[%s8483_s5] sm:$0xff] }
 0x23c   : > { %v5352_v10 = vunpack.c.l.bf16 %v5539_v56  ;;  %v5353_v19 = vunpack.c.h.bf16 %v5539_v56  ;;  %v5356_v11 = vunpack.c.l.bf16 %v7679_v28  ;;  %v3070_v62 = vpack.c.bf16 %v2999_v44, %v2992_v13 }
 0x23d   : > { %v5357_v26 = vunpack.c.h.bf16 %v7679_v28  ;;  %v5360_v35 = vunpack.c.l.bf16 %v7685_v38  ;;  %v5361_v0 = vunpack.c.h.bf16 %v7685_v38  ;;  %v5364_v20 = vunpack.c.l.bf16 %v7691_v58 }
 0x23e   : > { %v5365_v31 = vunpack.c.h.bf16 %v7691_v58  ;;  %v5368_v6 = vunpack.c.l.bf16 %v7694_v9  ;;  %v5369_v4 = vunpack.c.h.bf16 %v7694_v9  ;;  %3210 = vmatmul.bf16.gmra.mxu0 %v3070_v62  ;;  %v2251_v53 = vrot.slane %v5340_v24, 4 }
 0x23f   : > { %v2257_v18 = vrot.slane %v5341_v46, 4  ;;  %v2263_v52 = vrot.slane %v5344_v30, 4  ;;  %v2269_v27 = vrot.slane %v5345_v55, 4  ;;  %5582 = vmatpush.bf16.msra.mxu3 %v5777_v1  ;;  %v2275_v43 = vrot.slane %v5348_v37, 4 }
 0x240   : > { %v2281_v5 = vrot.slane %v5349_v60, 4  ;;  %v2287_v45 = vrot.slane %v5352_v10, 4  ;;  %v2293_v42 = vrot.slane %v5353_v19, 4  ;;  %v2252_v50 = vadd.f32 %v5340_v24, %v2251_v53 }
 0x241   : > { %v2258_v25 = vadd.f32 %v5341_v46, %v2257_v18  ;;  %v2264_v41 = vadd.f32 %v5344_v30, %v2263_v52  ;;  %v2270_v23 = vadd.f32 %v5345_v55, %v2269_v27  ;;  %v2276_v36 = vadd.f32 %v5348_v37, %v2275_v43 }
 0x242   : > { %v2282_v29 = vadd.f32 %v5349_v60, %v2281_v5  ;;  %v2288_v14 = vadd.f32 %v5352_v10, %v2287_v45  ;;  %v2294_v59 = vadd.f32 %v5353_v19, %v2293_v42  ;;  %v2253_v63 = vrot.slane %v2252_v50, 2  ;;  %v7716_v5 = vpop.f32.mrf.mxu0 }
 0x243   : > { %v2259_v12 = vrot.slane %v2258_v25, 2  ;;  %v2265_v48 = vrot.slane %v2264_v41, 2  ;;  %v2271_v56 = vrot.slane %v2270_v23, 2  ;;  %5583 = vmatpush.bf16.msra.mxu3 %v5778_v39  ;;  %v2277_v2 = vrot.slane %v2276_v36, 2 }
 0x244   : > { %v2283_v13 = vrot.slane %v2282_v29, 2  ;;  %v2289_v40 = vrot.slane %v2288_v14, 2  ;;  %v2295_v24 = vrot.slane %v2294_v59, 2  ;;  %v2254_v46 = vadd.f32 %v2253_v63, %v2252_v50 }
 0x245   : > { %v2260_v30 = vadd.f32 %v2259_v12, %v2258_v25  ;;  %v2266_v55 = vadd.f32 %v2265_v48, %v2264_v41  ;;  %v2272_v37 = vadd.f32 %v2271_v56, %v2270_v23  ;;  %v2278_v60 = vadd.f32 %v2277_v2, %v2276_v36  ;;  %v4904_v48 = vld [vmem:[%s8483_s5 + $0xb8] sm:$0xff] }
 0x246   : > { %v2284_v8 = vadd.f32 %v2283_v13, %v2282_v29  ;;  %v2290_v44 = vadd.f32 %v2289_v40, %v2288_v14  ;;  %v2296_v10 = vadd.f32 %v2295_v24, %v2294_v59  ;;  %v2255_v19 = vrot.slane %v2254_v46, 1 }
 0x247   : > { %v2261_v62 = vrot.slane %v2260_v30, 1  ;;  %v2267_v53 = vrot.slane %v2266_v55, 1  ;;  %v2273_v18 = vrot.slane %v2272_v37, 1  ;;  %v2279_v52 = vrot.slane %v2278_v60, 1  ;;  %3579 = vmatpush.bf16.msrb.mxu3 %v4904_v48 }
 0x248   : > { %v2285_v27 = vrot.slane %v2284_v8, 1  ;;  %v2291_v1 = vrot.slane %v2290_v44, 1  ;;  %v2297_v43 = vrot.slane %v2296_v10, 1  ;;  %v7718_v45 = vadd.f32 %v2255_v19, %v2254_v46 }
 0x249   : > { %v7720_v42 = vadd.f32 %v2261_v62, %v2260_v30  ;;  %v7722_v50 = vadd.f32 %v2267_v53, %v2266_v55  ;;  %v7724_v25 = vadd.f32 %v2273_v18, %v2272_v37  ;;  %v7726_v41 = vadd.f32 %v2279_v52, %v2278_v60  ;;  %v4903_v55 = vld [vmem:[%s8483_s5 + $0xb0] sm:$0xff] }
 0x24a   : > { %v7728_v23 = vadd.f32 %v2285_v27, %v2284_v8  ;;  %v7730_v36 = vadd.f32 %v2291_v1, %v2290_v44  ;;  %v7732_v29 = vadd.f32 %v2297_v43, %v2296_v10  ;;  %v2299_v14 = vrot.slane %v5356_v11, 4  ;;  %v3183_v62 = vpop.f32.mrf.mxu0 }
 0x24b   : > { %v2305_v59 = vrot.slane %v5357_v26, 4  ;;  %v2311_v63 = vrot.slane %v5360_v35, 4  ;;  %v2317_v12 = vrot.slane %v5361_v0, 4  ;;  %v2323_v56 = vrot.slane %v5364_v20, 4  ;;  %3580 = vmatpush.bf16.msrb.mxu3 %v4903_v55 }
 0x24c   : > { %v2329_v39 = vrot.slane %v5365_v31, 4  ;;  %v2335_v2 = vrot.slane %v5368_v6, 4  ;;  %v2341_v13 = vrot.slane %v5369_v4, 4  ;;  %v2300_v40 = vadd.f32 %v5356_v11, %v2299_v14 }
 0x24d   : > { %v2306_v24 = vadd.f32 %v5357_v26, %v2305_v59  ;;  %v2312_v46 = vadd.f32 %v5360_v35, %v2311_v63  ;;  %v2318_v30 = vadd.f32 %v5361_v0, %v2317_v12  ;;  %v2324_v37 = vadd.f32 %v5364_v20, %v2323_v56  ;;  %v3228_v56 = vpop.f32.mrf.mxu3 }
 0x24e   : > { %v2330_v11 = vadd.f32 %v5365_v31, %v2329_v39  ;;  %v2336_v28 = vadd.f32 %v5368_v6, %v2335_v2  ;;  %v2342_v26 = vadd.f32 %v5369_v4, %v2341_v13  ;;  %v2301_v35 = vrot.slane %v2300_v40, 2  ;;  %v4902_v31 = vld [vmem:[%s8483_s5 + $0xa8] sm:$0xff] }
 0x24f   : > { %v2307_v38 = vrot.slane %v2306_v24, 2  ;;  %v2313_v0 = vrot.slane %v2312_v46, 2  ;;  %v2319_v60 = vrot.slane %v2318_v30, 2  ;;  %v2325_v8 = vrot.slane %v2324_v37, 2  ;;  %3581 = vmatpush.bf16.msrb.mxu3 %v4902_v31 }
 0x250   : > { %v2331_v44 = vrot.slane %v2330_v11, 2  ;;  %v2337_v10 = vrot.slane %v2336_v28, 2  ;;  %v2343_v19 = vrot.slane %v2342_v26, 2  ;;  %v2302_v53 = vadd.f32 %v2301_v35, %v2300_v40 }
 0x251   : > { %v2308_v20 = vadd.f32 %v2307_v38, %v2306_v24  ;;  %v2314_v18 = vadd.f32 %v2313_v0, %v2312_v46  ;;  %v2320_v58 = vadd.f32 %v2319_v60, %v2318_v30  ;;  %v2326_v9 = vadd.f32 %v2325_v8, %v2324_v37 }
 0x252   : > { %v2332_v6 = vadd.f32 %v2331_v44, %v2330_v11  ;;  %v2338_v4 = vadd.f32 %v2337_v10, %v2336_v28  ;;  %v2344_v52 = vadd.f32 %v2343_v19, %v2342_v26  ;;  %v2303_v27 = vrot.slane %v2302_v53, 1  ;;  %v3186_v8 = vpop.f32.mrf.mxu0 }
 0x253   : > { %v2309_v1 = vrot.slane %v2308_v20, 1  ;;  %v2315_v43 = vrot.slane %v2314_v18, 1  ;;  %v2321_v14 = vrot.slane %v2320_v58, 1  ;;  %v2327_v59 = vrot.slane %v2326_v9, 1 }
 0x254   : > { %v2333_v63 = vrot.slane %v2332_v6, 1  ;;  %v2339_v12 = vrot.slane %v2338_v4, 1  ;;  %v2345_v48 = vrot.slane %v2344_v52, 1  ;;  %v2304_v39 = vadd.f32 %v2303_v27, %v2302_v53  ;;  %v4901_v53 = vld [vmem:[%s8483_s5 + $0xa0] sm:$0xff] }
 0x255   : > { %v2310_v2 = vadd.f32 %v2309_v1, %v2308_v20  ;;  %v2316_v13 = vadd.f32 %v2315_v43, %v2314_v18  ;;  %v2322_v40 = vadd.f32 %v2321_v14, %v2320_v58  ;;  %v2328_v24 = vadd.f32 %v2327_v59, %v2326_v9  ;;  %3582 = vmatpush.bf16.msrb.mxu3 %v4901_v53  ;;  %v4899_v59 = vld [vmem:[%s8483_s5 + $0x90] sm:$0xff] }
 0x256   : > { %v2334_v46 = vadd.f32 %v2333_v63, %v2332_v6  ;;  %v2340_v30 = vadd.f32 %v2339_v12, %v2338_v4  ;;  %v2346_v55 = vadd.f32 %v2345_v48, %v2344_v52  ;;  %v3000_v37 = vsel %vm2667_vm0, %v7720_v42, %v7718_v45 }
 0x257   : > { %v3007_v11 = vsel %vm2667_vm0, %v2310_v2, %v2304_v39  ;;  %v7781_v28 = vadd.f32 %v7520_v57, %v7711_v47  ;;  %v3229_v26 = vadd.f32 %v7520_v57, %v3228_v56  ;;  %v3001_v35 = vsel %vm2669_vm1, %v7722_v50, %v3000_v37  ;;  %v4897_v2 = vld [vmem:[%s8483_s5 + $0x80] sm:$0xff] }
 0x258   : > { %v3008_v38 = vsel %vm2669_vm1, %v2316_v13, %v3007_v11  ;;  %v3182_v0 = vadd.f32 %v7520_v57, %v7716_v5  ;;  %v3184_v60 = vadd.f32 %v7520_v57, %v3183_v62  ;;  %v3002_v45 = vsel %vm2671_vm2, %v7724_v25, %v3001_v35 }
 0x259   : > { %v3009_v42 = vsel %vm2671_vm2, %v2322_v40, %v3008_v38  ;;  %v3262_v47 = vpack.c.bf16 %v3229_v26, %v7663_v16  ;;  %v3236_v44 = vpack.c.bf16 %v7781_v28, %v7660_v61  ;;  %v3003_v50 = vsel %vm2673_vm3, %v7726_v41, %v3002_v45 }
 0x25a   : > { %v3010_v10 = vsel %vm2673_vm3, %v2328_v24, %v3009_v42  ;;  %v3486_v5 = vsub.f32 %v3182_v0, %v7533_v51  ;;  %v7801_v19 = vmul.f32 %v7533_v51, %v3182_v0  ;;  %v3004_v25 = vsel %vm2675_vm4, %v7728_v23, %v3003_v50  ;;  %v4912_v51 = vld [vmem:[%s8483_s5 + $0xf8] sm:$0xff]  ;;  %v3188_v1 = vpop.f32.mrf.mxu0  ;;  %v4911_v24 = vld [vmem:[%s8483_s5 + $0xf0] sm:$0xff] }
 0x25b   : > { %v3011_v62 = vsel %vm2675_vm4, %v2334_v46, %v3010_v10  ;;  %3371 = vmatmul.bf16.gmra.mxu3 %v3262_v47  ;;  %3458 = vmatmul.bf16.gmra.mxu2 %v3236_v44  ;;  %v3005_v41 = vsel %vm2677_vm5, %v7730_v36, %v3004_v25  ;;  %v3487_v18 = vsub.f32 %v3184_v60, %v7650_v49  ;;  %v4900_v36 = vld [vmem:[%s8483_s5 + $0x98] sm:$0xff] }
 0x25c   : > { %v3012_v20 = vsel %vm2677_vm5, %v2340_v30, %v3011_v62  ;;  %v3006_v23 = vsel %vm2679_vm6, %v7732_v29, %v3005_v41  ;;  %v7820_v31 = vmul.f32 %v7650_v49, %v3184_v60  ;;  %v3187_v9 = vadd.f32 %v7520_v57, %v3186_v8  ;;  %3733 = vmatpush.bf16.msrb.mxu1 %v4912_v51  ;;  %v4910_v8 = vld [vmem:[%s8483_s5 + $0xe8] sm:$0xff] }
 0x25d   : > { %v3013_v58 = vsel %vm2679_vm6, %v2346_v55, %v3012_v20  ;;  %v7826_v4 = vand.u32 2147483647, %v3486_v5  ;;  %v7828_v52 = vand.u32 2147483647, %v3487_v18  ;;  %v3189_v14 = vadd.f32 %v7520_v57, %v3188_v1  ;;  %3583 = vmatpush.bf16.msrb.mxu3 %v4900_v36  ;;  %v4908_v18 = vld [vmem:[%s8483_s5 + $0xd8] sm:$0xff] }
 0x25e   : > { %v3071_v6 = vpack.c.bf16 %v3013_v58, %v3006_v23  ;;  %v3488_v29 = vsub.f32 %v3187_v9, %v7663_v16  ;;  %v7832_v27 = vmul.f32 %v7663_v16, %v3187_v9  ;;  %v3666_v49 = vpack.c.bf16 %v7820_v31, %v7801_v19  ;;  %v4898_v16 = vld [vmem:[%s8483_s5 + $0x88] sm:$0xff] }
 0x25f   : > { %v3512_v43 = vpack.c.bf16 %v7828_v52, %v7826_v4  ;;  %v3489_v63 = vsub.f32 %v3189_v14, %v3229_v26  ;;  %v7842_v12 = vmul.f32 %v3229_v26, %v3189_v14  ;;  %v3237_v48 = vpack.c.bf16 %v3184_v60, %v3182_v0  ;;  %v4918_v52 = vld [vmem:[#allocation8 + $0x28] sm:$0xff] }
 0x260   : > { %3215 = vmatmul.bf16.gmra.mxu0 %v3071_v6  ;;  %v7852_v13 = vand.u32 2147483647, %v3488_v29  ;;  %3734 = vmatpush.bf16.msrb.mxu1 %v4911_v24  ;;  %v3238_v35 = vpack.c.bf16 %v3189_v14, %v3187_v9 }
 0x261   : > { %3584 = vmatpush.bf16.msrb.mxu3 %v4899_v59  ;;  %v7847_v56 = vand.u32 2147483647, %v3489_v63  ;;  %v3667_v40 = vpack.c.bf16 %v7842_v12, %v7832_v27 }
 0x262   : > { %v3191_v39 = vpop.f32.mrf.mxu0 }
 0x263   : > { %v3513_v46 = vpack.c.bf16 %v7847_v56, %v7852_v13  ;;  %v3192_v55 = vadd.f32 %v7520_v57, %v3191_v39  ;;  %v4916_v13 = vld [vmem:[#allocation8 + $0x18] sm:$0xff] }
 0x264   : > { %3735 = vmatpush.bf16.msrb.mxu1 %v4910_v8 }
 0x265   : > { %3585 = vmatpush.bf16.msrb.mxu3 %v4898_v16  ;;  %v7867_v38 = vmul.f32 %v3192_v55, %v7120_v17  ;;  %v3474_v47 = vsub.f32 %v7120_v17, %v3192_v55  ;;  %v4909_v17 = vld [vmem:[%s8483_s5 + $0xe0] sm:$0xff] }
 0x267   : > { %v3490_v25 = vand.u32 2147483647, %v3474_v47 }
 0x268   : > { %3736 = vmatpush.bf16.msrb.mxu1 %v4909_v17 }
 0x269   : > { %3586 = vmatpush.bf16.msrb.mxu3 %v4897_v2 }
 0x26a   : > { %v3193_v30 = vpop.f32.mrf.mxu0 }
 0x26b   : > { %3463 = vmatmul.bf16.vlgmr.msra.gmra.mxu3 %v3237_v48  ;;  %v3194_v37 = vadd.f32 %v7520_v57, %v3193_v30 }
 0x26c   : > { %3737 = vmatpush.bf16.msrb.mxu1 %v4908_v18 }
 0x26d   : > { %v3255_v11 = vpack.c.bf16 %v3194_v37, %v3192_v55  ;;  %v7864_v26 = vmul.f32 %v3194_v37, %v7213_v22  ;;  %v3475_v45 = vsub.f32 %v7213_v22, %v3194_v37  ;;  %v4907_v37 = vld [vmem:[%s8483_s5 + $0xd0] sm:$0xff] }
 0x26f   : > { %3336 = vmatmul.bf16.vlgmr.msra.gmra.mxu1 %v3255_v11  ;;  %v3660_v60 = vpack.c.bf16 %v7864_v26, %v7867_v38  ;;  %v3491_v10 = vand.u32 2147483647, %v3475_v45  ;;  %v4917_v38 = vld [vmem:[#allocation8 + $0x20] sm:$0xff] }
 0x270   : > { %3738 = vmatpush.bf16.msrb.mxu1 %v4907_v37 }
 0x271   : > { %v3506_v62 = vpack.c.bf16 %v3491_v10, %v3490_v25  ;;  %v4906_v10 = vld [vmem:[%s8483_s5 + $0xc8] sm:$0xff] }
 0x272   : > { %v3196_v0 = vpop.f32.mrf.mxu0 }
 0x273   : > { %v3197_v44 = vadd.f32 %v7520_v57, %v3196_v0 }
 0x274   : > { %3739 = vmatpush.bf16.msrb.mxu1 %v4906_v10  ;;  %v4920_v10 = vld [vmem:[#allocation8 + $0x38] sm:$0xff] }
 0x275   : > { %v7879_v41 = vmul.f32 %v3197_v44, %v7216_v3  ;;  %v3476_v9 = vsub.f32 %v7216_v3, %v3197_v44  ;;  %3910 = vmatpush.bf16.msrb.mxu2 %v4920_v10 }
 0x277   : > { %v3492_v1 = vand.u32 2147483647, %v3476_v9 }
 0x27a   : > { %v3198_v42 = vpop.f32.mrf.mxu0 }
 0x27b   : > { %3468 = vmatmul.bf16.gmra.mxu3 %v3238_v35  ;;  %v3199_v50 = vadd.f32 %v7520_v57, %v3198_v42 }
 0x27d   : > { %v3256_v5 = vpack.c.bf16 %v3199_v50, %v3197_v44  ;;  %v7882_v20 = vmul.f32 %v3199_v50, %v7306_v7  ;;  %v3477_v51 = vsub.f32 %v7306_v7, %v3199_v50 }
 0x27f   : > { %3341 = vmatmul.bf16.gmra.mxu1 %v3256_v5  ;;  %v3661_v22 = vpack.c.bf16 %v7882_v20, %v7879_v41  ;;  %v3493_v6 = vand.u32 2147483647, %v3477_v51  ;;  %v4915_v41 = vld [vmem:[#allocation8 + $0x10] sm:$0xff] }
 0x281   : > { %v3507_v14 = vpack.c.bf16 %v3493_v6, %v3492_v1  ;;  %v4905_v6 = vld [vmem:[%s8483_s5 + $0xc0] sm:$0xff] }
 0x282   : > { %v3201_v53 = vpop.f32.mrf.mxu0  ;;  %3740 = vmatpush.bf16.msrb.mxu1 %v4905_v6 }
 0x283   : > { %v3202_v58 = vadd.f32 %v7520_v57, %v3201_v53 }
 0x285   : > { %v7897_v59 = vmul.f32 %v3202_v58, %v7309_v34  ;;  %v3478_v48 = vsub.f32 %v7309_v34, %v3202_v58 }
 0x287   : > { %v3494_v55 = vand.u32 2147483647, %v3478_v48 }
 0x28a   : > { %v3203_v23 = vpop.f32.mrf.mxu0 }
 0x28b   : > { %3587 = vmatmul.bf16.vlgmr.msrb.gmra.mxu3 %v3506_v62  ;;  %v3204_v36 = vadd.f32 %v7520_v57, %v3203_v23 }
 0x28d   : > { %v3257_v29 = vpack.c.bf16 %v3204_v36, %v3202_v58  ;;  %v7900_v63 = vmul.f32 %v3204_v36, %v7408_v54  ;;  %v3479_v3 = vsub.f32 %v7408_v54, %v3204_v36 }
 0x28f   : > { %3346 = vmatmul.bf16.gmra.mxu1 %v3257_v29  ;;  %v3662_v7 = vpack.c.bf16 %v7900_v63, %v7897_v59  ;;  %v3495_v39 = vand.u32 2147483647, %v3479_v3 }
 0x291   : > { %v3508_v35 = vpack.c.bf16 %v3495_v39, %v3494_v55 }
 0x29b   : > { %3592 = vmatmul.bf16.gmra.mxu3 %v3507_v14  ;;  %v3206_v16 = vpop.f32.mrf.mxu0 }
 0x29c   : > { %v3207_v24 = vadd.f32 %v7520_v57, %v3206_v16 }
 0x29e   : > { %v7912_v0 = vmul.f32 %v3207_v24, %v7411_v21  ;;  %v3480_v45 = vsub.f32 %v7411_v21, %v3207_v24 }
 0x2a0   : > { %v3496_v47 = vand.u32 2147483647, %v3480_v45 }
 0x2a3   : > { %v3208_v2 = vpop.f32.mrf.mxu0 }
 0x2a4   : > { %v3209_v30 = vadd.f32 %v7520_v57, %v3208_v2 }
 0x2a6   : > { %v3258_v11 = vpack.c.bf16 %v3209_v30, %v3207_v24  ;;  %v7915_v34 = vmul.f32 %v3209_v30, %v7523_v32  ;;  %v3481_v8 = vsub.f32 %v7523_v32, %v3209_v30 }
 0x2a8   : > { %3351 = vmatmul.bf16.gmra.mxu1 %v3258_v11  ;;  %v3663_v54 = vpack.c.bf16 %v7915_v34, %v7912_v0  ;;  %v3497_v42 = vand.u32 2147483647, %v3481_v8 }
 0x2aa   : > { %v3509_v44 = vpack.c.bf16 %v3497_v42, %v3496_v47 }
 0x2ab   : > { %3597 = vmatmul.bf16.gmra.mxu3 %v3508_v35 }
 0x2bb   : > { %3602 = vmatmul.bf16.gmra.mxu3 %v3509_v44  ;;  %v3211_v50 = vpop.f32.mrf.mxu0 }
 0x2bc   : > { %v3212_v5 = vadd.f32 %v7520_v57, %v3211_v50 }
 0x2bd   : > { %v3367_v9 = vpop.f32.mrf.mxu3 }
 0x2be   : > { %v3482_v53 = vsub.f32 %v7526_v33, %v3212_v5  ;;  %v3652_v17 = vmul.f32 %v3212_v5, %v7526_v33 }
 0x2c0   : > { %v3498_v51 = vand.u32 2147483647, %v3482_v53 }
 0x2c3   : > { %v3213_v25 = vpop.f32.mrf.mxu0 }
 0x2c4   : > { %v3214_v62 = vadd.f32 %v7520_v57, %v3213_v25 }
 0x2c5   : > { %v3369_v29 = vpop.f32.mrf.mxu3 }
 0x2c6   : > { %v3259_v32 = vpack.c.bf16 %v3214_v62, %v3212_v5  ;;  %v3483_v21 = vsub.f32 %v7647_v15, %v3214_v62  ;;  %v3653_v18 = vmul.f32 %v3214_v62, %v7647_v15  ;;  %v4919_v5 = vld [vmem:[#allocation8 + $0x30] sm:$0xff] }
 0x2c7   : > { %3911 = vmatpush.bf16.msrb.mxu2 %v4919_v5 }
 0x2c8   : > { %3356 = vmatmul.bf16.gmra.mxu1 %v3259_v32  ;;  %v3499_v23 = vand.u32 2147483647, %v3483_v21  ;;  %v3664_v58 = vpack.c.bf16 %v3653_v18, %v3652_v17 }
 0x2ca   : > { %v3510_v36 = vpack.c.bf16 %v3499_v23, %v3498_v51  ;;  %v4206_v23 = vld [vmem:[%s7995_s10 + $0x8] sm:$0xff] }
 0x2cb   : > { %3912 = vmatpush.bf16.msrb.mxu2 %v4918_v52 }
 0x2cc   : > { %3607 = vmatmul.bf16.gmra.mxu3 %v3510_v36  ;;  %v6015_v36 = vmov 0  }
 0x2cd   : > { %5669 = vset.pattern.permute.xlu1 %v6015_v36  ;;  %5668 = vset.pattern.permute.xlu0 %v6015_v36 }
 0x2ce   : > { %4225 = vperm.xlu1 %5669, %v4206_v23   ;;  %5670 = vset.pattern.permute.xlu2 %v6015_v36 }
 0x2cf   : > { %3913 = vmatpush.bf16.msrb.mxu2 %v4917_v38 }
 0x2d3   : > { %3914 = vmatpush.bf16.msrb.mxu2 %v4916_v13 }
 0x2d7   : > { %3915 = vmatpush.bf16.msrb.mxu2 %v4915_v41 }
 0x2dd   : > { %v3216_v1 = vpop.f32.mrf.mxu0 }
 0x2de   : > { %v3372_v14 = vpop.f32.mrf.mxu3  ;;  %v3217_v16 = vadd.f32 %v7520_v57, %v3216_v1 }
 0x2e0   : > { %v3484_v3 = vsub.f32 %v7660_v61, %v3217_v16  ;;  %v3654_v24 = vmul.f32 %v3217_v16, %v7660_v61 }
 0x2e2   : > { %v3500_v55 = vand.u32 2147483647, %v3484_v3 }
 0x2e5   : > { %v3218_v33 = vpop.f32.mrf.mxu0 }
 0x2e6   : > { %v3219_v15 = vadd.f32 %v7520_v57, %v3218_v33  ;;  %v3374_v48 = vpop.f32.mrf.mxu3 }
 0x2e8   : > { %v3260_v39 = vpack.c.bf16 %v3219_v15, %v3217_v16  ;;  %v3485_v2 = vsub.f32 %v7781_v28, %v3219_v15  ;;  %v3655_v30 = vmul.f32 %v3219_v15, %v7781_v28  ;;  %v4209_v16 = vld [vmem:[%s7995_s10 + $0x20] sm:$0xff] }
 0x2e9   : > { %4234 = vperm.xlu1 %5669, %v4209_v16   ;;  %v4208_v16 = vld [vmem:[%s7995_s10 + $0x18] sm:$0xff] }
 0x2ea   : > { %3361 = vmatmul.bf16.gmra.mxu1 %v3260_v39  ;;  %v3501_v37 = vand.u32 2147483647, %v3485_v2  ;;  %v3665_v11 = vpack.c.bf16 %v3655_v30, %v3654_v24 }
 0x2ec   : > { %v3511_v35 = vpack.c.bf16 %v3501_v37, %v3500_v55  ;;  %v3337_v47 = vpop.f32.mrf.mxu1 }
 0x2ee   : > { %3612 = vmatmul.bf16.gmra.mxu3 %v3511_v35  ;;  %v3464_v8 = vpop.f32.mrf.mxu3  ;;  %v4211_v35 = vld [vmem:[%s7995_s10 + $0x30] sm:$0xff] }
 0x2ef   : > { %v7939_v45 = vadd.f32 %v3464_v8, %v3367_v9 }
 0x2f4   : > { %v3339_v26 = vpop.f32.mrf.mxu1 }
 0x2f6   : > { %v3466_v57 = vpop.f32.mrf.mxu3 }
 0x2f7   : > { %v7941_v42 = vadd.f32 %v3466_v57, %v3369_v29 }
 0x2fa   : > { %3741 = vmatmul.bf16.vlgmr.msrb.gmra.mxu1 %v3660_v60 }
 0x2fc   : > { %v7959_v4 = vpop.f32.mrf.mxu1 }
 0x2fe   : > { %3617 = vmatmul.bf16.gmra.mxu3 %v3512_v43  ;;  %v3469_v61 = vpop.f32.mrf.mxu3 }
 0x2ff   : > { %v7949_v28 = vadd.f32 %v3469_v61, %v3372_v14 }
 0x304   : > { %v7964_v43 = vpop.f32.mrf.mxu1 }
 0x306   : > { %v3471_v44 = vpop.f32.mrf.mxu3 }
 0x307   : > { %v7951_v50 = vadd.f32 %v3471_v44, %v3374_v48 }
 0x30a   : > { %3746 = vmatmul.bf16.gmra.mxu1 %v3661_v22  ;;  %v4914_v22 = vld [vmem:[#allocation8 + $0x8] sm:$0xff] }
 0x30b   : > { %3916 = vmatpush.bf16.msrb.mxu2 %v4914_v22 }
 0x30c   : > { %v7969_v60 = vpop.f32.mrf.mxu1 }
 0x30e   : > { %3622 = vmatmul.bf16.gmra.mxu3 %v3513_v46  ;;  %v3588_v63 = vpop.f32.mrf.mxu3 }
 0x314   : > { %v7971_v56 = vpop.f32.mrf.mxu1 }
 0x316   : > { %v3590_v34 = vpop.f32.mrf.mxu3 }
 0x31a   : > { %3751 = vmatmul.bf16.gmra.mxu1 %v3662_v7  ;;  %v3434_v7 = vpop.f32.mrf.mxu2 }
 0x31e   : > { %v3593_v53 = vpop.f32.mrf.mxu3 }
 0x322   : > { %v3436_v25 = vpop.f32.mrf.mxu2 }
 0x323   : > { %v3437_v18 = vadd.f32 %v3436_v25, %v3339_v26  ;;  %v4212_v26 = vld [vmem:[%s7995_s10 + $0x38] sm:$0xff]  ;;  %v4214_v25 = vld [vmem:[%s7995_s10 + $0x48] sm:$0xff] }
 0x325   : > { %v7973_v46 = vpop.f32.mrf.mxu1  ;;  %v3629_v9 = vadd.f32 %v3590_v34, %v3437_v18 }
 0x326   : > { %v3595_v31 = vpop.f32.mrf.mxu3 }
 0x32a   : > { %3756 = vmatmul.bf16.gmra.mxu1 %v3663_v54  ;;  %v4913_v54 = vld [vmem:[#allocation8] sm:$0xff]  ;;  %v3439_v19 = vpop.f32.mrf.mxu2 }
 0x32b   : > { %3917 = vmatpush.bf16.msrb.mxu2 %v4913_v54  ;;  %v3440_v15 = vadd.f32 %v3439_v19, %v7959_v4  ;;  %v4213_v4 = vld [vmem:[%s7995_s10 + $0x40] sm:$0xff] }
 0x32d   : > { %v7975_v20 = vpop.f32.mrf.mxu1  ;;  %v3630_v2 = vadd.f32 %v3593_v53, %v3440_v15  ;;  %v4215_v53 = vld [vmem:[%s7995_s10 + $0x50] sm:$0xff] }
 0x32e   : > { %v3598_v51 = vpop.f32.mrf.mxu3  ;;  %v4219_v15 = vld [vmem:[%s7995_s10 + $0x70] sm:$0xff] }
 0x332   : > { %v3441_v27 = vpop.f32.mrf.mxu2 }
 0x333   : > { %v3442_v37 = vadd.f32 %v3441_v27, %v7964_v43  ;;  %v4207_v27 = vld [vmem:[%s7995_s10 + $0x10] sm:$0xff] }
 0x334   : > { %4228 = vperm.xlu2 %5670, %v4207_v27  }
 0x335   : > { %v3631_v8 = vadd.f32 %v3595_v31, %v3442_v37 }
 0x336   : > { %v3600_v3 = vpop.f32.mrf.mxu3 }
 0x33a   : > { %3761 = vmatmul.bf16.gmra.mxu1 %v3664_v58  ;;  %v4205_v58 = vld [vmem:[%s7995_s10] sm:$0xff]  ;;  %v3444_v33 = vpop.f32.mrf.mxu2 }
 0x33b   : > { %4222 = vperm.xlu0 %5668, %v4205_v58   ;;  %v3445_v52 = vadd.f32 %v3444_v33, %v7969_v60  ;;  %v4218_v33 = vld [vmem:[%s7995_s10 + $0x68] sm:$0xff] }
 0x33c   : > { %4231 = vperm.xlu2 %5670, %v4208_v16  }
 0x33d   : > { %v3632_v41 = vadd.f32 %v3598_v51, %v3445_v52 }
 0x33e   : > { %v3603_v10 = vpop.f32.mrf.mxu3 }
 0x342   : > { %v3446_v57 = vpop.f32.mrf.mxu2 }
 0x343   : > { %4240 = vperm.xlu0 %5668, %v4211_v35   ;;  %v3447_v54 = vadd.f32 %v3446_v57, %v7971_v56  ;;  %v4217_v56 = vld [vmem:[%s7995_s10 + $0x60] sm:$0xff] }
 0x345   : > { %v7977_v59 = vpop.f32.mrf.mxu1  ;;  %v3633_v19 = vadd.f32 %v3600_v3, %v3447_v54 }
 0x34a   : > { %3766 = vmatmul.bf16.gmra.mxu1 %v3665_v11  ;;  %v4210_v11 = vld [vmem:[%s7995_s10 + $0x28] sm:$0xff]  ;;  %v3449_v13 = vpop.f32.mrf.mxu2 }
 0x34b   : > { %4237 = vperm.xlu1 %5669, %v4210_v11   ;;  %4246 = vperm.xlu0 %5668, %v4213_v4   ;;  %v3450_v51 = vadd.f32 %v3449_v13, %v7973_v46 }
 0x34d   : > { %v7982_v0 = vpop.f32.mrf.mxu1 }
 0x353   : > { %4243 = vperm.xlu1 %5669, %v4212_v26   ;;  %4252 = vperm.xlu0 %5668, %v4215_v53  }
 0x35a   : > { %3771 = vmatmul.bf16.gmra.mxu1 %v3666_v49  ;;  %v3435_v49 = vadd.f32 %v3434_v7, %v3337_v47 }
 0x35b   : > { %4249 = vperm.xlu1 %5669, %v4214_v25   ;;  %4258 = vperm.xlu0 %5668, %v4217_v56  }
 0x35c   : > { %v3628_v17 = vadd.f32 %v3588_v63, %v3435_v49  ;;  %v3605_v63 = vpop.f32.mrf.mxu3 }
 0x363   : > { %4264 = vperm.xlu0 %5668, %v4219_v15  }
 0x364   : > { %v3608_v18 = vpop.f32.mrf.mxu3 }
 0x367   : > { %v7984_v62 = vpop.f32.mrf.mxu1 }
 0x36a   : > { %3776 = vmatmul.bf16.gmra.mxu1 %v3667_v40  ;;  %v8000_v40 = vld [vmem:[%s8484_s6] ss:$0 sm:$0xff] }
 0x36f   : > { %v7990_v32 = vpop.f32.mrf.mxu1 }
 0x377   : > { %v3742_v21 = vpop.f32.mrf.mxu1 }
 0x378   : > { %v3782_v12 = vadd.f32 %v3742_v21, %v3628_v17  ;;  %v3451_v17 = vpop.f32.mrf.mxu2 }
 0x37a   : > { %v3802_v6 = vadd.f32 %v8000_v40, %v3782_v12  ;;  %v4216_v12 = vld [vmem:[%s7995_s10 + $0x58] sm:$0xff] }
 0x37b   : > { %4255 = vperm.xlu1 %5669, %v4216_v12  }
 0x37c   : > { %5674 = vtanh.f32 %v3802_v6 }
 0x37f   : > { %v3744_v29 = vpop.f32.mrf.mxu1 }
 0x380   : > { %v3783_v1 = vadd.f32 %v3744_v29, %v3629_v9  ;;  %v3634_v9 = vadd.f32 %v3603_v10, %v3450_v51 }
 0x382   : > { %v3803_v14 = vadd.f32 %v8000_v40, %v3783_v1  ;;  %v5675_v39 = vpop.eup %5674  ;;  %v3452_v1 = vadd.f32 %v3451_v17, %v7975_v20  ;;  %v4220_v20 = vld [vmem:[%s7995_s10 + $0x78] sm:$0xff] }
 0x383   : > { %4261 = vperm.xlu1 %5669, %v4218_v33  }
 0x384   : > { %5676 = vtanh.f32 %v3803_v14  ;;  %v3454_v14 = vpop.f32.mrf.mxu2  ;;  %v3635_v3 = vadd.f32 %v3605_v63, %v3452_v1 }
 0x387   : > { %v3747_v48 = vpop.f32.mrf.mxu1 }
 0x388   : > { %v3784_v30 = vadd.f32 %v3747_v48, %v3630_v2  ;;  %v3610_v48 = vpop.f32.mrf.mxu3 }
 0x38a   : > { %v5677_v24 = vpop.eup %5676  ;;  %v3804_v61 = vadd.f32 %v8000_v40, %v3784_v30 }
 0x38b   : > { %v3834_v55 = vpack.c.bf16 %v5677_v24, %v5675_v39  ;;  %4267 = vperm.xlu1 %5669, %v4220_v20  }
 0x38c   : > { %5678 = vtanh.f32 %v3804_v61  ;;  %v3456_v30 = vpop.f32.mrf.mxu2 }
 0x38d   : > { %3918 = vmatmul.bf16.vlgmr.msrb.gmra.mxu2 %v3834_v55  ;;  %v3455_v55 = vadd.f32 %v3454_v14, %v7977_v59 }
 0x38f   : > { %v3749_v47 = vpop.f32.mrf.mxu1  ;;  %v3636_v35 = vadd.f32 %v3608_v18, %v3455_v55 }
 0x390   : > { %v3785_v44 = vadd.f32 %v3749_v47, %v3631_v8  ;;  %v3613_v8 = vpop.f32.mrf.mxu3 }
 0x392   : > { %v3805_v5 = vadd.f32 %v8000_v40, %v3785_v44  ;;  %v5679_v38 = vpop.eup %5678  ;;  %v3457_v44 = vadd.f32 %v3456_v30, %v7982_v0 }
 0x394   : > { %5680 = vtanh.f32 %v3805_v5  ;;  %v3637_v10 = vadd.f32 %v3610_v48, %v3457_v44  ;;  %v3459_v52 = vpop.f32.mrf.mxu2 }
 0x397   : > { %v3752_v43 = vpop.f32.mrf.mxu1 }
 0x398   : > { %v3786_v7 = vadd.f32 %v3752_v43, %v3632_v41  ;;  %v3615_v59 = vpop.f32.mrf.mxu3 }
 0x39a   : > { %v5681_v22 = vpop.eup %5680  ;;  %v3806_v60 = vadd.f32 %v8000_v40, %v3786_v7 }
 0x39b   : > { %v3835_v34 = vpack.c.bf16 %v5681_v22, %v5679_v38  ;;  %v3460_v38 = vadd.f32 %v3459_v52, %v7984_v62 }
 0x39c   : > { %5682 = vtanh.f32 %v3806_v60  ;;  %v3461_v7 = vpop.f32.mrf.mxu2 }
 0x39d   : > { %3923 = vmatmul.bf16.gmra.mxu2 %v3835_v34  ;;  %v3638_v22 = vadd.f32 %v3613_v8, %v3460_v38  ;;  %v3462_v54 = vadd.f32 %v3461_v7, %v7990_v32 }
 0x39f   : > { %v3754_v31 = vpop.f32.mrf.mxu1  ;;  %v3639_v53 = vadd.f32 %v3615_v59, %v3462_v54 }
 0x3a0   : > { %v3787_v49 = vadd.f32 %v3754_v31, %v3633_v19  ;;  %v3618_v25 = vpop.f32.mrf.mxu3 }
 0x3a1   : > { %v3640_v27 = vadd.f32 %v3618_v25, %v7939_v45 }
 0x3a2   : > { %v3807_v21 = vadd.f32 %v8000_v40, %v3787_v49  ;;  %v5683_v58 = vpop.eup %5682 }
 0x3a4   : > { %5684 = vtanh.f32 %v3807_v21 }
 0x3a7   : > { %v3757_v23 = vpop.f32.mrf.mxu1 }
 0x3a8   : > { %v3788_v6 = vadd.f32 %v3757_v23, %v3634_v9  ;;  %v3620_v62 = vpop.f32.mrf.mxu3 }
 0x3a9   : > { %v3641_v32 = vadd.f32 %v3620_v62, %v7941_v42 }
 0x3aa   : > { %v5685_v36 = vpop.eup %5684  ;;  %v3808_v46 = vadd.f32 %v8000_v40, %v3788_v6 }
 0x3ab   : > { %v3836_v29 = vpack.c.bf16 %v5685_v36, %v5683_v58 }
 0x3ac   : > { %5686 = vtanh.f32 %v3808_v46  ;;  %v4226_v46 = vpop.permute.xlu1 %4225 }
 0x3ad   : > { %3928 = vmatmul.bf16.gmra.mxu2 %v3836_v29  ;;  %v4223_v20 = vpop.permute.xlu0 %4222 }
 0x3af   : > { %v3759_v39 = vpop.f32.mrf.mxu1 }
 0x3b0   : > { %v3789_v2 = vadd.f32 %v3759_v39, %v3635_v3  ;;  %v3623_v9 = vpop.f32.mrf.mxu3 }
 0x3b1   : > { %v3642_v1 = vadd.f32 %v3623_v9, %v7949_v28 }
 0x3b2   : > { %v3809_v24 = vadd.f32 %v8000_v40, %v3789_v2  ;;  %v5687_v11 = vpop.eup %5686 }
 0x3b4   : > { %5688 = vtanh.f32 %v3809_v24  ;;  %v4235_v24 = vpop.permute.xlu1 %4234 }
 0x3b7   : > { %v3762_v37 = vpop.f32.mrf.mxu1 }
 0x3b8   : > { %v3790_v61 = vadd.f32 %v3762_v37, %v3636_v35  ;;  %v3625_v14 = vpop.f32.mrf.mxu3  ;;  %v8050_v37 = vpop.permute.xlu0 %4240 }
 0x3b9   : > { %v3643_v42 = vadd.f32 %v3625_v14, %v7951_v50  ;;  %v3975_v50 = vlaneseq }
 0x3ba   : > { %v5689_v57 = vpop.eup %5688  ;;  %v3810_v5 = vadd.f32 %v8000_v40, %v3790_v61 }
 0x3bb   : > { %v3837_v47 = vpack.c.bf16 %v5689_v57, %v5687_v11  ;;  %v8057_v8 = vand.u32 127, %v3975_v50 }
 0x3bc   : > { %5690 = vtanh.f32 %v3810_v5 }
 0x3bd   : > { %3933 = vmatmul.bf16.gmra.mxu2 %v3837_v47  ;;  %v8048_v55 = vpop.permute.xlu1 %4237  ;;  %vm4269_vm7 = vcmp.eq.s32.totalorder %v8057_v8, %v4223_v20  ;;  %vm4012_vm8 = vcmp.lt.s32.totalorder %v8057_v8, 3  ;;  %vm4270_vm10 = vcmp.eq.s32.totalorder %v8057_v8, %v4226_v46  ;;  %vm4273_vm0 = vcmp.eq.s32.totalorder %v8057_v8, %v4235_v24 }
 0x3be   : > { %vm4274_vm1 = vcmp.eq.s32.totalorder %v8057_v8, %v8048_v55  ;;  %vm4275_vm2 = vcmp.eq.s32.totalorder %v8057_v8, %v8050_v37 }
 0x3bf   : > { %v3764_v26 = vpop.f32.mrf.mxu1 }
 0x3c0   : > { %v3791_v4 = vadd.f32 %v3764_v26, %v3637_v10  ;;  %v8054_v35 = vpop.permute.xlu0 %4246 }
 0x3c1   : > { %vm4277_vm3 = vcmp.eq.s32.totalorder %v8057_v8, %v8054_v35 }
 0x3c2   : > { %v3811_v43 = vadd.f32 %v8000_v40, %v3791_v4  ;;  %v5691_v41 = vpop.eup %5690 }
 0x3c4   : > { %5692 = vtanh.f32 %v3811_v43 }
 0x3c5   : > { %v8052_v11 = vpop.permute.xlu1 %4243 }
 0x3c6   : > { %vm4276_vm4 = vcmp.eq.s32.totalorder %v8057_v8, %v8052_v11 }
 0x3c7   : > { %v3767_v13 = vpop.f32.mrf.mxu1 }
 0x3c8   : > { %v3792_v0 = vadd.f32 %v3767_v13, %v3638_v22  ;;  %v8070_v44 = vpop.permute.xlu0 %4252  ;;  %v4229_v13 = vpop.permute.xlu2 %4228 }
 0x3c9   : > { %vm4279_vm9 = vcmp.eq.s32.totalorder %v8057_v8, %v8070_v44  ;;  %vm4271_vm13 = vcmp.eq.s32.totalorder %v8057_v8, %v4229_v13 }
 0x3ca   : > { %v5693_v63 = vpop.eup %5692  ;;  %v3812_v19 = vadd.f32 %v8000_v40, %v3792_v0 }
 0x3cb   : > { %v3838_v34 = vpack.c.bf16 %v5693_v63, %v5691_v41 }
 0x3cc   : > { %5694 = vtanh.f32 %v3812_v19 }
 0x3cd   : > { %3938 = vmatmul.bf16.gmra.mxu2 %v3838_v34  ;;  %v8068_v47 = vpop.permute.xlu1 %4249 }
 0x3cf   : > { %v3769_v60 = vpop.f32.mrf.mxu1 }
 0x3d0   : > { %v3793_v31 = vadd.f32 %v3769_v60, %v3639_v53  ;;  %v8086_v43 = vpop.permute.xlu0 %4258  ;;  %v4232_v34 = vpop.permute.xlu2 %4231 }
 0x3d1   : > { %vm4281_vm12 = vcmp.eq.s32.totalorder %v8057_v8, %v8086_v43  ;;  %vm4272_vm15 = vcmp.eq.s32.totalorder %v8057_v8, %v4232_v34 }
 0x3d2   : > { %v3813_v49 = vadd.f32 %v8000_v40, %v3793_v31  ;;  %v5695_v17 = vpop.eup %5694 }
 0x3d4   : > { %5696 = vtanh.f32 %v3813_v49 }
 0x3d7   : > { %v3772_v21 = vpop.f32.mrf.mxu1 }
 0x3d8   : > { %v3794_v56 = vadd.f32 %v3772_v21, %v3640_v27  ;;  %v4265_v11 = vpop.permute.xlu0 %4264 }
 0x3d9   : > { %vm4283_vm5 = vcmp.eq.s32.totalorder %v8057_v8, %v4265_v11 }
 0x3da   : > { %v5697_v12 = vpop.eup %5696  ;;  %v3814_v51 = vadd.f32 %v8000_v40, %v3794_v56 }
 0x3db   : > { %v3839_v18 = vpack.c.bf16 %v5697_v12, %v5695_v17 }
 0x3dc   : > { %5698 = vtanh.f32 %v3814_v51 }
 0x3dd   : > { %3943 = vmatmul.bf16.gmra.mxu2 %v3839_v18 }
 0x3df   : > { %v3774_v23 = vpop.f32.mrf.mxu1 }
 0x3e0   : > { %v3795_v58 = vadd.f32 %v3774_v23, %v3641_v32 }
 0x3e2   : > { %v3815_v36 = vadd.f32 %v8000_v40, %v3795_v58  ;;  %v5699_v29 = vpop.eup %5698 }
 0x3e4   : > { %5700 = vtanh.f32 %v3815_v36 }
 0x3e7   : > { %v3777_v6 = vpop.f32.mrf.mxu1 }
 0x3e8   : > { %v3796_v16 = vadd.f32 %v3777_v6, %v3642_v1 }
 0x3ea   : > { %v5701_v45 = vpop.eup %5700  ;;  %v3816_v15 = vadd.f32 %v8000_v40, %v3796_v16 }
 0x3eb   : > { %v3840_v33 = vpack.c.bf16 %v5701_v45, %v5699_v29 }
 0x3ec   : > { %5702 = vtanh.f32 %v3816_v15 }
 0x3ed   : > { %3948 = vmatmul.bf16.gmra.mxu2 %v3840_v33  ;;  %v8084_v52 = vpop.permute.xlu1 %4255 }
 0x3ee   : > { %vm4280_vm11 = vcmp.eq.s32.totalorder %v8057_v8, %v8084_v52 }
 0x3ef   : > { %v3779_v3 = vpop.f32.mrf.mxu1 }
 0x3f0   : > { %v3797_v48 = vadd.f32 %v3779_v3, %v3643_v42 }
 0x3f2   : > { %v3817_v39 = vadd.f32 %v8000_v40, %v3797_v48  ;;  %v5703_v2 = vpop.eup %5702  ;;  %v8063_v40 = vld [vmem:[%s8486_s8] ss:$0 sm:$0xff] }
 0x3f4   : > { %5704 = vtanh.f32 %v3817_v39 }
 0x3f5   : > { %v8100_v63 = vpop.permute.xlu1 %4261 }
 0x3f6   : > { %vm4282_vm14 = vcmp.eq.s32.totalorder %v8057_v8, %v8100_v63 }
 0x3fa   : > { %v5705_v28 = vpop.eup %5704 }
 0x3fb   : > { %v3841_v30 = vpack.c.bf16 %v5705_v28, %v5703_v2 }
 0x3fd   : > { %3953 = vmatmul.bf16.gmra.mxu2 %v3841_v30  ;;  %v4268_v52 = vpop.permute.xlu1 %4267 }
 0x3fe   : > { %vm4284_vm6 = vcmp.eq.s32.totalorder %v8057_v8, %v4268_v52 }
 0x410   : > { %v3919_v57 = vpop.f32.mrf.mxu2 }
 0x411   : > { %v3920_v61 = vadd.f32 %v8063_v40, %v3919_v57 }
 0x413   : > { %3959 = vst [vmem:[%s8072_s28] sm:$0xff] %v3920_v61  ;;  %v4285_v10 = vsel %vm4269_vm7, %v3920_v61, 0.0  ;;  %v8077_v5 = vsel %vm4012_vm8, %v3920_v61, -1e+30  ;;  %vm4278_vm7 = vcmp.eq.s32.totalorder %v8057_v8, %v8068_v47 }
 0x414   : > { %4301 = vadd.xlane.f32.xlu2 %v4285_v10  ;;  %4045 = vmax.xlane.f32.xlu0 %v8077_v5 }
 0x418   : > { %v3921_v26 = vpop.f32.mrf.mxu2 }
 0x419   : > { %v3922_v4 = vadd.f32 %v8063_v40, %v3921_v26 }
 0x41b   : > { %3960 = vst [vmem:[%s8072_s28 + $0x8] sm:$0xff] %v3922_v4  ;;  %v4286_v59 = vsel %vm4270_vm10, %v3922_v4, 0.0  ;;  %v8091_v38 = vsel %vm4012_vm8, %v3922_v4, -1e+30  ;;  %vm4365_vm10 = vcmask 7168  }
 0x41c   : > { %4303 = vadd.xlane.f32.xlu2 %v4286_v59  ;;  %4047 = vmax.xlane.f32.xlu0 %v8091_v38 }
 0x420   : > { %v3924_v41 = vpop.f32.mrf.mxu2 }
 0x421   : > { %v3925_v22 = vadd.f32 %v8063_v40, %v3924_v41 }
 0x423   : > { %3961 = vst [vmem:[%s8072_s28 + $0x10] sm:$0xff] %v3925_v22  ;;  %v8105_v7 = vsel %vm4012_vm8, %v3925_v22, -1e+30  ;;  %v8109_v0 = vsel %vm4271_vm13, %v3925_v22, 0.0 }
 0x424   : > { %4049 = vmax.xlane.f32.xlu1 %v8105_v7 }
 0x428   : > { %v3926_v54 = vpop.f32.mrf.mxu2 }
 0x429   : > { %v3927_v25 = vadd.f32 %v8063_v40, %v3926_v54 }
 0x42b   : > { %3962 = vst [vmem:[%s8072_s28 + $0x18] sm:$0xff] %v3927_v25  ;;  %v8117_v53 = vsel %vm4012_vm8, %v3927_v25, -1e+30  ;;  %v8119_v19 = vsel %vm4272_vm15, %v3927_v25, 0.0 }
 0x42c   : > { %4051 = vmax.xlane.f32.xlu1 %v8117_v53 }
 0x430   : > { %v3929_v60 = vpop.f32.mrf.mxu2 }
 0x431   : > { %v3930_v31 = vadd.f32 %v8063_v40, %v3929_v60 }
 0x433   : > { %3963 = vst [vmem:[%s8072_s28 + $0x20] sm:$0xff] %v3930_v31  ;;  %v8127_v49 = vsel %vm4012_vm8, %v3930_v31, -1e+30  ;;  %v4289_v62 = vsel %vm4273_vm0, %v3930_v31, 0.0 }
 0x434   : > { %4053 = vmax.xlane.f32.xlu2 %v8127_v49 }
 0x438   : > { %v3931_v21 = vpop.f32.mrf.mxu2 }
 0x439   : > { %v3932_v17 = vadd.f32 %v8063_v40, %v3931_v21 }
 0x43b   : > { %3964 = vst [vmem:[%s8072_s28 + $0x28] sm:$0xff] %v3932_v17  ;;  %v8136_v27 = vsel %vm4012_vm8, %v3932_v17, -1e+30  ;;  %v8138_v12 = vsel %vm4274_vm1, %v3932_v17, 0.0 }
 0x43c   : > { %4055 = vmax.xlane.f32.xlu2 %v8136_v27 }
 0x440   : > { %v3934_v56 = vpop.f32.mrf.mxu2 }
 0x441   : > { %v3935_v18 = vadd.f32 %v8063_v40, %v3934_v56 }
 0x443   : > { %3965 = vst [vmem:[%s8072_s28 + $0x30] sm:$0xff] %v3935_v18  ;;  %v8147_v32 = vsel %vm4012_vm8, %v3935_v18, -1e+30  ;;  %v4291_v51 = vsel %vm4275_vm2, %v3935_v18, 0.0 }
 0x444   : > { %4057 = vmax.xlane.f32.xlu0 %v8147_v32 }
 0x448   : > { %v3936_v23 = vpop.f32.mrf.mxu2 }
 0x449   : > { %v3937_v58 = vadd.f32 %v8063_v40, %v3936_v23 }
 0x44b   : > { %3966 = vst [vmem:[%s8072_s28 + $0x38] sm:$0xff] %v3937_v58  ;;  %v8154_v9 = vsel %vm4012_vm8, %v3937_v58, -1e+30  ;;  %v4292_v57 = vsel %vm4276_vm4, %v3937_v58, 0.0 }
 0x44c   : > { %4059 = vmax.xlane.f32.xlu1 %v8154_v9 }
 0x450   : > { %v3939_v36 = vpop.f32.mrf.mxu2 }
 0x451   : > { %v3940_v6 = vadd.f32 %v8063_v40, %v3939_v36 }
 0x453   : > { %3967 = vst [vmem:[%s8072_s28 + $0x40] sm:$0xff] %v3940_v6  ;;  %v8163_v29 = vsel %vm4012_vm8, %v3940_v6, -1e+30  ;;  %v8165_v1 = vsel %vm4277_vm3, %v3940_v6, 0.0 }
 0x454   : > { %4061 = vmax.xlane.f32.xlu2 %v8163_v29 }
 0x458   : > { %v3941_v45 = vpop.f32.mrf.mxu2 }
 0x459   : > { %v3942_v14 = vadd.f32 %v8063_v40, %v3941_v45 }
 0x45b   : > { %3968 = vst [vmem:[%s8072_s28 + $0x48] sm:$0xff] %v3942_v14  ;;  %v8172_v16 = vsel %vm4012_vm8, %v3942_v14, -1e+30 }
 0x45c   : > { %4063 = vmax.xlane.f32.xlu0 %v8172_v16 }
 0x460   : > { %v3944_v33 = vpop.f32.mrf.mxu2 }
 0x461   : > { %v3945_v42 = vadd.f32 %v8063_v40, %v3944_v33 }
 0x463   : > { %3969 = vst [vmem:[%s8072_s28 + $0x50] sm:$0xff] %v3945_v42  ;;  %v8179_v15 = vsel %vm4012_vm8, %v3945_v42, -1e+30  ;;  %v8184_v3 = vsel %vm4279_vm9, %v3945_v42, 0.0 }
 0x464   : > { %4065 = vmax.xlane.f32.xlu1 %v8179_v15 }
 0x468   : > { %v3946_v48 = vpop.f32.mrf.mxu2 }
 0x469   : > { %v3947_v46 = vadd.f32 %v8063_v40, %v3946_v48 }
 0x46b   : > { %3970 = vst [vmem:[%s8072_s28 + $0x58] sm:$0xff] %v3947_v46  ;;  %v8191_v39 = vsel %vm4012_vm8, %v3947_v46, -1e+30  ;;  %v8196_v2 = vsel %vm4280_vm11, %v3947_v46, 0.0 }
 0x46c   : > { %4067 = vmax.xlane.f32.xlu2 %v8191_v39 }
 0x470   : > { %v3949_v24 = vpop.f32.mrf.mxu2 }
 0x471   : > { %v3950_v28 = vadd.f32 %v8063_v40, %v3949_v24 }
 0x473   : > { %3971 = vst [vmem:[%s8072_s28 + $0x60] sm:$0xff] %v3950_v28  ;;  %v8203_v20 = vsel %vm4012_vm8, %v3950_v28, -1e+30  ;;  %v8208_v30 = vsel %vm4281_vm12, %v3950_v28, 0.0 }
 0x474   : > { %4309 = vadd.xlane.f32.xlu2 %v4289_v62  ;;  %4069 = vmax.xlane.f32.xlu0 %v8203_v20 }
 0x478   : > { %v3951_v55 = vpop.f32.mrf.mxu2 }
 0x479   : > { %v3952_v37 = vadd.f32 %v8063_v40, %v3951_v55 }
 0x47b   : > { %3972 = vst [vmem:[%s8072_s28 + $0x68] sm:$0xff] %v3952_v37  ;;  %v8217_v35 = vsel %vm4012_vm8, %v3952_v37, -1e+30  ;;  %v8222_v61 = vsel %vm4282_vm14, %v3952_v37, 0.0 }
 0x47c   : > { %4071 = vmax.xlane.f32.xlu1 %v8217_v35  ;;  %4315 = vadd.xlane.f32.xlu2 %v4292_v57 }
 0x47d   : > { %4307 = vadd.xlane.f32.xlu0 %v8119_v19 }
 0x480   : > { %v3954_v44 = vpop.f32.mrf.mxu2 }
 0x481   : > { %v3955_v10 = vadd.f32 %v8063_v40, %v3954_v44 }
 0x483   : > { %3973 = vst [vmem:[%s8072_s28 + $0x70] sm:$0xff] %v3955_v10  ;;  %v8231_v26 = vsel %vm4012_vm8, %v3955_v10, -1e+30  ;;  %v8233_v4 = vsel %vm4283_vm5, %v3955_v10, 0.0 }
 0x484   : > { %4305 = vadd.xlane.f32.xlu1 %v8109_v0  ;;  %4073 = vmax.xlane.f32.xlu2 %v8231_v26 }
 0x485   : > { %4313 = vadd.xlane.f32.xlu0 %v4291_v51 }
 0x487   : > { %v8237_v43 = vpop.xlane.xlu0 %4045  ;;  %v8259_v8 = vpop.xlane.xlu2 %4301 }
 0x488   : > { %v4077_v59 = vsub.f32 %v8077_v5, %v8237_v43  ;;  %v3956_v13 = vpop.f32.mrf.mxu2  ;;  %v4294_v5 = vsel %vm4278_vm7, %v3942_v14, 0.0 }
 0x489   : > { %v3957_v41 = vadd.f32 %v8063_v40, %v3956_v13 }
 0x48a   : > { %v4093_v22 = vmul.f32 1.442695, %v4077_v59 }
 0x48b   : > { %3974 = vst [vmem:[%s8072_s28 + $0x78] sm:$0xff] %v3957_v41  ;;  %v8248_v63 = vsel %vm4012_vm8, %v3957_v41, -1e+30  ;;  %v8250_v0 = vsel %vm4284_vm6, %v3957_v41, 0.0 }
 0x48c   : > { %5706 = vpow2.f32 %v4093_v22  ;;  %4311 = vadd.xlane.f32.xlu1 %v8138_v12  ;;  %4075 = vmax.xlane.f32.xlu2 %v8248_v63 }
 0x48d   : > { %4319 = vadd.xlane.f32.xlu0 %v4294_v5 }
 0x48f   : > { %v8254_v40 = vpop.xlane.xlu0 %4047  ;;  %v8265_v62 = vpop.xlane.xlu2 %4303 }
 0x490   : > { %v4078_v34 = vsub.f32 %v8091_v38, %v8254_v40 }
 0x492   : > { %v5707_v47 = vpop.eup %5706  ;;  %v4095_v54 = vmul.f32 1.442695, %v4078_v34 }
 0x494   : > { %5708 = vpow2.f32 %v4095_v54  ;;  %4317 = vadd.xlane.f32.xlu1 %v8165_v1  ;;  %4125 = vadd.xlane.f32.xlu2 %v5707_v47 }
 0x497   : > { %v8261_v25 = vpop.xlane.xlu1 %4049 }
 0x498   : > { %v4079_v19 = vsub.f32 %v8105_v7, %v8261_v25 }
 0x49a   : > { %v5709_v60 = vpop.eup %5708  ;;  %v4097_v31 = vmul.f32 1.442695, %v4079_v19 }
 0x49b   : > { %4127 = vadd.xlane.f32.xlu0 %v5709_v60 }
 0x49c   : > { %5710 = vpow2.f32 %v4097_v31 }
 0x49f   : > { %v8267_v38 = vpop.xlane.xlu1 %4051 }
 0x4a0   : > { %v4080_v21 = vsub.f32 %v8117_v53, %v8267_v38 }
 0x4a2   : > { %v5711_v17 = vpop.eup %5710  ;;  %v4099_v12 = vmul.f32 1.442695, %v4080_v21 }
 0x4a3   : > { %4129 = vadd.xlane.f32.xlu1 %v5711_v17 }
 0x4a4   : > { %5712 = vpow2.f32 %v4099_v12 }
 0x4a7   : > { %v8271_v56 = vpop.xlane.xlu2 %4053 }
 0x4a8   : > { %v4081_v7 = vsub.f32 %v8127_v49, %v8271_v56 }
 0x4aa   : > { %v5713_v18 = vpop.eup %5712  ;;  %v4101_v51 = vmul.f32 1.442695, %v4081_v7 }
 0x4ab   : > { %4131 = vadd.xlane.f32.xlu2 %v5713_v18 }
 0x4ac   : > { %5714 = vpow2.f32 %v4101_v51 }
 0x4af   : > { %v8275_v23 = vpop.xlane.xlu2 %4055 }
 0x4b0   : > { %v4082_v58 = vsub.f32 %v8136_v27, %v8275_v23 }
 0x4b2   : > { %v5715_v36 = vpop.eup %5714  ;;  %v4103_v53 = vmul.f32 1.442695, %v4082_v58 }
 0x4b3   : > { %4133 = vadd.xlane.f32.xlu2 %v5715_v36 }
 0x4b4   : > { %5716 = vpow2.f32 %v4103_v53 }
 0x4b7   : > { %v8279_v6 = vpop.xlane.xlu0 %4057 }
 0x4b8   : > { %v4083_v1 = vsub.f32 %v8147_v32, %v8279_v6 }
 0x4ba   : > { %v5717_v45 = vpop.eup %5716  ;;  %v4105_v49 = vmul.f32 1.442695, %v4083_v1 }
 0x4bb   : > { %4135 = vadd.xlane.f32.xlu2 %v5717_v45 }
 0x4bc   : > { %5718 = vpow2.f32 %v4105_v49 }
 0x4bf   : > { %v8283_v14 = vpop.xlane.xlu1 %4059 }
 0x4c0   : > { %v4084_v33 = vsub.f32 %v8154_v9, %v8283_v14 }
 0x4c2   : > { %v5719_v42 = vpop.eup %5718  ;;  %v4107_v27 = vmul.f32 1.442695, %v4084_v33 }
 0x4c3   : > { %4137 = vadd.xlane.f32.xlu2 %v5719_v42  ;;  %v8343_v42 = vshrl.u32 %v3975_v50, 7 }
 0x4c4   : > { %5720 = vpow2.f32 %v4107_v27  ;;  %v8347_v27 = vstv %s4863_s15 }
 0x4c7   : > { %v8287_v48 = vpop.xlane.xlu2 %4061 }
 0x4c8   : > { %v4085_v46 = vsub.f32 %v8163_v29, %v8287_v48 }
 0x4ca   : > { %v5721_v24 = vpop.eup %5720  ;;  %v4109_v32 = vmul.f32 1.442695, %v4085_v46 }
 0x4cb   : > { %4139 = vadd.xlane.f32.xlu0 %v5721_v24 }
 0x4cc   : > { %5722 = vpow2.f32 %v4109_v32  ;;  %v3979_v32 = vadd.s32 8, %v8343_v42 }
 0x4cf   : > { %v8291_v28 = vpop.xlane.xlu0 %4063 }
 0x4d0   : > { %v4086_v55 = vsub.f32 %v8172_v16, %v8291_v28 }
 0x4d2   : > { %v5723_v37 = vpop.eup %5722  ;;  %v4111_v9 = vmul.f32 1.442695, %v4086_v55 }
 0x4d3   : > { %4141 = vadd.xlane.f32.xlu2 %v5723_v37 }
 0x4d4   : > { %5724 = vpow2.f32 %v4111_v9 }
 0x4d7   : > { %v8295_v57 = vpop.xlane.xlu1 %4065 }
 0x4d8   : > { %v4087_v11 = vsub.f32 %v8179_v15, %v8295_v57 }
 0x4da   : > { %v5725_v44 = vpop.eup %5724  ;;  %v4113_v29 = vmul.f32 1.442695, %v4087_v11  ;;  %v3996_v11 = vadd.s32 %v8347_v27, %v8343_v42 }
 0x4db   : > { %4143 = vadd.xlane.f32.xlu1 %v5725_v44  ;;  %v3980_v44 = vadd.s32 16, %v8343_v42 }
 0x4dc   : > { %5726 = vpow2.f32 %v4113_v29  ;;  %vm4013_vm8 = vcmp.lt.s32.totalorder %v3996_v11, 256 }
 0x4df   : > { %v8299_v10 = vpop.xlane.xlu2 %4067 }
 0x4e0   : > { %v4088_v52 = vsub.f32 %v8191_v39, %v8299_v10 }
 0x4e2   : > { %v5727_v59 = vpop.eup %5726  ;;  %v4115_v16 = vmul.f32 1.442695, %v4088_v52 }
 0x4e3   : > { %4145 = vadd.xlane.f32.xlu0 %v5727_v59 }
 0x4e4   : > { %5728 = vpow2.f32 %v4115_v16  ;;  %v3997_v16 = vadd.s32 %v8347_v27, %v3979_v32 }
 0x4e6   : > { %vm4014_vm9 = vcmp.lt.s32.totalorder %v3997_v16, 256  ;;  %v3987_v16 = vadd.s32 72, %v8343_v42 }
 0x4e7   : > { %v8303_v13 = vpop.xlane.xlu2 %4309  ;;  %v8305_v41 = vpop.xlane.xlu0 %4069 }
 0x4e8   : > { %v4089_v15 = vsub.f32 %v8203_v20, %v8305_v41 }
 0x4ea   : > { %v5729_v22 = vpop.eup %5728  ;;  %v4117_v5 = vmul.f32 1.442695, %v4089_v15  ;;  %v3981_v15 = vadd.s32 24, %v8343_v42 }
 0x4eb   : > { %4147 = vadd.xlane.f32.xlu2 %v5729_v22  ;;  %v3982_v22 = vadd.s32 32, %v8343_v42 }
 0x4ec   : > { %5730 = vpow2.f32 %v4117_v5 }
 0x4ef   : > { %v8309_v34 = vpop.xlane.xlu1 %4071  ;;  %v8311_v47 = vpop.xlane.xlu2 %4315 }
 0x4f0   : > { %v4090_v39 = vsub.f32 %v8217_v35, %v8309_v34 }
 0x4f2   : > { %v5731_v54 = vpop.eup %5730  ;;  %v4119_v19 = vmul.f32 1.442695, %v4090_v39 }
 0x4f3   : > { %4149 = vadd.xlane.f32.xlu1 %v5731_v54 }
 0x4f4   : > { %5732 = vpow2.f32 %v4119_v19 }
 0x4f7   : > { %v8315_v60 = vpop.xlane.xlu2 %4073  ;;  %v8331_v51 = vpop.xlane.xlu1 %4305 }
 0x4f8   : > { %v4091_v20 = vsub.f32 %v8231_v26, %v8315_v60 }
 0x4fa   : > { %v5733_v31 = vpop.eup %5732  ;;  %v4121_v21 = vmul.f32 1.442695, %v4091_v20  ;;  %v3998_v20 = vadd.s32 %v8347_v27, %v3980_v44  ;;  %v3986_v44 = vadd.s32 64, %v8343_v42 }
 0x4fb   : > { %4151 = vadd.xlane.f32.xlu0 %v5733_v31 }
 0x4fc   : > { %5734 = vpow2.f32 %v4121_v21  ;;  %vm4015_vm11 = vcmp.lt.s32.totalorder %v3998_v20, 256 }
 0x4ff   : > { %v8319_v17 = vpop.xlane.xlu2 %4075  ;;  %v8335_v36 = vpop.xlane.xlu1 %4311 }
 0x500   : > { %v4092_v12 = vsub.f32 %v8248_v63, %v8319_v17  ;;  %v8329_v63 = vpop.xlane.xlu0 %4307 }
 0x502   : > { %v5735_v7 = vpop.eup %5734  ;;  %v4123_v35 = vmul.f32 1.442695, %v4092_v12  ;;  %v3999_v12 = vadd.s32 %v8347_v27, %v3981_v15 }
 0x503   : > { %4323 = vadd.xlane.f32.xlu0 %v8196_v2  ;;  %4153 = vadd.xlane.f32.xlu2 %v5735_v7  ;;  %v4000_v7 = vadd.s32 %v8347_v27, %v3982_v22 }
 0x504   : > { %5736 = vpow2.f32 %v4123_v35  ;;  %vm4016_vm12 = vcmp.lt.s32.totalorder %v3999_v12, 256 }
 0x505   : > { %vm4017_vm13 = vcmp.lt.s32.totalorder %v4000_v7, 256 }
 0x507   : > { %v4126_v26 = vpop.xlane.xlu2 %4125 }
 0x508   : > { %v8333_v58 = vpop.xlane.xlu0 %4313  ;;  %5738 = vlog2.f32 %v4126_v26 }
 0x50a   : > { %v5737_v18 = vpop.eup %5736 }
 0x50b   : > { %4329 = vadd.xlane.f32.xlu0 %v8233_v4  ;;  %4321 = vadd.xlane.f32.xlu2 %v8184_v3 }
 0x50c   : > { %4155 = vadd.xlane.f32.xlu1 %v5737_v18 }
 0x50e   : > { %v5739_v45 = vpop.eup %5738 }
 0x50f   : > { %v4158_v46 = vmul.f32 0.6931472, %v5739_v45 }
 0x510   : > { %v8337_v3 = vpop.xlane.xlu0 %4319 }
 0x511   : > { %v4189_v29 = vadd.f32 %v4158_v46, %v8237_v43 }
 0x513   : > { %4327 = vadd.xlane.f32.xlu2 %v8222_v61  ;;  %v8339_v61 = vpop.xlane.xlu1 %4317  ;;  %v4333_v43 = vsub.f32 %v4189_v29, %v8259_v8 }
 0x514   : > { %4325 = vadd.xlane.f32.xlu1 %v8208_v30 }
 0x518   : > { %v4128_v53 = vpop.xlane.xlu0 %4127 }
 0x519   : > { %5740 = vlog2.f32 %v4128_v53 }
 0x51c   : > { %4331 = vadd.xlane.f32.xlu1 %v8250_v0  ;;  %v4130_v0 = vpop.xlane.xlu1 %4129 }
 0x51d   : > { %5742 = vlog2.f32 %v4130_v0 }
 0x51e   : > { %v4132_v2 = vpop.xlane.xlu2 %4131 }
 0x51f   : > { %v5741_v49 = vpop.eup %5740  ;;  %5744 = vlog2.f32 %v4132_v2 }
 0x520   : > { %v4160_v24 = vmul.f32 0.6931472, %v5741_v49 }
 0x522   : > { %v4190_v52 = vadd.f32 %v4160_v24, %v8254_v40 }
 0x523   : > { %v5743_v33 = vpop.eup %5742 }
 0x524   : > { %v4162_v55 = vmul.f32 0.6931472, %v5743_v33  ;;  %v4334_v40 = vsub.f32 %v4190_v52, %v8265_v62  ;;  %v4349_v62 = vsel %vm4013_vm8, %v4333_v43, 0.0 }
 0x525   : > { %v5745_v9 = vpop.eup %5744  ;;  %v4366_v32 = vsel %vm4365_vm10, %v4349_v62, 0.0 }
 0x526   : > { %v4134_v4 = vpop.xlane.xlu2 %4133  ;;  %v4191_v39 = vadd.f32 %v4162_v55, %v8261_v25  ;;  %v4164_v54 = vmul.f32 0.6931472, %v5745_v9  ;;  %v3983_v25 = vadd.s32 40, %v8343_v42  ;;  %v3985_v55 = vadd.s32 56, %v8343_v42 }
 0x527   : > { %5746 = vlog2.f32 %v4134_v4  ;;  %v4350_v4 = vsel %vm4014_vm9, %v4334_v40, 0.0 }
 0x528   : > { %v4335_v35 = vsub.f32 %v4191_v39, %v8331_v51  ;;  %v4192_v18 = vadd.f32 %v4164_v54, %v8267_v38  ;;  %v3984_v51 = vadd.s32 48, %v8343_v42  ;;  %v4004_v39 = vadd.s32 %v8347_v27, %v3986_v44 }
 0x52a   : > { %v4351_v38 = vsel %vm4015_vm11, %v4335_v35, 0.0  ;;  %v4336_v49 = vsub.f32 %v4192_v18, %v8329_v63  ;;  %vm4021_vm1 = vcmp.lt.s32.totalorder %v4004_v39, 256 }
 0x52b   : > { %v4369_v63 = vsel %vm4365_vm10, %v4351_v38, 0.0 }
 0x52c   : > { %v4352_v29 = vsel %vm4016_vm12, %v4336_v49, 0.0 }
 0x52d   : > { %v5747_v59 = vpop.eup %5746 }
 0x52e   : > { %v4136_v30 = vpop.xlane.xlu2 %4135  ;;  %v4166_v31 = vmul.f32 0.6931472, %v5747_v59 }
 0x52f   : > { %5748 = vlog2.f32 %v4136_v30 }
 0x530   : > { %v4193_v30 = vadd.f32 %v4166_v31, %v8271_v56  ;;  %v4367_v56 = vsel %vm4365_vm10, %v4350_v4, 0.0 }
 0x532   : > { %v4337_v9 = vsub.f32 %v4193_v30, %v8303_v13  ;;  %v4368_v13 = vadd.f32 %v4367_v56, %v4366_v32  ;;  %v3989_v30 = vadd.s32 88, %v8343_v42 }
 0x534   : > { %v4353_v22 = vsel %vm4017_vm13, %v4337_v9, 0.0  ;;  %v4007_v56 = vadd.s32 %v8347_v27, %v3989_v30  ;;  %v3991_v9 = vadd.s32 104, %v8343_v42 }
 0x535   : > { %v5749_v19 = vpop.eup %5748  ;;  %v4373_v12 = vsel %vm4365_vm10, %v4353_v22, 0.0 }
 0x536   : > { %v4138_v1 = vpop.xlane.xlu2 %4137  ;;  %v4168_v26 = vmul.f32 0.6931472, %v5749_v19  ;;  %v4370_v19 = vadd.f32 %v4369_v63, %v4368_v13  ;;  %v3992_v13 = vadd.s32 112, %v8343_v42  ;;  %vm4024_vm4 = vcmp.lt.s32.totalorder %v4007_v56, 256 }
 0x537   : > { %5750 = vlog2.f32 %v4138_v1  ;;  %v4001_v1 = vadd.s32 %v8347_v27, %v3983_v25 }
 0x538   : > { %v4194_v33 = vadd.f32 %v4168_v26, %v8275_v23  ;;  %v4002_v23 = vadd.s32 %v8347_v27, %v3984_v51 }
 0x539   : > { %vm4018_vm14 = vcmp.lt.s32.totalorder %v4001_v1, 256 }
 0x53a   : > { %v4338_v52 = vsub.f32 %v4194_v33, %v8335_v36  ;;  %v4371_v36 = vsel %vm4365_vm10, %v4352_v29, 0.0  ;;  %vm4019_vm15 = vcmp.lt.s32.totalorder %v4002_v23, 256 }
 0x53b   : > { %v4372_v25 = vadd.f32 %v4371_v36, %v4370_v19  ;;  %v4010_v36 = vadd.s32 %v8347_v27, %v3992_v13 }
 0x53c   : > { %v4354_v43 = vsel %vm4018_vm14, %v4338_v52, 0.0 }
 0x53d   : > { %v5751_v21 = vpop.eup %5750  ;;  %v4375_v18 = vsel %vm4365_vm10, %v4354_v43, 0.0  ;;  %vm4027_vm7 = vcmp.lt.s32.totalorder %v4010_v36, 256 }
 0x53e   : > { %v4140_v37 = vpop.xlane.xlu0 %4139  ;;  %v4170_v53 = vmul.f32 0.6931472, %v5751_v21 }
 0x53f   : > { %5752 = vlog2.f32 %v4140_v37 }
 0x540   : > { %v4195_v11 = vadd.f32 %v4170_v53, %v8279_v6  ;;  %v4003_v6 = vadd.s32 %v8347_v27, %v3985_v55 }
 0x542   : > { %vm4020_vm0 = vcmp.lt.s32.totalorder %v4003_v6, 256 }
 0x545   : > { %v5753_v2 = vpop.eup %5752 }
 0x546   : > { %v4142_v50 = vpop.xlane.xlu2 %4141  ;;  %v4172_v46 = vmul.f32 0.6931472, %v5753_v2  ;;  %v4374_v2 = vadd.f32 %v4373_v12, %v4372_v25 }
 0x547   : > { %5754 = vlog2.f32 %v4142_v50 }
 0x548   : > { %v4196_v59 = vadd.f32 %v4172_v46, %v8283_v14  ;;  %v4376_v53 = vadd.f32 %v4375_v18, %v4374_v2 }
 0x54a   : > { %v4340_v40 = vsub.f32 %v4196_v59, %v8311_v47 }
 0x54d   : > { %v5755_v8 = vpop.eup %5754 }
 0x54e   : > { %v4144_v5 = vpop.xlane.xlu1 %4143  ;;  %v4174_v37 = vmul.f32 0.6931472, %v5755_v8  ;;  %v4356_v8 = vsel %vm4020_vm0, %v4340_v40, 0.0 }
 0x54f   : > { %5756 = vlog2.f32 %v4144_v5  ;;  %v4339_v5 = vsub.f32 %v4195_v11, %v8333_v58  ;;  %v3988_v58 = vadd.s32 80, %v8343_v42  ;;  %v4379_v51 = vsel %vm4365_vm10, %v4356_v8, 0.0 }
 0x550   : > { %v4197_v15 = vadd.f32 %v4174_v37, %v8287_v48  ;;  %v4005_v48 = vadd.s32 %v8347_v27, %v3987_v16  ;;  %v3990_v11 = vadd.s32 96, %v8343_v42 }
 0x551   : > { %v4355_v35 = vsel %vm4019_vm15, %v4339_v5, 0.0  ;;  %v4006_v62 = vadd.s32 %v8347_v27, %v3988_v58 }
 0x552   : > { %v4341_v7 = vsub.f32 %v4197_v15, %v8339_v61  ;;  %vm4022_vm2 = vcmp.lt.s32.totalorder %v4005_v48, 256  ;;  %v4377_v4 = vsel %vm4365_vm10, %v4355_v35, 0.0  ;;  %v4009_v15 = vadd.s32 %v8347_v27, %v3991_v9 }
 0x553   : > { %v4378_v49 = vadd.f32 %v4377_v4, %v4376_v53  ;;  %vm4023_vm3 = vcmp.lt.s32.totalorder %v4006_v62, 256  ;;  %v4008_v22 = vadd.s32 %v8347_v27, %v3990_v11 }
 0x554   : > { %v4357_v61 = vsel %vm4021_vm1, %v4341_v7, 0.0  ;;  %vm4026_vm5 = vcmp.lt.s32.totalorder %v4009_v15, 256 }
 0x555   : > { %v5757_v45 = vpop.eup %5756  ;;  %v4381_v33 = vsel %vm4365_vm10, %v4357_v61, 0.0  ;;  %v4380_v44 = vadd.f32 %v4379_v51, %v4378_v49  ;;  %vm4025_vm6 = vcmp.lt.s32.totalorder %v4008_v22, 256 }
 0x556   : > { %v4146_v0 = vpop.xlane.xlu0 %4145  ;;  %v4176_v50 = vmul.f32 0.6931472, %v5757_v45 }
 0x557   : > { %5758 = vlog2.f32 %v4146_v0  ;;  %v4382_v16 = vadd.f32 %v4381_v33, %v4380_v44 }
 0x558   : > { %v4198_v14 = vadd.f32 %v4176_v50, %v8291_v28 }
 0x55a   : > { %v4342_v47 = vsub.f32 %v4198_v14, %v8337_v3 }
 0x55c   : > { %v4358_v45 = vsel %vm4022_vm2, %v4342_v47, 0.0 }
 0x55d   : > { %v5759_v20 = vpop.eup %5758 }
 0x55e   : > { %v4148_v24 = vpop.xlane.xlu2 %4147  ;;  %v4178_v26 = vmul.f32 0.6931472, %v5759_v20 }
 0x55f   : > { %5760 = vlog2.f32 %v4148_v24 }
 0x560   : > { %v4199_v3 = vadd.f32 %v4178_v26, %v8295_v57  ;;  %v4383_v57 = vsel %vm4365_vm10, %v4358_v45, 0.0 }
 0x561   : > { %v4384_v5 = vadd.f32 %v4383_v57, %v4382_v16 }
 0x565   : > { %v5761_v28 = vpop.eup %5760 }
 0x566   : > { %v4150_v31 = vpop.xlane.xlu1 %4149  ;;  %v4180_v0 = vmul.f32 0.6931472, %v5761_v28 }
 0x568   : > { %v4200_v63 = vadd.f32 %v4180_v0, %v8299_v10 }
 0x56e   : > { %v4152_v54 = vpop.xlane.xlu0 %4151 }
 0x56f   : > { %5762 = vlog2.f32 %v4152_v54 }
 0x575   : > { %v5763_v1 = vpop.eup %5762 }
 0x576   : > { %v4154_v21 = vpop.xlane.xlu2 %4153  ;;  %v4324_v46 = vpop.xlane.xlu0 %4323  ;;  %v4184_v23 = vmul.f32 0.6931472, %v5763_v1 }
 0x577   : > { %5764 = vlog2.f32 %v4154_v21  ;;  %v4344_v59 = vsub.f32 %v4200_v63, %v4324_v46 }
 0x578   : > { %5766 = vlog2.f32 %v4150_v31  ;;  %v4202_v39 = vadd.f32 %v4184_v23, %v8309_v34  ;;  %v3993_v31 = vadd.s32 120, %v8343_v42 }
 0x579   : > { %v4360_v54 = vsel %vm4024_vm4, %v4344_v59, 0.0 }
 0x57d   : > { %v5765_v38 = vpop.eup %5764 }
 0x57e   : > { %v4322_v24 = vpop.xlane.xlu2 %4321  ;;  %v5767_v32 = vpop.eup %5766  ;;  %v4186_v50 = vmul.f32 0.6931472, %v5765_v38 }
 0x57f   : > { %v4343_v55 = vsub.f32 %v4199_v3, %v4322_v24  ;;  %v4156_v37 = vpop.xlane.xlu1 %4155  ;;  %v4182_v52 = vmul.f32 0.6931472, %v5767_v32  ;;  %v4330_v21 = vpop.xlane.xlu0 %4329 }
 0x580   : > { %5768 = vlog2.f32 %v4156_v37  ;;  %v4203_v10 = vadd.f32 %v4186_v50, %v8315_v60  ;;  %v4387_v60 = vsel %vm4365_vm10, %v4360_v54, 0.0 }
 0x581   : > { %v4359_v29 = vsel %vm4023_vm3, %v4343_v55, 0.0  ;;  %v4201_v20 = vadd.f32 %v4182_v52, %v8305_v41  ;;  %v4011_v41 = vadd.s32 %v8347_v27, %v3993_v31 }
 0x582   : > { %v4385_v6 = vsel %vm4365_vm10, %v4359_v29, 0.0  ;;  %v4347_v12 = vsub.f32 %v4203_v10, %v4330_v21 }
 0x583   : > { %v4386_v19 = vadd.f32 %v4385_v6, %v4384_v5  ;;  %vm4028_vm8 = vcmp.lt.s32.totalorder %v4011_v41, 256 }
 0x584   : > { %v4363_v42 = vsel %vm4027_vm7, %v4347_v12, 0.0 }
 0x585   : > { %v4388_v35 = vadd.f32 %v4387_v60, %v4386_v19  ;;  %v4393_v4 = vsel %vm4365_vm10, %v4363_v42, 0.0 }
 0x586   : > { %v4328_v14 = vpop.xlane.xlu2 %4327  ;;  %v5769_v43 = vpop.eup %5768 }
 0x587   : > { %v4346_v40 = vsub.f32 %v4202_v39, %v4328_v14  ;;  %v4326_v48 = vpop.xlane.xlu1 %4325  ;;  %v4188_v34 = vmul.f32 0.6931472, %v5769_v43 }
 0x588   : > { %v4345_v58 = vsub.f32 %v4201_v20, %v4326_v48 }
 0x589   : > { %v4362_v7 = vsel %vm4026_vm5, %v4346_v40, 0.0  ;;  %v4204_v26 = vadd.f32 %v4188_v34, %v8319_v17 }
 0x58a   : > { %v4361_v25 = vsel %vm4025_vm6, %v4345_v58, 0.0  ;;  %v4391_v47 = vsel %vm4365_vm10, %v4362_v7, 0.0 }
 0x58b   : > { %v4389_v28 = vsel %vm4365_vm10, %v4361_v25, 0.0 }
 0x58c   : > { %v4390_v18 = vadd.f32 %v4389_v28, %v4388_v35 }
 0x58e   : > { %v4392_v2 = vadd.f32 %v4391_v47, %v4390_v18 }
 0x58f   : > { %v4332_v8 = vpop.xlane.xlu1 %4331 }
 0x590   : > { %v4348_v62 = vsub.f32 %v4204_v26, %v4332_v8  ;;  %v4394_v30 = vadd.f32 %v4393_v4, %v4392_v2 }
 0x592   : > { %v4364_v61 = vsel %vm4028_vm8, %v4348_v62, 0.0 }
 0x593   : > { %v4395_v53 = vsel %vm4365_vm10, %v4364_v61, 0.0 }
 0x594   : > { %v4396_v27 = vadd.f32 %v4395_v53, %v4394_v30 }
 0x596   : > { %4397 = vadd.xlane.f32.xlu2 %v4396_v27 }
 0x597   : > { %5926 = shalt.err (!%p5923_p12)
}
 0x598   : > { %s6016_s11 = smov 128   ;;  %s6017_s7 = smov 8  }
 0x599   : > { %5598 = dma.vmem_to_hbm [thread:$0]  (%p6145_p3), %s4427_s23, 2048, %s4429_s18, %s4409_s13, %s6016_s11, %s6016_s11, %s6017_s7  }
 0x59a   : > { %s4620_s24 = sshll.u32 %s6203_s20, 3  ;;  %s4868_s19 = sshll.u32 %s6094_s17, 3 }
 0x59b   : > { %s8518_s26 = sld [smem:[#allocation27_spill]]  ;;  %s481_s30 = scalar_lea.vmem [#allocation11], %s4620_s24 }
 0x59c   : > { %s4443_s12 = sshll.u32 %s481_s30, 4  ;;  %s4414_s23 = scalar_lea.sflag [#allocation12], %s6203_s20  ;;  %s4444_s12 = int_to_ptr.vmem [resolvable:$true] %s4443_s12 }
 0x5a1   : > { %s4441_s29 = scalar_lea.hbm %s8518_s26, %s4868_s19  ;;  %s5947_s3 = scalar_lea.hbm %s8518_s26, 16 }
 0x5a2   : > { %s4445_s25 = sshll.u32 %s4441_s29, 4  ;;  %s4446_s25 = int_to_ptr.hbm [resolvable:$true] %s4445_s25 }
 0x5a3   : > { %s5941_s13 = sshra.s32 %s4446_s25, 4  ;;  %s5942_s13 = int_to_ptr.hbm [resolvable:$true] %s5941_s13 }
 0x5a4   : > { %s5943_s22 = scalar_lea.hbm %s5942_s13, 8  ;;  %p5948_p7 = scmp.lt.s32.totalorder %s5942_s13, %s8518_s26 }
 0x5a5   : > { %p5944_p13 = scmp.ne.s32.totalorder %s5942_s13, %s5943_s22  ;;  %p5949_p1 = scmp.lt.s32.totalorder %s5947_s3, %s5943_s22 }
 0x5a7   : > { %p5945_p0 = pnand %p5944_p13, %p6145_p3  ;;  %p5950_p4 = por %p5949_p1, %p5948_p7 }
 0x5a9   : > { %p5946_p5 = pneg %p5945_p0 }
 0x5ab   : > { %p5951_p8 = pnand %p5950_p4, %p5946_p5 }
 0x609   : > { %v4398_v17 = vpop.xlane.xlu2 %4397 }
 0x60a   : > { %v4399_v0 = vrot.slane %v4398_v17, 4 }
 0x60c   : > { %v4400_v1 = vadd.f32 %v4399_v0, %v4398_v17 }
 0x60e   : > { %v4401_v51 = vrot.slane %v4400_v1, 2 }
 0x610   : > { %v4402_v45 = vadd.f32 %v4401_v51, %v4400_v1 }
 0x612   : > { %v4403_v3 = vrot.slane %v4402_v45, 1 }
 0x614   : > { %v4404_v38 = vadd.f32 %v4403_v3, %v4402_v45 }
 0x616   : > { %5584 = vpush %v4404_v38 }
 0x647   : > { %s5585_s18 = spop %5584 }
 0x648   : > { %v4406_v49 = vstv %s5585_s18 }
 0x649   : > { %4407 = vst [vmem:[%s481_s30] sm:$0xff] %v4406_v49 }
 0x64a   : > { %5954 = shalt.err (!%p5951_p8)
}
 0x64b   : > { %5599 = dma.vmem_to_hbm [thread:$0]  (%p6145_p3), %s4444_s12, 128, %s4446_s25, %s4414_s23  }
 0x64c PF: > { %s8519_s20 = sld [smem:[#allocation19_spill]]  ;;  %p8521_p2 = scmp.ge.s32.totalorder %s6009_s16, 2 }
 0x64e   : > { %p5617_p10 = pnand %p8521_p2, %p6108_p6 }
 0x650   : > { %p5618_p9 = pneg %p5617_p10 }
 0x652   : > { %s4457_s7 = sand.u32 1, %s8519_s20  }
 0x653   : > { %s4458_s24 = scalar_lea.sflag [#allocation4], %s4457_s7 }
 0x654   : > { %5988 = dma.done.wait (%p5618_p9), %s4458_s24, 2048  }
 0x655   : > { %5990 = vsyncadd (%p5618_p9), %s4458_s24, 4294965248  ;;  %s4468_s19 = scalar_lea.sflag [#allocation12], %s4457_s7 }
 0x656   : > { %5992 = dma.done.wait (%p5618_p9), %s4468_s19, 128  }
 0x657   : > { %5994 = vsyncadd (%p5618_p9), %s4468_s19, 4294967168  ;;  %s8522_s16 = sld [smem:[#allocation22_spill]]  ;;  %s8525_s13 = smov %s6001_s14 }
 0x658   : > { %s8523_s28 = sld [smem:[#allocation20_spill]] }
 0x659   : > { %s8524_s15 = sld [smem:[#allocation23_spill]] }
 0x65d   : > { %p31_p3 = scmp.ge.s32.totalorder %s8522_s16, 4  }
 0x65e   : > { %s8526_s14 = smov %s8523_s28 }
 0x65f   :  { %33 = sbr.rel (!%p31_p3) target bundleno = 15 (0xf), region = 145 }
 0x664   :  { %4474 = vsyncpa [#allocation3], 1 }
 0x665   :  { %4476 = vsyncpa [#allocation3 + $0x1], 1 }
 0x666   :  { %4477 = vsyncpa [#allocation6], 1 }
 0x667   :  { %4479 = vsyncpa [#allocation6 + $0x1], 1 }
 0x668   :  { %4480 = vsyncpa [#allocation9], 1 }
 0x669   :  { %4481 = vsyncpa [#allocation4], 1 }
 0x66a   :  { %4483 = vsyncpa [#allocation4 + $0x1], 1 }
 0x66b   :  { %4484 = vsyncpa [#allocation12], 1 }
 0x66c   :  { %4486 = vsyncpa [#allocation12 + $0x1], 1 }

</bundles_post_ra>
